<compile_context>
chip_gen: v6e
topology: v6e:2x2x1
jax: 0.10.0
libtpu: 0.0.40
codegen_flags: <defaults>
</compile_context>

<pallas_src>
import functools

import numpy as np
import jax
import jax.numpy as jnp
from jax import lax
from jax.experimental import pallas as pl
from jax.experimental.pallas import tpu as pltpu

KSIZE = 7     # conv kernel size
STRIDE = 4    # conv stride
PAD = 1       # conv padding
NOUT = 3      # output channels of the second conv
BLOCK_B = 64  # images per grid step (rounded down to what the batch needs)


def _round_up(x, m):
    return (x + m - 1) // m * m


def _conv_out(n):
    return (n + 2 * PAD - KSIZE) // STRIDE + 1


# --------------------------- fused Pallas kernel ----------------------------

def _netE_kernel(x_ref, w1_ref, b1_ref, w2_ref, out_ref):
    """One batch tile per grid step.  Whole network = two MXU matmuls plus an
    f32 epilogue; nothing intermediate touches HBM."""
    # conv1 (dense expanded weight): bf16 x bf16 -> f32
    xb = x_ref[...].astype(jnp.bfloat16)
    h1 = jnp.dot(xb, w1_ref[...], preferred_element_type=jnp.float32)
    h1 = h1 + b1_ref[...]                       # bias (zero on padded columns)
    h1 = jnp.where(h1 > 0, h1, 0.1 * h1)        # LeakyReLU(0.1)

    # conv2 (dense expanded weight, zero rows for padded h1 columns)
    y = jnp.dot(h1.astype(jnp.bfloat16), w2_ref[...],
                preferred_element_type=jnp.float32)

    # exact sigmoid, one lane-dense store for the whole tile
    out_ref[...] = 1.0 / (1.0 + jnp.exp(-y))


# ------------------------------ JAX wrappers --------------------------------

def spectral_normalize(w, n_iter=30):
    """SNConv2d weight scaling: W / sigma_max(W.view(out, -1)).
    Power iteration from a deterministic start (PyTorch keeps a persistent
    random `u`; the estimated sigma converges to the same value)."""
    out = w.shape[0]
    w_mat = w.reshape(out, -1)
    u0 = jnp.ones((out,), w.dtype) / jnp.sqrt(jnp.asarray(out, w.dtype))

    def body(_, u):
        v = w_mat.T @ u
        v = v / (jnp.linalg.norm(v) + 1e-12)
        u = w_mat @ v
        u = u / (jnp.linalg.norm(u) + 1e-12)
        return u

    u = lax.fori_loop(0, n_iter, body, u0)
    v = w_mat.T @ u
    v = v / (jnp.linalg.norm(v) + 1e-12)
    sigma = u @ (w_mat @ v)
    return w / sigma


def prepare_params(w1, b1, w2, image_hw, n_power_iter=30):
    """Hoisted parameter setup (spectral norm + dense conv->matmul expansion).
    Run once; the jitted forward only consumes the prepared tensors."""
    H, W = image_hw
    ndf, nc = int(w1.shape[0]), int(w1.shape[1])
    w1_sn = spectral_normalize(w1, n_power_iter)
    w2_sn = spectral_normalize(w2, n_power_iter)

    H1, W1 = _conv_out(H), _conv_out(W)
    H2, W2 = _conv_out(H1), _conv_out(W1)
    m1, m2 = H1 * W1, H2 * W2
    K1 = nc * H * W
    N1P = _round_up(m1 * ndf, 128)          # h1 width, lane-aligned
    M2P = _round_up(m2 * NOUT, 128)         # output width, lane-aligned

    w1_np = np.asarray(jax.device_get(w1_sn), np.float32)   # (ndf, nc, 7, 7)
    w2_np = np.asarray(jax.device_get(w2_sn), np.float32)   # (3, ndf, 7, 7)
    b1_np = np.asarray(jax.device_get(b1), np.float32)      # (ndf,)

    # conv1 as a dense (K1, N1P) matrix acting on NCHW-flattened images.
    # h1 column layout: (oh*W1 + ow) * ndf + co ; padded columns stay zero.
    w1big = np.zeros((K1, N1P), np.float32)
    for oh in range(H1):
        for ow in range(W1):
            p = oh * W1 + ow
            for kh in range(KSIZE):
                ih = oh * STRIDE - PAD + kh
                if ih < 0 or ih >= H:
                    continue
                for kw in range(KSIZE):
                    iw = ow * STRIDE - PAD + kw
                    if iw < 0 or iw >= W:
                        continue
                    rows = np.arange(nc) * (H * W) + ih * W + iw
                    w1big[rows, p * ndf:(p + 1) * ndf] = w1_np[:, :, kh, kw].T

    # bias broadcast over spatial positions (zero on padded columns)
    b1big = np.zeros((1, N1P), np.float32)
    b1big[0, :m1 * ndf] = np.tile(b1_np, m1)

    # conv2 as a dense (N1P, M2P) matrix.
    # output column layout matches PyTorch's per-image (c, h2, w2) flatten:
    #   col = co2 * (H2*W2) + oh2*W2 + ow2 ; padded rows/cols stay zero.
    w2big = np.zeros((N1P, M2P), np.float32)
    for oh2 in range(H2):
        for ow2 in range(W2):
            p2 = oh2 * W2 + ow2
            for kh in range(KSIZE):
                ih = oh2 * STRIDE - PAD + kh
                if ih < 0 or ih >= H1:
                    continue
                for kw in range(KSIZE):
                    iw = ow2 * STRIDE - PAD + kw
                    if iw < 0 or iw >= W1:
                        continue
                    p1 = ih * W1 + iw
                    cols = np.arange(NOUT) * m2 + p2
                    w2big[p1 * ndf:(p1 + 1) * ndf, cols] = w2_np[:, :, kh, kw].T

    params = dict(
        w1big=jnp.asarray(w1big, jnp.bfloat16),
        b1big=jnp.asarray(b1big, jnp.float32),
        w2big=jnp.asarray(w2big, jnp.bfloat16),
    )
    return params, (w1_sn, w2_sn)


@jax.jit
def netE_forward(x_nchw, params):
    """Fused forward of _netE. x: (B, nc, H, W) f32 -> (B*H2*W2, 3) f32."""
    B, nc, H, W = x_nchw.shape
    w1big, b1big, w2big = params["w1big"], params["b1big"], params["w2big"]
    K1 = nc * H * W
    N1P = w1big.shape[1]
    M2P = w2big.shape[1]
    H1, W1 = _conv_out(H), _conv_out(W)
    H2, W2 = _conv_out(H1), _conv_out(W1)
    m2 = H2 * W2

    # NCHW flatten is a contiguous reshape: no data movement, no im2col.
    xf = x_nchw.reshape(B, K1)

    # batch tile: multiple of 8, capped at BLOCK_B; pad batch to a multiple.
    BT = min(BLOCK_B, _round_up(B, 8))
    Bp = _round_up(B, BT)
    if Bp != B:
        xf = jnp.pad(xf, ((0, Bp - B), (0, 0)))

    out = pl.pallas_call(
        _netE_kernel,
        out_shape=jax.ShapeDtypeStruct((Bp, M2P), jnp.float32),
        grid=(Bp // BT,),
        in_specs=[
            pl.BlockSpec((BT, K1), lambda i: (i, 0)),
            pl.BlockSpec((K1, N1P), lambda i: (0, 0)),
            pl.BlockSpec((1, N1P), lambda i: (0, 0)),
            pl.BlockSpec((N1P, M2P), lambda i: (0, 0)),
        ],
        out_specs=pl.BlockSpec((BT, M2P), lambda i: (i, 0)),
        compiler_params=pltpu.CompilerParams(
            dimension_semantics=("parallel",)),
    )(xf, w1big, b1big, w2big)

    # PyTorch: output is (B, 3, H2, W2); .view(-1, 3).squeeze(1)
    # Kernel columns are already in per-image (c, h2, w2) order.
    y = out[:B, :m2 * NOUT].reshape(-1, NOUT)
    return y


def netE_reference(x_nchw, w1_sn, b1, w2_sn):
    """Pure-XLA f32 reference (lax.conv) for correctness checking."""
    dn = ("NCHW", "OIHW", "NCHW")
    h = lax.conv_general_dilated(
        x_nchw, w1_sn, (STRIDE, STRIDE), [(PAD, PAD), (PAD, PAD)],
        dimension_numbers=dn, precision=lax.Precision.HIGHEST)
    h = h + b1.reshape(1, -1, 1, 1)
    h = jnp.where(h > 0, h, 0.1 * h)
    y = lax.conv_general_dilated(
        h, w2_sn, (STRIDE, STRIDE), [(PAD, PAD), (PAD, PAD)],
        dimension_numbers=dn, precision=lax.Precision.HIGHEST)
    y = jax.nn.sigmoid(y)
    return y.reshape(-1, NOUT)


if __name__ == "__main__":
    # 32x32 input -> conv1 (k7,s4,p1) -> 7x7 -> conv2 -> 1x1  => output (B, 3)
    B, nc, ndf, H, W = 2, 3, 8, 32, 32   # ncontext / ndiscriminators unused
    key = jax.random.PRNGKey(0)
    kx, kw1, kb1, kw2 = jax.random.split(key, 4)
    x = jax.random.normal(kx, (B, nc, H, W), jnp.float32)
    w1 = 0.05 * jax.random.normal(kw1, (ndf, nc, KSIZE, KSIZE), jnp.float32)
    b1 = 0.05 * jax.random.normal(kb1, (ndf,), jnp.float32)
    w2 = 0.05 * jax.random.normal(kw2, (NOUT, ndf, KSIZE, KSIZE), jnp.float32)

    # hoisted parameter preparation (spectral norm + dense conv expansion)
    params, (w1_sn, w2_sn) = prepare_params(w1, b1, w2, (H, W))

    out = netE_forward(x, params)
    out = jax.block_until_ready(out)

    H2 = _conv_out(_conv_out(H))
    W2 = _conv_out(_conv_out(W))
    assert out.shape == (B * H2 * W2, NOUT), out.shape
    assert bool(jnp.all((out >= 0.0) & (out <= 1.0)))

    ref = netE_reference(x, w1_sn, b1, w2_sn)
    max_err = float(jnp.max(jnp.abs(out - ref)))
    assert max_err < 4e-2, f"mismatch vs XLA reference: {max_err}"

    print("KERNEL_OK")
</pallas_src>

<mosaic_0001>
module attributes {stable_mosaic.version = 11 : i64} {
  func.func @_netE_kernel(%arg0: i32, %arg1: memref<8x3072xf32, #tpu.memory_space<vmem>>, %arg2: memref<3072x512xbf16, #tpu.memory_space<vmem>>, %arg3: memref<1x512xf32, #tpu.memory_space<vmem>>, %arg4: memref<512x128xbf16, #tpu.memory_space<vmem>>, %arg5: memref<8x128xf32, #tpu.memory_space<vmem>>) attributes {dimension_semantics = [#tpu.dimension_semantics<parallel>], iteration_bounds = array<i64: 1>, scalar_prefetch = 0 : i64, scratch_operands = 0 : i64, tpu.core_type = #tpu.core_type<tc>, window_params = [{transform_indices = @transform_0, window_bounds = array<i64: 8, 3072>}, {pipeline_mode = #tpu.pipeline_mode<synchronous>, transform_indices = @transform_1, window_bounds = array<i64: 3072, 512>}, {pipeline_mode = #tpu.pipeline_mode<synchronous>, transform_indices = @transform_2, window_bounds = array<i64: 1, 512>}, {pipeline_mode = #tpu.pipeline_mode<synchronous>, transform_indices = @transform_3, window_bounds = array<i64: 512, 128>}, {transform_indices = @transform_4, window_bounds = array<i64: 8, 128>}]} {
    %c0 = arith.constant 0 : index
    %c0_0 = arith.constant 0 : index
    %0 = vector.load %arg1[%c0, %c0_0] : memref<8x3072xf32, #tpu.memory_space<vmem>>, vector<8x3072xf32>
    %1 = arith.truncf %0 : vector<8x3072xf32> to vector<8x3072xbf16>
    %c0_1 = arith.constant 0 : index
    %c0_2 = arith.constant 0 : index
    %2 = vector.load %arg2[%c0_1, %c0_2] : memref<3072x512xbf16, #tpu.memory_space<vmem>>, vector<3072x512xbf16>
    %cst = arith.constant dense<0.000000e+00> : vector<8x512xf32>
    %3 = tpu.matmul %1, %2, %cst {dimension_numbers = #tpu.dot_dimension_numbers<[1], [0], [0], [1], [0, 0, 1, 1], [], []>} : vector<8x3072xbf16>, vector<3072x512xbf16>, vector<8x512xf32> -> vector<8x512xf32>
    %c0_3 = arith.constant 0 : index
    %c0_4 = arith.constant 0 : index
    %4 = vector.load %arg3[%c0_3, %c0_4] : memref<1x512xf32, #tpu.memory_space<vmem>>, vector<1x512xf32>
    %5 = vector.broadcast %4 : vector<1x512xf32> to vector<8x512xf32>
    %6 = arith.addf %3, %5 : vector<8x512xf32>
    %cst_5 = arith.constant 0.000000e+00 : f32
    %7 = vector.broadcast %cst_5 : f32 to vector<8x512xf32>
    %8 = arith.cmpf ogt, %6, %7 : vector<8x512xf32>
    %cst_6 = arith.constant 1.000000e-01 : f32
    %9 = vector.broadcast %cst_6 : f32 to vector<8x512xf32>
    %10 = arith.mulf %9, %6 : vector<8x512xf32>
    %11 = arith.select %8, %6, %10 : vector<8x512xi1>, vector<8x512xf32>
    %12 = arith.truncf %11 : vector<8x512xf32> to vector<8x512xbf16>
    %c0_7 = arith.constant 0 : index
    %c0_8 = arith.constant 0 : index
    %13 = vector.load %arg4[%c0_7, %c0_8] : memref<512x128xbf16, #tpu.memory_space<vmem>>, vector<512x128xbf16>
    %cst_9 = arith.constant dense<0.000000e+00> : vector<8x128xf32>
    %14 = tpu.matmul %12, %13, %cst_9 {dimension_numbers = #tpu.dot_dimension_numbers<[1], [0], [0], [1], [0, 0, 1, 1], [], []>} : vector<8x512xbf16>, vector<512x128xbf16>, vector<8x128xf32> -> vector<8x128xf32>
    %cst_10 = arith.constant 0.000000e+00 : f32
    %15 = vector.broadcast %cst_10 : f32 to vector<8x128xf32>
    %16 = arith.subf %15, %14 : vector<8x128xf32>
    %17 = math.exp %16 : vector<8x128xf32>
    %cst_11 = arith.constant 1.000000e+00 : f32
    %18 = vector.broadcast %cst_11 : f32 to vector<8x128xf32>
    %19 = arith.addf %18, %17 : vector<8x128xf32>
    %cst_12 = arith.constant 1.000000e+00 : f32
    %20 = vector.broadcast %cst_12 : f32 to vector<8x128xf32>
    %21 = arith.divf %20, %19 : vector<8x128xf32>
    %c0_13 = arith.constant 0 : index
    %c0_14 = arith.constant 0 : index
    %22 = vector.load %arg5[%c0_13, %c0_14] : memref<8x128xf32, #tpu.memory_space<vmem>>, vector<8x128xf32>
    tpu.vector_store %arg5[%c0_13, %c0_14], %21 {strides = array<i32>} : memref<8x128xf32, #tpu.memory_space<vmem>>, vector<8x128xf32>,
    return
  }
  func.func @transform_0(%arg0: i32) -> (i32, i32) {
    %c0_i32 = arith.constant 0 : i32
    %c0_i32_0 = arith.constant 0 : i32
    return %arg0, %c0_i32 : i32, i32
  }
  func.func @transform_1(%arg0: i32) -> (i32, i32) {
    %c0_i32 = arith.constant 0 : i32
    %c0_i32_0 = arith.constant 0 : i32
    %c0_i32_1 = arith.constant 0 : i32
    return %c0_i32, %c0_i32_0 : i32, i32
  }
  func.func @transform_2(%arg0: i32) -> (i32, i32) {
    %c0_i32 = arith.constant 0 : i32
    %c0_i32_0 = arith.constant 0 : i32
    %c0_i32_1 = arith.constant 0 : i32
    return %c0_i32, %c0_i32_0 : i32, i32
  }
  func.func @transform_3(%arg0: i32) -> (i32, i32) {
    %c0_i32 = arith.constant 0 : i32
    %c0_i32_0 = arith.constant 0 : i32
    %c0_i32_1 = arith.constant 0 : i32
    return %c0_i32, %c0_i32_0 : i32, i32
  }
  func.func @transform_4(%arg0: i32) -> (i32, i32) {
    %c0_i32 = arith.constant 0 : i32
    %c0_i32_0 = arith.constant 0 : i32
    return %arg0, %c0_i32 : i32, i32
  }
}

</mosaic_0001>

<bundles_post_ra>
// kernel: netE_forward.1
= control target key start
LH: loop header
LB: loop body
LE: loop exit
PB: predicated region body
PF: predicated region fallthrough
CT: control target
= control target key end

     0   :  { %9 = vsyncpa [#allocation3], 0  ;;  %s8458_s0 = inlined_call_operand.vmem [shape: f32[8,3072], index: 0, kind: input, shape index: {}]   ;;  %s8459_s1 = inlined_call_operand.hbm [shape: bf16[3072,512], index: 1, kind: input, shape index: {}]   ;;  %s8460_s2 = inlined_call_operand.hbm [shape: f32[1,512], index: 2, kind: input, shape index: {}]   ;;  %s8461_s3 = inlined_call_operand.hbm [shape: bf16[512,128], index: 3, kind: input, shape index: {}]   ;;  %s8462_s4 = inlined_call_operand.vmem [shape: f32[8,128], index: 4, kind: output, shape index: {}]  }
   0x1   :  { %10 = vsyncpa [#allocation5], 0  ;;  %s8188_s15 = smov [#allocation4]   ;;  %s8189_s17 = smov [#allocation2]  }
   0x2   :  { %s31_s16 = sshll.u32 %s8188_s15, 4  ;;  %s18_s18 = sshll.u32 %s8189_s17, 4  ;;  %s32_s16 = int_to_ptr.vmem [resolvable:$true] %s31_s16  ;;  %s19_s18 = int_to_ptr.vmem [resolvable:$true] %s18_s18 }
   0x3   :  { %s8132_s19 = scalar_lea.vmem %s32_s16, 64  ;;  %p8137_p1 = scmp.lt.s32.totalorder %s32_s16, %s32_s16 }
   0x4   :  { %p8133_p0 = scmp.ne.s32.totalorder %s32_s16, %s8132_s19  ;;  %p8138_p2 = scmp.lt.s32.totalorder %s8132_s19, %s8132_s19 }
   0x6   :  { %p8139_p3 = por %p8138_p2, %p8137_p1 }
   0x8   :  { %p8140_p4 = pnand %p8139_p3, %p8133_p0 }
   0xa   :  { %8143 = shalt.err (!%p8140_p4)
}
   0xb   :  { %34 = dma.hbm_to_vmem [thread:$0]  %s8460_s2, 64, %s32_s16, [#allocation5]  }
   0xc   :  { %s8152_s22 = scalar_lea.vmem %s19_s18, 98304  ;;  %p8157_p6 = scmp.lt.s32.totalorder %s19_s18, %s19_s18 }
   0xd   :  { %p8153_p5 = scmp.ne.s32.totalorder %s19_s18, %s8152_s22  ;;  %p8158_p7 = scmp.lt.s32.totalorder %s8152_s22, %s8152_s22 }
   0xf   :  { %p8159_p8 = por %p8158_p7, %p8157_p6 }
  0x11   :  { %p8160_p9 = pnand %p8159_p8, %p8153_p5 }
  0x13   :  { %8163 = shalt.err (!%p8160_p9)
}
  0x14   :  { %s8190_s23 = smov 256   ;;  %s8191_s24 = smov 16  }
  0x15   :  { %24 = dma.hbm_to_vmem [thread:$0]  %s8459_s1, 98304, %s19_s18, [#allocation3], %s8190_s23, %s8190_s23, %s8191_s24  }
  0x16   :  { %s8192_s27 = smov [#allocation6]  }
  0x17   :  { %s40_s28 = sshll.u32 %s8192_s27, 4  ;;  %s41_s28 = int_to_ptr.vmem [resolvable:$true] %s40_s28 }
  0x18   :  { %s8172_s29 = scalar_lea.vmem %s41_s28, 4096  ;;  %p8177_p11 = scmp.lt.s32.totalorder %s41_s28, %s41_s28 }
  0x19   :  { %p8173_p10 = scmp.ne.s32.totalorder %s41_s28, %s8172_s29  ;;  %p8178_p12 = scmp.lt.s32.totalorder %s8172_s29, %s8172_s29 }
  0x1b   :  { %p8179_p13 = por %p8178_p12, %p8177_p11 }
  0x1d   :  { %p8180_p0 = pnand %p8179_p13, %p8173_p10 }
  0x1f   :  { %8183 = shalt.err (!%p8180_p0)
}
  0x20   :  { %s8193_s2 = smov 64   ;;  %s8194_s30 = smov 4  }
  0x21   :  { %46 = dma.hbm_to_vmem [thread:$0]  %s8461_s3, 4096, %s41_s28, [#allocation5], %s8193_s2, %s8193_s2, %s8194_s30  }
  0x22   :  { %8184 = dma.done.wait [#allocation3], 98304  }
  0x23   :  { %8185 = vsyncadd [#allocation3], 4294868992 }
  0x24   :  { %8186 = dma.done.wait [#allocation5], 4160  }
  0x25   :  { %8187 = vsyncadd [#allocation5], 4294963136  ;;  %v6935_v0 = vld [vmem:[#allocation2 + $0xe4] ss:$16 sps:$4 sm:$0xff]   ;;  %v6939_v2 = vld [vmem:[#allocation2 + $0xe0] ss:$16 sps:$4 sm:$0xff]  }
  0x26   :  { %v6937_v1 = vld [vmem:[#allocation2 + $0x2e4] ss:$16 sps:$4 sm:$0xff]   ;;  %4735 = vmatprep.subr.bf16.mxu0 %v6935_v0  ;;  %v6940_v3 = vld [vmem:[#allocation2 + $0x2e0] ss:$16 sps:$4 sm:$0xff]   ;;  %v58_v46 = vld [vmem:[%s8458_s0 + $0x8] sm:$0xff] }
  0x27   :  { %4776 = vmatprep.subr.bf16.mxu1 %v6937_v1  ;;  %v6941_v4 = vld [vmem:[#allocation2 + $0xc4] ss:$16 sps:$4 sm:$0xff]   ;;  %4736 = vmatpush1.bf16.msra.mxu0 %v6939_v2  ;;  %v6945_v6 = vld [vmem:[#allocation2 + $0xc0] ss:$16 sps:$4 sm:$0xff]   ;;  %v8232_v49 = vpack.c.bf16 %v58_v46, %v58_v46  ;;  %v60_v50 = vld [vmem:[%s8458_s0 + $0x18] sm:$0xff] }
  0x28   :  { %4777 = vmatpush1.bf16.msra.mxu1 %v6940_v3  ;;  %v6943_v5 = vld [vmem:[#allocation2 + $0x2c4] ss:$16 sps:$4 sm:$0xff]   ;;  %4737 = vmatprep.subr.bf16.mxu0 %v6941_v4  ;;  %v6946_v7 = vld [vmem:[#allocation2 + $0x2c0] ss:$16 sps:$4 sm:$0xff]   ;;  %v8237_v52 = vpack.c.bf16 %v60_v50, %v60_v50 }
  0x29   :  { %4778 = vmatprep.subr.bf16.mxu1 %v6943_v5  ;;  %v6947_v8 = vld [vmem:[#allocation2 + $0xa4] ss:$16 sps:$4 sm:$0xff]   ;;  %v6951_v10 = vld [vmem:[#allocation2 + $0xa0] ss:$16 sps:$4 sm:$0xff]   ;;  %4767 = vmatprep.mubr.bf16.mxu0 %v8232_v49 }
  0x2a   :  { %v6949_v9 = vld [vmem:[#allocation2 + $0x2a4] ss:$16 sps:$4 sm:$0xff]   ;;  %v6952_v11 = vld [vmem:[#allocation2 + $0x2a0] ss:$16 sps:$4 sm:$0xff]   ;;  %4808 = vmatprep.mubr.bf16.mxu1 %v8237_v52 }
  0x2b   :  { %4738 = vmatpush1.bf16.msra.mxu0 %v6945_v6  ;;  %v6953_v12 = vld [vmem:[#allocation2 + $0x84] ss:$16 sps:$4 sm:$0xff]   ;;  %v6957_v14 = vld [vmem:[#allocation2 + $0x80] ss:$16 sps:$4 sm:$0xff]  }
  0x2c   :  { %4779 = vmatpush1.bf16.msra.mxu1 %v6946_v7  ;;  %4739 = vmatprep.subr.bf16.mxu0 %v6947_v8  ;;  %v6955_v13 = vld [vmem:[#allocation2 + $0x284] ss:$16 sps:$4 sm:$0xff]   ;;  %v6958_v15 = vld [vmem:[#allocation2 + $0x280] ss:$16 sps:$4 sm:$0xff]  }
  0x2d   :  { %4780 = vmatprep.subr.bf16.mxu1 %v6949_v9  ;;  %v6959_v16 = vld [vmem:[#allocation2 + $0x64] ss:$16 sps:$4 sm:$0xff]   ;;  %v6963_v18 = vld [vmem:[#allocation2 + $0x60] ss:$16 sps:$4 sm:$0xff]  }
  0x2e   :  { %v6961_v17 = vld [vmem:[#allocation2 + $0x264] ss:$16 sps:$4 sm:$0xff]   ;;  %v6964_v19 = vld [vmem:[#allocation2 + $0x260] ss:$16 sps:$4 sm:$0xff]  }
  0x2f   :  { %4740 = vmatpush1.bf16.msra.mxu0 %v6951_v10  ;;  %v6965_v20 = vld [vmem:[#allocation2 + $0x44] ss:$16 sps:$4 sm:$0xff]   ;;  %v6969_v22 = vld [vmem:[#allocation2 + $0x40] ss:$16 sps:$4 sm:$0xff]  }
  0x30   :  { %4781 = vmatpush1.bf16.msra.mxu1 %v6952_v11  ;;  %4741 = vmatprep.subr.bf16.mxu0 %v6953_v12  ;;  %v6967_v21 = vld [vmem:[#allocation2 + $0x244] ss:$16 sps:$4 sm:$0xff]   ;;  %v6970_v23 = vld [vmem:[#allocation2 + $0x240] ss:$16 sps:$4 sm:$0xff]  }
  0x31   :  { %4782 = vmatprep.subr.bf16.mxu1 %v6955_v13  ;;  %v6971_v24 = vld [vmem:[#allocation2 + $0x24] ss:$16 sps:$4 sm:$0xff]   ;;  %v6975_v26 = vld [vmem:[#allocation2 + $0x20] ss:$16 sps:$4 sm:$0xff]  }
  0x32   :  { %v6973_v25 = vld [vmem:[#allocation2 + $0x224] ss:$16 sps:$4 sm:$0xff]   ;;  %v6976_v27 = vld [vmem:[#allocation2 + $0x220] ss:$16 sps:$4 sm:$0xff]  }
  0x33   :  { %4742 = vmatpush1.bf16.msra.mxu0 %v6957_v14  ;;  %v6977_v28 = vld [vmem:[#allocation2 + $0x4] ss:$16 sps:$4 sm:$0xff]   ;;  %v6981_v30 = vld [vmem:[#allocation2] ss:$16 sps:$4 sm:$0xff]  }
  0x34   :  { %4783 = vmatpush1.bf16.msra.mxu1 %v6958_v15  ;;  %4743 = vmatprep.subr.bf16.mxu0 %v6959_v16  ;;  %v6979_v29 = vld [vmem:[#allocation2 + $0x204] ss:$16 sps:$4 sm:$0xff]   ;;  %v6982_v31 = vld [vmem:[#allocation2 + $0x200] ss:$16 sps:$4 sm:$0xff]  }
  0x35   :  { %4784 = vmatprep.subr.bf16.mxu1 %v6961_v17  ;;  %v6983_v32 = vld [vmem:[#allocation2 + $0x1e4] ss:$16 sps:$4 sm:$0xff]   ;;  %v6987_v34 = vld [vmem:[#allocation2 + $0x1e0] ss:$16 sps:$4 sm:$0xff]  }
  0x36   :  { %v6985_v33 = vld [vmem:[#allocation2 + $0x3e4] ss:$16 sps:$4 sm:$0xff]   ;;  %v6988_v35 = vld [vmem:[#allocation2 + $0x3e0] ss:$16 sps:$4 sm:$0xff]  }
  0x37   :  { %4744 = vmatpush1.bf16.msra.mxu0 %v6963_v18  ;;  %v6989_v36 = vld [vmem:[#allocation2 + $0x1c4] ss:$16 sps:$4 sm:$0xff]   ;;  %v6993_v38 = vld [vmem:[#allocation2 + $0x1c0] ss:$16 sps:$4 sm:$0xff]  }
  0x38   :  { %4785 = vmatpush1.bf16.msra.mxu1 %v6964_v19  ;;  %4745 = vmatprep.subr.bf16.mxu0 %v6965_v20  ;;  %v6991_v37 = vld [vmem:[#allocation2 + $0x3c4] ss:$16 sps:$4 sm:$0xff]   ;;  %v6994_v39 = vld [vmem:[#allocation2 + $0x3c0] ss:$16 sps:$4 sm:$0xff]  }
  0x39   :  { %4786 = vmatprep.subr.bf16.mxu1 %v6967_v21  ;;  %v6995_v40 = vld [vmem:[#allocation2 + $0x1a4] ss:$16 sps:$4 sm:$0xff]   ;;  %v6999_v42 = vld [vmem:[#allocation2 + $0x1a0] ss:$16 sps:$4 sm:$0xff]  }
  0x3a   :  { %v6997_v41 = vld [vmem:[#allocation2 + $0x3a4] ss:$16 sps:$4 sm:$0xff]   ;;  %v7000_v43 = vld [vmem:[#allocation2 + $0x3a0] ss:$16 sps:$4 sm:$0xff]  }
  0x3b   :  { %4746 = vmatpush1.bf16.msra.mxu0 %v6969_v22  ;;  %v7001_v44 = vld [vmem:[#allocation2 + $0x184] ss:$16 sps:$4 sm:$0xff]   ;;  %v7005_v47 = vld [vmem:[#allocation2 + $0x180] ss:$16 sps:$4 sm:$0xff]  }
  0x3c   :  { %4787 = vmatpush1.bf16.msra.mxu1 %v6970_v23  ;;  %4747 = vmatprep.subr.bf16.mxu0 %v6971_v24  ;;  %v7003_v45 = vld [vmem:[#allocation2 + $0x384] ss:$16 sps:$4 sm:$0xff]   ;;  %v7006_v48 = vld [vmem:[#allocation2 + $0x380] ss:$16 sps:$4 sm:$0xff]  }
  0x3d   :  { %4788 = vmatprep.subr.bf16.mxu1 %v6973_v25  ;;  %v7007_v51 = vld [vmem:[#allocation2 + $0x164] ss:$16 sps:$4 sm:$0xff]   ;;  %v7011_v54 = vld [vmem:[#allocation2 + $0x160] ss:$16 sps:$4 sm:$0xff]  }
  0x3e   :  { %v7009_v53 = vld [vmem:[#allocation2 + $0x364] ss:$16 sps:$4 sm:$0xff]   ;;  %v7012_v55 = vld [vmem:[#allocation2 + $0x360] ss:$16 sps:$4 sm:$0xff]  }
  0x3f   :  { %4748 = vmatpush1.bf16.msra.mxu0 %v6975_v26  ;;  %v7013_v56 = vld [vmem:[#allocation2 + $0x144] ss:$16 sps:$4 sm:$0xff]   ;;  %v7017_v58 = vld [vmem:[#allocation2 + $0x140] ss:$16 sps:$4 sm:$0xff]  }
  0x40   :  { %4789 = vmatpush1.bf16.msra.mxu1 %v6976_v27  ;;  %4749 = vmatprep.subr.bf16.mxu0 %v6977_v28  ;;  %v7015_v57 = vld [vmem:[#allocation2 + $0x344] ss:$16 sps:$4 sm:$0xff]   ;;  %v7018_v59 = vld [vmem:[#allocation2 + $0x340] ss:$16 sps:$4 sm:$0xff]  }
  0x41   :  { %4790 = vmatprep.subr.bf16.mxu1 %v6979_v29  ;;  %v7019_v60 = vld [vmem:[#allocation2 + $0x124] ss:$16 sps:$4 sm:$0xff]   ;;  %v7023_v62 = vld [vmem:[#allocation2 + $0x120] ss:$16 sps:$4 sm:$0xff]  }
  0x42   :  { %v7021_v61 = vld [vmem:[#allocation2 + $0x324] ss:$16 sps:$4 sm:$0xff]   ;;  %v7024_v63 = vld [vmem:[#allocation2 + $0x320] ss:$16 sps:$4 sm:$0xff]  }
  0x43   :  { %4750 = vmatpush1.bf16.msra.mxu0 %v6981_v30  ;;  %v7025_v0 = vld [vmem:[#allocation2 + $0x104] ss:$16 sps:$4 sm:$0xff]   ;;  %v7029_v2 = vld [vmem:[#allocation2 + $0x100] ss:$16 sps:$4 sm:$0xff]  }
  0x44   :  { %4791 = vmatpush1.bf16.msra.mxu1 %v6982_v31  ;;  %4751 = vmatprep.subr.bf16.mxu0 %v6983_v32  ;;  %v7027_v1 = vld [vmem:[#allocation2 + $0x304] ss:$16 sps:$4 sm:$0xff]   ;;  %v7030_v3 = vld [vmem:[#allocation2 + $0x300] ss:$16 sps:$4 sm:$0xff]  }
  0x45   :  { %4792 = vmatprep.subr.bf16.mxu1 %v6985_v33  ;;  %v57_v4 = vld [vmem:[%s8458_s0] sm:$0xff]  ;;  %v59_v5 = vld [vmem:[%s8458_s0 + $0x10] sm:$0xff] }
  0x46   :  { %v7033_v6 = vld [vmem:[#allocation2 + $0x4e4] ss:$16 sps:$4 sm:$0xff]   ;;  %v8247_v8 = vpack.c.bf16 %v57_v4, %v57_v4  ;;  %v8249_v9 = vpack.c.bf16 %v59_v5, %v59_v5  ;;  %v7031_v10 = vld [vmem:[#allocation2 + $0x4e0] ss:$16 sps:$4 sm:$0xff]  }
  0x47   :  { %4752 = vmatpush2.bf16.msra.mxu0 %v6987_v34  ;;  %v7036_v7 = vld [vmem:[#allocation2 + $0x6e4] ss:$16 sps:$4 sm:$0xff]   ;;  %v7034_v11 = vld [vmem:[#allocation2 + $0x6e0] ss:$16 sps:$4 sm:$0xff]   ;;  %v62_v34 = vld [vmem:[%s8458_s0 + $0x28] sm:$0xff] }
  0x48   :  { %4793 = vmatpush2.bf16.msra.mxu1 %v6988_v35  ;;  %4753 = vmatprep.subr.bf16.mxu0 %v6989_v36  ;;  %v7039_v12 = vld [vmem:[#allocation2 + $0x4c4] ss:$16 sps:$4 sm:$0xff]   ;;  %v7037_v14 = vld [vmem:[#allocation2 + $0x4c0] ss:$16 sps:$4 sm:$0xff]  }
  0x49   :  { %4794 = vmatprep.subr.bf16.mxu1 %v6991_v37  ;;  %v7042_v13 = vld [vmem:[#allocation2 + $0x6c4] ss:$16 sps:$4 sm:$0xff]   ;;  %v7040_v15 = vld [vmem:[#allocation2 + $0x6c0] ss:$16 sps:$4 sm:$0xff]   ;;  %v8256_v37 = vpack.c.bf16 %v62_v34, %v62_v34 }
  0x4a   :  { %v7045_v16 = vld [vmem:[#allocation2 + $0x4a4] ss:$16 sps:$4 sm:$0xff]   ;;  %v7043_v18 = vld [vmem:[#allocation2 + $0x4a0] ss:$16 sps:$4 sm:$0xff]  }
  0x4b   :  { %4754 = vmatpush2.bf16.msra.mxu0 %v6993_v38  ;;  %v7048_v17 = vld [vmem:[#allocation2 + $0x6a4] ss:$16 sps:$4 sm:$0xff]   ;;  %v7046_v19 = vld [vmem:[#allocation2 + $0x6a0] ss:$16 sps:$4 sm:$0xff]   ;;  %v64_v38 = vld [vmem:[%s8458_s0 + $0x38] sm:$0xff] }
  0x4c   :  { %4795 = vmatpush2.bf16.msra.mxu1 %v6994_v39  ;;  %4755 = vmatprep.subr.bf16.mxu0 %v6995_v40  ;;  %v7051_v20 = vld [vmem:[#allocation2 + $0x484] ss:$16 sps:$4 sm:$0xff]   ;;  %v7049_v22 = vld [vmem:[#allocation2 + $0x480] ss:$16 sps:$4 sm:$0xff]   ;;  %v8261_v40 = vpack.c.bf16 %v64_v38, %v64_v38 }
  0x4d   :  { %4796 = vmatprep.subr.bf16.mxu1 %v6997_v41  ;;  %v7054_v21 = vld [vmem:[#allocation2 + $0x684] ss:$16 sps:$4 sm:$0xff]   ;;  %v7052_v23 = vld [vmem:[#allocation2 + $0x680] ss:$16 sps:$4 sm:$0xff]  }
  0x4e   :  { %v7057_v24 = vld [vmem:[#allocation2 + $0x464] ss:$16 sps:$4 sm:$0xff]   ;;  %v7055_v26 = vld [vmem:[#allocation2 + $0x460] ss:$16 sps:$4 sm:$0xff]  }
  0x4f   :  { %4756 = vmatpush2.bf16.msra.mxu0 %v6999_v42  ;;  %v7060_v25 = vld [vmem:[#allocation2 + $0x664] ss:$16 sps:$4 sm:$0xff]   ;;  %v7058_v27 = vld [vmem:[#allocation2 + $0x660] ss:$16 sps:$4 sm:$0xff]  }
  0x50   :  { %4797 = vmatpush2.bf16.msra.mxu1 %v7000_v43  ;;  %4757 = vmatprep.subr.bf16.mxu0 %v7001_v44  ;;  %v7063_v28 = vld [vmem:[#allocation2 + $0x444] ss:$16 sps:$4 sm:$0xff]   ;;  %v7061_v30 = vld [vmem:[#allocation2 + $0x440] ss:$16 sps:$4 sm:$0xff]  }
  0x51   :  { %4798 = vmatprep.subr.bf16.mxu1 %v7003_v45  ;;  %v7066_v29 = vld [vmem:[#allocation2 + $0x644] ss:$16 sps:$4 sm:$0xff]   ;;  %v7064_v31 = vld [vmem:[#allocation2 + $0x640] ss:$16 sps:$4 sm:$0xff]  }
  0x52   :  { %v7069_v32 = vld [vmem:[#allocation2 + $0x424] ss:$16 sps:$4 sm:$0xff]   ;;  %v7067_v35 = vld [vmem:[#allocation2 + $0x420] ss:$16 sps:$4 sm:$0xff]  }
  0x53   :  { %4758 = vmatpush2.bf16.msra.mxu0 %v7005_v47  ;;  %v7072_v33 = vld [vmem:[#allocation2 + $0x624] ss:$16 sps:$4 sm:$0xff]   ;;  %v7070_v36 = vld [vmem:[#allocation2 + $0x620] ss:$16 sps:$4 sm:$0xff]  }
  0x54   :  { %4799 = vmatpush2.bf16.msra.mxu1 %v7006_v48  ;;  %4759 = vmatprep.subr.bf16.mxu0 %v7007_v51  ;;  %v7075_v39 = vld [vmem:[#allocation2 + $0x404] ss:$16 sps:$4 sm:$0xff]   ;;  %v7073_v42 = vld [vmem:[#allocation2 + $0x400] ss:$16 sps:$4 sm:$0xff]  }
  0x55   :  { %4800 = vmatprep.subr.bf16.mxu1 %v7009_v53  ;;  %v7078_v41 = vld [vmem:[#allocation2 + $0x604] ss:$16 sps:$4 sm:$0xff]   ;;  %v7076_v43 = vld [vmem:[#allocation2 + $0x600] ss:$16 sps:$4 sm:$0xff]  }
  0x56   :  { %v7081_v44 = vld [vmem:[#allocation2 + $0x5e4] ss:$16 sps:$4 sm:$0xff]   ;;  %v7079_v46 = vld [vmem:[#allocation2 + $0x5e0] ss:$16 sps:$4 sm:$0xff]  }
  0x57   :  { %4760 = vmatpush2.bf16.msra.mxu0 %v7011_v54  ;;  %v7084_v45 = vld [vmem:[#allocation2 + $0x7e4] ss:$16 sps:$4 sm:$0xff]   ;;  %v7082_v47 = vld [vmem:[#allocation2 + $0x7e0] ss:$16 sps:$4 sm:$0xff]  }
  0x58   :  { %4801 = vmatpush2.bf16.msra.mxu1 %v7012_v55  ;;  %4761 = vmatprep.subr.bf16.mxu0 %v7013_v56  ;;  %v7087_v48 = vld [vmem:[#allocation2 + $0x5c4] ss:$16 sps:$4 sm:$0xff]   ;;  %v7085_v51 = vld [vmem:[#allocation2 + $0x5c0] ss:$16 sps:$4 sm:$0xff]  }
  0x59   :  { %4802 = vmatprep.subr.bf16.mxu1 %v7015_v57  ;;  %v7090_v50 = vld [vmem:[#allocation2 + $0x7c4] ss:$16 sps:$4 sm:$0xff]   ;;  %v7088_v53 = vld [vmem:[#allocation2 + $0x7c0] ss:$16 sps:$4 sm:$0xff]  }
  0x5a   :  { %v7093_v54 = vld [vmem:[#allocation2 + $0x5a4] ss:$16 sps:$4 sm:$0xff]   ;;  %v7091_v56 = vld [vmem:[#allocation2 + $0x5a0] ss:$16 sps:$4 sm:$0xff]  }
  0x5b   :  { %4762 = vmatpush2.bf16.msra.mxu0 %v7017_v58  ;;  %v7096_v55 = vld [vmem:[#allocation2 + $0x7a4] ss:$16 sps:$4 sm:$0xff]   ;;  %v7094_v57 = vld [vmem:[#allocation2 + $0x7a0] ss:$16 sps:$4 sm:$0xff]  }
  0x5c   :  { %4803 = vmatpush2.bf16.msra.mxu1 %v7018_v59  ;;  %4763 = vmatprep.subr.bf16.mxu0 %v7019_v60  ;;  %v7099_v58 = vld [vmem:[#allocation2 + $0x584] ss:$16 sps:$4 sm:$0xff]   ;;  %v7097_v60 = vld [vmem:[#allocation2 + $0x580] ss:$16 sps:$4 sm:$0xff]  }
  0x5d   :  { %4804 = vmatprep.subr.bf16.mxu1 %v7021_v61  ;;  %v7102_v59 = vld [vmem:[#allocation2 + $0x784] ss:$16 sps:$4 sm:$0xff]   ;;  %v7100_v61 = vld [vmem:[#allocation2 + $0x780] ss:$16 sps:$4 sm:$0xff]  }
  0x5e   :  { %v7109_v4 = vld [vmem:[#allocation2 + $0x540] ss:$16 sps:$4 sm:$0xff]   ;;  %v7150_v38 = vld [vmem:[#allocation2 + $0xa84] ss:$16 sps:$4 sm:$0xff]  }
  0x5f   :  { %4764 = vmatpush2.bf16.msra.mxu0 %v7023_v62  ;;  %v7105_v62 = vld [vmem:[#allocation2 + $0x564] ss:$16 sps:$4 sm:$0xff]   ;;  %v7112_v5 = vld [vmem:[#allocation2 + $0x740] ss:$16 sps:$4 sm:$0xff]  }
  0x60   :  { %4805 = vmatpush2.bf16.msra.mxu1 %v7024_v63  ;;  %4765 = vmatprep.subr.bf16.mxu0 %v7025_v0  ;;  %v7108_v63 = vld [vmem:[#allocation2 + $0x764] ss:$16 sps:$4 sm:$0xff]   ;;  %v7103_v0 = vld [vmem:[#allocation2 + $0x560] ss:$16 sps:$4 sm:$0xff]  }
  0x61   :  { %4806 = vmatprep.subr.bf16.mxu1 %v7027_v1  ;;  %v7106_v1 = vld [vmem:[#allocation2 + $0x760] ss:$16 sps:$4 sm:$0xff]  }
  0x62   :  { %v7139_v34 = vld [vmem:[#allocation2 + $0x8a0] ss:$16 sps:$4 sm:$0xff]  }
  0x63   :  { %4766 = vmatpush2.bf16.msra.mxu0 %v7029_v2  ;;  %v7111_v2 = vld [vmem:[#allocation2 + $0x544] ss:$16 sps:$4 sm:$0xff]  }
  0x64   :  { %4807 = vmatpush2.bf16.msra.mxu1 %v7030_v3  ;;  %4817 = vmatprep.subr.bf16.mxu0 %v7033_v6  ;;  %v7114_v3 = vld [vmem:[#allocation2 + $0x744] ss:$16 sps:$4 sm:$0xff]  }
  0x65   :  { %4858 = vmatprep.subr.bf16.mxu1 %v7036_v7  ;;  %v7117_v6 = vld [vmem:[#allocation2 + $0x524] ss:$16 sps:$4 sm:$0xff]  }
  0x66   :  { %4768 = vmatmul.mubr.bf16.vlgmr.msra.gmra.mxu0 %v8247_v8  ;;  %v7120_v7 = vld [vmem:[#allocation2 + $0x724] ss:$16 sps:$4 sm:$0xff]  }
  0x67   :  { %4809 = vmatmul.mubr.bf16.vlgmr.msra.gmra.mxu1 %v8249_v9  ;;  %4818 = vmatpush1.bf16.msra.mxu0 %v7031_v10  ;;  %v7115_v10 = vld [vmem:[#allocation2 + $0x520] ss:$16 sps:$4 sm:$0xff]  }
  0x68   :  { %4859 = vmatpush1.bf16.msra.mxu1 %v7034_v11  ;;  %4819 = vmatprep.subr.bf16.mxu0 %v7039_v12  ;;  %v7118_v11 = vld [vmem:[#allocation2 + $0x720] ss:$16 sps:$4 sm:$0xff]   ;;  %v7123_v12 = vld [vmem:[#allocation2 + $0x504] ss:$16 sps:$4 sm:$0xff]  }
  0x69   :  { %4860 = vmatprep.subr.bf16.mxu1 %v7042_v13  ;;  %4849 = vmatprep.mubr.bf16.mxu0 %v8256_v37  ;;  %v7126_v13 = vld [vmem:[#allocation2 + $0x704] ss:$16 sps:$4 sm:$0xff]  }
  0x6a   :  { %4890 = vmatprep.mubr.bf16.mxu1 %v8261_v40 }
  0x6b   :  { %4820 = vmatpush1.bf16.msra.mxu0 %v7037_v14  ;;  %v7121_v14 = vld [vmem:[#allocation2 + $0x500] ss:$16 sps:$4 sm:$0xff]  }
  0x6c   :  { %4861 = vmatpush1.bf16.msra.mxu1 %v7040_v15  ;;  %4821 = vmatprep.subr.bf16.mxu0 %v7045_v16  ;;  %v7124_v15 = vld [vmem:[#allocation2 + $0x700] ss:$16 sps:$4 sm:$0xff]  }
  0x6d   :  { %4862 = vmatprep.subr.bf16.mxu1 %v7048_v17  ;;  %v61_v16 = vld [vmem:[%s8458_s0 + $0x20] sm:$0xff]  ;;  %v63_v17 = vld [vmem:[%s8458_s0 + $0x30] sm:$0xff] }
  0x6f   :  { %4822 = vmatpush1.bf16.msra.mxu0 %v7043_v18  ;;  %v7129_v18 = vld [vmem:[#allocation2 + $0x8e4] ss:$16 sps:$4 sm:$0xff]  }
  0x70   :  { %4863 = vmatpush1.bf16.msra.mxu1 %v7046_v19  ;;  %4823 = vmatprep.subr.bf16.mxu0 %v7051_v20  ;;  %v7132_v19 = vld [vmem:[#allocation2 + $0xae4] ss:$16 sps:$4 sm:$0xff]   ;;  %v8271_v20 = vpack.c.bf16 %v61_v16, %v61_v16  ;;  %v7199_v16 = vld [vmem:[#allocation2 + $0x960] ss:$16 sps:$4 sm:$0xff]  }
  0x71   :  { %4864 = vmatprep.subr.bf16.mxu1 %v7054_v21  ;;  %v8273_v21 = vpack.c.bf16 %v63_v17, %v63_v17  ;;  %v7202_v17 = vld [vmem:[#allocation2 + $0xb60] ss:$16 sps:$4 sm:$0xff]  }
  0x73   :  { %4824 = vmatpush1.bf16.msra.mxu0 %v7049_v22  ;;  %v7127_v22 = vld [vmem:[#allocation2 + $0x8e0] ss:$16 sps:$4 sm:$0xff]  }
  0x74   :  { %4865 = vmatpush1.bf16.msra.mxu1 %v7052_v23  ;;  %4825 = vmatprep.subr.bf16.mxu0 %v7057_v24  ;;  %v7130_v23 = vld [vmem:[#allocation2 + $0xae0] ss:$16 sps:$4 sm:$0xff]   ;;  %v7135_v24 = vld [vmem:[#allocation2 + $0x8c4] ss:$16 sps:$4 sm:$0xff]  }
  0x75   :  { %4866 = vmatprep.subr.bf16.mxu1 %v7060_v25  ;;  %v7138_v25 = vld [vmem:[#allocation2 + $0xac4] ss:$16 sps:$4 sm:$0xff]  }
  0x77   :  { %4826 = vmatpush1.bf16.msra.mxu0 %v7055_v26  ;;  %v66_v26 = vld [vmem:[%s8458_s0 + $0x48] sm:$0xff] }
  0x78   :  { %4867 = vmatpush1.bf16.msra.mxu1 %v7058_v27  ;;  %4827 = vmatprep.subr.bf16.mxu0 %v7063_v28  ;;  %v7133_v27 = vld [vmem:[#allocation2 + $0x8c0] ss:$16 sps:$4 sm:$0xff]  }
  0x79   :  { %4868 = vmatprep.subr.bf16.mxu1 %v7066_v29  ;;  %v7136_v28 = vld [vmem:[#allocation2 + $0xac0] ss:$16 sps:$4 sm:$0xff]   ;;  %v8280_v29 = vpack.c.bf16 %v66_v26, %v66_v26 }
  0x7a   :  { %v7211_v26 = vld [vmem:[#allocation2 + $0x920] ss:$16 sps:$4 sm:$0xff]  }
  0x7b   :  { %4828 = vmatpush1.bf16.msra.mxu0 %v7061_v30  ;;  %v68_v30 = vld [vmem:[%s8458_s0 + $0x58] sm:$0xff] }
  0x7c   :  { %4869 = vmatpush1.bf16.msra.mxu1 %v7064_v31  ;;  %4829 = vmatprep.subr.bf16.mxu0 %v7069_v32  ;;  %v7141_v31 = vld [vmem:[#allocation2 + $0x8a4] ss:$16 sps:$4 sm:$0xff]   ;;  %v8285_v32 = vpack.c.bf16 %v68_v30, %v68_v30 }
  0x7d   :  { %4870 = vmatprep.subr.bf16.mxu1 %v7072_v33  ;;  %v7144_v33 = vld [vmem:[#allocation2 + $0xaa4] ss:$16 sps:$4 sm:$0xff]  }
  0x7e   :  { %v7222_v30 = vld [vmem:[#allocation2 + $0xb04] ss:$16 sps:$4 sm:$0xff]  }
  0x7f   :  { %4830 = vmatpush1.bf16.msra.mxu0 %v7067_v35  ;;  %v7142_v35 = vld [vmem:[#allocation2 + $0xaa0] ss:$16 sps:$4 sm:$0xff]  }
  0x80   :  { %4871 = vmatpush1.bf16.msra.mxu1 %v7070_v36  ;;  %4831 = vmatprep.subr.bf16.mxu0 %v7075_v39  ;;  %v7147_v36 = vld [vmem:[#allocation2 + $0x884] ss:$16 sps:$4 sm:$0xff]   ;;  %v7145_v39 = vld [vmem:[#allocation2 + $0x880] ss:$16 sps:$4 sm:$0xff]  }
  0x81   :  { %4872 = vmatprep.subr.bf16.mxu1 %v7078_v41  ;;  %v7148_v41 = vld [vmem:[#allocation2 + $0xa80] ss:$16 sps:$4 sm:$0xff]  }
  0x83   :  { %4832 = vmatpush1.bf16.msra.mxu0 %v7073_v42  ;;  %v7153_v42 = vld [vmem:[#allocation2 + $0x864] ss:$16 sps:$4 sm:$0xff]  }
  0x84   :  { %4873 = vmatpush1.bf16.msra.mxu1 %v7076_v43  ;;  %4833 = vmatprep.subr.bf16.mxu0 %v7081_v44  ;;  %v7156_v43 = vld [vmem:[#allocation2 + $0xa64] ss:$16 sps:$4 sm:$0xff]   ;;  %v7151_v44 = vld [vmem:[#allocation2 + $0x860] ss:$16 sps:$4 sm:$0xff]  }
  0x85   :  { %4874 = vmatprep.subr.bf16.mxu1 %v7084_v45  ;;  %v7154_v45 = vld [vmem:[#allocation2 + $0xa60] ss:$16 sps:$4 sm:$0xff]  }
  0x87   :  { %4834 = vmatpush2.bf16.msra.mxu0 %v7079_v46  ;;  %v7159_v46 = vld [vmem:[#allocation2 + $0x844] ss:$16 sps:$4 sm:$0xff]  }
  0x88   :  { %4875 = vmatpush2.bf16.msra.mxu1 %v7082_v47  ;;  %4835 = vmatprep.subr.bf16.mxu0 %v7087_v48  ;;  %v7162_v47 = vld [vmem:[#allocation2 + $0xa44] ss:$16 sps:$4 sm:$0xff]   ;;  %v7157_v48 = vld [vmem:[#allocation2 + $0x840] ss:$16 sps:$4 sm:$0xff]  }
  0x89   :  { %4876 = vmatprep.subr.bf16.mxu1 %v7090_v50  ;;  %v7160_v50 = vld [vmem:[#allocation2 + $0xa40] ss:$16 sps:$4 sm:$0xff]  }
  0x8b   :  { %4836 = vmatpush2.bf16.msra.mxu0 %v7085_v51  ;;  %v7165_v51 = vld [vmem:[#allocation2 + $0x824] ss:$16 sps:$4 sm:$0xff]  }
  0x8c   :  { %4877 = vmatpush2.bf16.msra.mxu1 %v7088_v53  ;;  %4837 = vmatprep.subr.bf16.mxu0 %v7093_v54  ;;  %v7168_v53 = vld [vmem:[#allocation2 + $0xa24] ss:$16 sps:$4 sm:$0xff]   ;;  %v7163_v54 = vld [vmem:[#allocation2 + $0x820] ss:$16 sps:$4 sm:$0xff]  }
  0x8d   :  { %4878 = vmatprep.subr.bf16.mxu1 %v7096_v55  ;;  %v7166_v55 = vld [vmem:[#allocation2 + $0xa20] ss:$16 sps:$4 sm:$0xff]  }
  0x8f   :  { %4838 = vmatpush2.bf16.msra.mxu0 %v7091_v56  ;;  %v7171_v56 = vld [vmem:[#allocation2 + $0x804] ss:$16 sps:$4 sm:$0xff]  }
  0x90   :  { %4879 = vmatpush2.bf16.msra.mxu1 %v7094_v57  ;;  %4839 = vmatprep.subr.bf16.mxu0 %v7099_v58  ;;  %v7174_v57 = vld [vmem:[#allocation2 + $0xa04] ss:$16 sps:$4 sm:$0xff]   ;;  %v7169_v58 = vld [vmem:[#allocation2 + $0x800] ss:$16 sps:$4 sm:$0xff]  }
  0x91   :  { %4880 = vmatprep.subr.bf16.mxu1 %v7102_v59  ;;  %v7172_v59 = vld [vmem:[#allocation2 + $0xa00] ss:$16 sps:$4 sm:$0xff]  }
  0x93   :  { %4840 = vmatpush2.bf16.msra.mxu0 %v7097_v60  ;;  %v7177_v60 = vld [vmem:[#allocation2 + $0x9e4] ss:$16 sps:$4 sm:$0xff]  }
  0x94   :  { %4881 = vmatpush2.bf16.msra.mxu1 %v7100_v61  ;;  %4841 = vmatprep.subr.bf16.mxu0 %v7105_v62  ;;  %v7180_v61 = vld [vmem:[#allocation2 + $0xbe4] ss:$16 sps:$4 sm:$0xff]   ;;  %v7175_v62 = vld [vmem:[#allocation2 + $0x9e0] ss:$16 sps:$4 sm:$0xff]  }
  0x95   :  { %4882 = vmatprep.subr.bf16.mxu1 %v7108_v63  ;;  %v7178_v63 = vld [vmem:[#allocation2 + $0xbe0] ss:$16 sps:$4 sm:$0xff]  }
  0x97   :  { %4842 = vmatpush2.bf16.msra.mxu0 %v7103_v0  ;;  %v7183_v0 = vld [vmem:[#allocation2 + $0x9c4] ss:$16 sps:$4 sm:$0xff]  }
  0x98   :  { %4883 = vmatpush2.bf16.msra.mxu1 %v7106_v1  ;;  %4843 = vmatprep.subr.bf16.mxu0 %v7111_v2  ;;  %v7186_v1 = vld [vmem:[#allocation2 + $0xbc4] ss:$16 sps:$4 sm:$0xff]   ;;  %v7181_v2 = vld [vmem:[#allocation2 + $0x9c0] ss:$16 sps:$4 sm:$0xff]  }
  0x99   :  { %4884 = vmatprep.subr.bf16.mxu1 %v7114_v3  ;;  %v7184_v3 = vld [vmem:[#allocation2 + $0xbc0] ss:$16 sps:$4 sm:$0xff]  }
  0x9b   :  { %4844 = vmatpush2.bf16.msra.mxu0 %v7109_v4  ;;  %v7189_v4 = vld [vmem:[#allocation2 + $0x9a4] ss:$16 sps:$4 sm:$0xff]  }
  0x9c   :  { %4885 = vmatpush2.bf16.msra.mxu1 %v7112_v5  ;;  %4845 = vmatprep.subr.bf16.mxu0 %v7117_v6  ;;  %v7192_v5 = vld [vmem:[#allocation2 + $0xba4] ss:$16 sps:$4 sm:$0xff]   ;;  %v7187_v6 = vld [vmem:[#allocation2 + $0x9a0] ss:$16 sps:$4 sm:$0xff]  }
  0x9d   :  { %4886 = vmatprep.subr.bf16.mxu1 %v7120_v7  ;;  %v7190_v7 = vld [vmem:[#allocation2 + $0xba0] ss:$16 sps:$4 sm:$0xff]  }
  0x9f   :  { %4846 = vmatpush2.bf16.msra.mxu0 %v7115_v10  ;;  %v7195_v10 = vld [vmem:[#allocation2 + $0x984] ss:$16 sps:$4 sm:$0xff]  }
  0xa0   :  { %4887 = vmatpush2.bf16.msra.mxu1 %v7118_v11  ;;  %4847 = vmatprep.subr.bf16.mxu0 %v7123_v12  ;;  %v7198_v11 = vld [vmem:[#allocation2 + $0xb84] ss:$16 sps:$4 sm:$0xff]   ;;  %v7193_v12 = vld [vmem:[#allocation2 + $0x980] ss:$16 sps:$4 sm:$0xff]  }
  0xa1   :  { %4888 = vmatprep.subr.bf16.mxu1 %v7126_v13  ;;  %v7196_v13 = vld [vmem:[#allocation2 + $0xb80] ss:$16 sps:$4 sm:$0xff]  }
  0xa3   :  { %4848 = vmatpush2.bf16.msra.mxu0 %v7121_v14  ;;  %v7201_v14 = vld [vmem:[#allocation2 + $0x964] ss:$16 sps:$4 sm:$0xff]  }
  0xa4   :  { %4889 = vmatpush2.bf16.msra.mxu1 %v7124_v15  ;;  %4899 = vmatprep.subr.bf16.mxu0 %v7129_v18  ;;  %v7204_v15 = vld [vmem:[#allocation2 + $0xb64] ss:$16 sps:$4 sm:$0xff]  }
  0xa5   :  { %4940 = vmatprep.subr.bf16.mxu1 %v7132_v19  ;;  %v7207_v18 = vld [vmem:[#allocation2 + $0x944] ss:$16 sps:$4 sm:$0xff]  }
  0xa6   :  { %4850 = vmatmul.mubr.bf16.vlgmr.msra.gmra.mxu0 %v8271_v20  ;;  %v7210_v19 = vld [vmem:[#allocation2 + $0xb44] ss:$16 sps:$4 sm:$0xff]  }
  0xa7   :  { %4891 = vmatmul.mubr.bf16.vlgmr.msra.gmra.mxu1 %v8273_v21  ;;  %4900 = vmatpush1.bf16.msra.mxu0 %v7127_v22  ;;  %v7205_v22 = vld [vmem:[#allocation2 + $0x940] ss:$16 sps:$4 sm:$0xff]  }
  0xa8   :  { %4941 = vmatpush1.bf16.msra.mxu1 %v7130_v23  ;;  %4901 = vmatprep.subr.bf16.mxu0 %v7135_v24  ;;  %v7208_v23 = vld [vmem:[#allocation2 + $0xb40] ss:$16 sps:$4 sm:$0xff]   ;;  %v7213_v24 = vld [vmem:[#allocation2 + $0x924] ss:$16 sps:$4 sm:$0xff]  }
  0xa9   :  { %4942 = vmatprep.subr.bf16.mxu1 %v7138_v25  ;;  %4931 = vmatprep.mubr.bf16.mxu0 %v8280_v29  ;;  %v7216_v25 = vld [vmem:[#allocation2 + $0xb24] ss:$16 sps:$4 sm:$0xff]  }
  0xaa   :  { %4972 = vmatprep.mubr.bf16.mxu1 %v8285_v32 }
  0xab   :  { %4902 = vmatpush1.bf16.msra.mxu0 %v7133_v27  ;;  %v7214_v27 = vld [vmem:[#allocation2 + $0xb20] ss:$16 sps:$4 sm:$0xff]  }
  0xac   :  { %4943 = vmatpush1.bf16.msra.mxu1 %v7136_v28  ;;  %4903 = vmatprep.subr.bf16.mxu0 %v7141_v31  ;;  %v7219_v28 = vld [vmem:[#allocation2 + $0x904] ss:$16 sps:$4 sm:$0xff]   ;;  %v7217_v31 = vld [vmem:[#allocation2 + $0x900] ss:$16 sps:$4 sm:$0xff]  }
  0xad   :  { %4944 = vmatprep.subr.bf16.mxu1 %v7144_v33  ;;  %v7220_v33 = vld [vmem:[#allocation2 + $0xb00] ss:$16 sps:$4 sm:$0xff]  }
  0xaf   :  { %4904 = vmatpush1.bf16.msra.mxu0 %v7139_v34  ;;  %v65_v34 = vld [vmem:[%s8458_s0 + $0x40] sm:$0xff] }
  0xb0   :  { %4945 = vmatpush1.bf16.msra.mxu1 %v7142_v35  ;;  %4905 = vmatprep.subr.bf16.mxu0 %v7147_v36  ;;  %v67_v35 = vld [vmem:[%s8458_s0 + $0x50] sm:$0xff] }
  0xb1   :  { %4946 = vmatprep.subr.bf16.mxu1 %v7150_v38  ;;  %v7225_v36 = vld [vmem:[#allocation2 + $0xce4] ss:$16 sps:$4 sm:$0xff]  }
  0xb2   :  { %v7228_v38 = vld [vmem:[#allocation2 + $0xee4] ss:$16 sps:$4 sm:$0xff]  }
  0xb3   :  { %4906 = vmatpush1.bf16.msra.mxu0 %v7145_v39  ;;  %v7223_v39 = vld [vmem:[#allocation2 + $0xce0] ss:$16 sps:$4 sm:$0xff]  }
  0xb4   :  { %4947 = vmatpush1.bf16.msra.mxu1 %v7148_v41  ;;  %4907 = vmatprep.subr.bf16.mxu0 %v7153_v42  ;;  %v70_v41 = vld [vmem:[%s8458_s0 + $0x68] sm:$0xff]  ;;  %v8298_v42 = vpack.c.bf16 %v65_v34, %v65_v34  ;;  %v7289_v34 = vld [vmem:[#allocation2 + $0xd80] ss:$16 sps:$4 sm:$0xff]  }
  0xb5   :  { %4948 = vmatprep.subr.bf16.mxu1 %v7156_v43  ;;  %v8300_v43 = vpack.c.bf16 %v67_v35, %v67_v35  ;;  %v7292_v35 = vld [vmem:[#allocation2 + $0xf80] ss:$16 sps:$4 sm:$0xff]  }
  0xb7   :  { %4908 = vmatpush1.bf16.msra.mxu0 %v7151_v44  ;;  %v72_v44 = vld [vmem:[%s8458_s0 + $0x78] sm:$0xff] }
  0xb8   :  { %4949 = vmatpush1.bf16.msra.mxu1 %v7154_v45  ;;  %4909 = vmatprep.subr.bf16.mxu0 %v7159_v46  ;;  %v7226_v45 = vld [vmem:[#allocation2 + $0xee0] ss:$16 sps:$4 sm:$0xff]   ;;  %v7231_v46 = vld [vmem:[#allocation2 + $0xcc4] ss:$16 sps:$4 sm:$0xff]  }
  0xb9   :  { %4950 = vmatprep.subr.bf16.mxu1 %v7162_v47  ;;  %v7234_v47 = vld [vmem:[#allocation2 + $0xec4] ss:$16 sps:$4 sm:$0xff]  }
  0xbb   :  { %4910 = vmatpush1.bf16.msra.mxu0 %v7157_v48  ;;  %v8305_v48 = vpack.c.bf16 %v70_v41, %v70_v41  ;;  %v7298_v41 = vld [vmem:[#allocation2 + $0xf60] ss:$16 sps:$4 sm:$0xff]  }
  0xbc   :  { %4951 = vmatpush1.bf16.msra.mxu1 %v7160_v50  ;;  %4911 = vmatprep.subr.bf16.mxu0 %v7165_v51  ;;  %v8307_v50 = vpack.c.bf16 %v72_v44, %v72_v44  ;;  %v7229_v51 = vld [vmem:[#allocation2 + $0xcc0] ss:$16 sps:$4 sm:$0xff]   ;;  %v7303_v44 = vld [vmem:[#allocation2 + $0xd44] ss:$16 sps:$4 sm:$0xff]  }
  0xbd   :  { %4952 = vmatprep.subr.bf16.mxu1 %v7168_v53  ;;  %v7232_v53 = vld [vmem:[#allocation2 + $0xec0] ss:$16 sps:$4 sm:$0xff]  }
  0xbf   :  { %4912 = vmatpush1.bf16.msra.mxu0 %v7163_v54  ;;  %v7237_v54 = vld [vmem:[#allocation2 + $0xca4] ss:$16 sps:$4 sm:$0xff]  }
  0xc0   :  { %4953 = vmatpush1.bf16.msra.mxu1 %v7166_v55  ;;  %4913 = vmatprep.subr.bf16.mxu0 %v7171_v56  ;;  %v7240_v55 = vld [vmem:[#allocation2 + $0xea4] ss:$16 sps:$4 sm:$0xff]   ;;  %v7235_v56 = vld [vmem:[#allocation2 + $0xca0] ss:$16 sps:$4 sm:$0xff]  }
  0xc1   :  { %4954 = vmatprep.subr.bf16.mxu1 %v7174_v57  ;;  %v7238_v57 = vld [vmem:[#allocation2 + $0xea0] ss:$16 sps:$4 sm:$0xff]  }
  0xc3   :  { %4914 = vmatpush1.bf16.msra.mxu0 %v7169_v58  ;;  %v7243_v58 = vld [vmem:[#allocation2 + $0xc84] ss:$16 sps:$4 sm:$0xff]  }
  0xc4   :  { %4955 = vmatpush1.bf16.msra.mxu1 %v7172_v59  ;;  %4915 = vmatprep.subr.bf16.mxu0 %v7177_v60  ;;  %v7246_v59 = vld [vmem:[#allocation2 + $0xe84] ss:$16 sps:$4 sm:$0xff]   ;;  %v7241_v60 = vld [vmem:[#allocation2 + $0xc80] ss:$16 sps:$4 sm:$0xff]  }
  0xc5   :  { %4956 = vmatprep.subr.bf16.mxu1 %v7180_v61  ;;  %v7244_v61 = vld [vmem:[#allocation2 + $0xe80] ss:$16 sps:$4 sm:$0xff]  }
  0xc7   :  { %4916 = vmatpush2.bf16.msra.mxu0 %v7175_v62  ;;  %v7249_v62 = vld [vmem:[#allocation2 + $0xc64] ss:$16 sps:$4 sm:$0xff]  }
  0xc8   :  { %4957 = vmatpush2.bf16.msra.mxu1 %v7178_v63  ;;  %4917 = vmatprep.subr.bf16.mxu0 %v7183_v0  ;;  %v7252_v63 = vld [vmem:[#allocation2 + $0xe64] ss:$16 sps:$4 sm:$0xff]   ;;  %v7247_v0 = vld [vmem:[#allocation2 + $0xc60] ss:$16 sps:$4 sm:$0xff]  }
  0xc9   :  { %4958 = vmatprep.subr.bf16.mxu1 %v7186_v1  ;;  %v7250_v1 = vld [vmem:[#allocation2 + $0xe60] ss:$16 sps:$4 sm:$0xff]  }
  0xcb   :  { %4918 = vmatpush2.bf16.msra.mxu0 %v7181_v2  ;;  %v7255_v2 = vld [vmem:[#allocation2 + $0xc44] ss:$16 sps:$4 sm:$0xff]  }
  0xcc   :  { %4959 = vmatpush2.bf16.msra.mxu1 %v7184_v3  ;;  %4919 = vmatprep.subr.bf16.mxu0 %v7189_v4  ;;  %v7258_v3 = vld [vmem:[#allocation2 + $0xe44] ss:$16 sps:$4 sm:$0xff]   ;;  %v7253_v4 = vld [vmem:[#allocation2 + $0xc40] ss:$16 sps:$4 sm:$0xff]  }
  0xcd   :  { %4960 = vmatprep.subr.bf16.mxu1 %v7192_v5  ;;  %v7256_v5 = vld [vmem:[#allocation2 + $0xe40] ss:$16 sps:$4 sm:$0xff]  }
  0xcf   :  { %4920 = vmatpush2.bf16.msra.mxu0 %v7187_v6  ;;  %v7261_v6 = vld [vmem:[#allocation2 + $0xc24] ss:$16 sps:$4 sm:$0xff]  }
  0xd0   :  { %4961 = vmatpush2.bf16.msra.mxu1 %v7190_v7  ;;  %4921 = vmatprep.subr.bf16.mxu0 %v7195_v10  ;;  %v7264_v7 = vld [vmem:[#allocation2 + $0xe24] ss:$16 sps:$4 sm:$0xff]   ;;  %v7259_v10 = vld [vmem:[#allocation2 + $0xc20] ss:$16 sps:$4 sm:$0xff]  }
  0xd1   :  { %4962 = vmatprep.subr.bf16.mxu1 %v7198_v11  ;;  %v7262_v11 = vld [vmem:[#allocation2 + $0xe20] ss:$16 sps:$4 sm:$0xff]  }
  0xd3   :  { %4922 = vmatpush2.bf16.msra.mxu0 %v7193_v12  ;;  %v7267_v12 = vld [vmem:[#allocation2 + $0xc04] ss:$16 sps:$4 sm:$0xff]  }
  0xd4   :  { %4963 = vmatpush2.bf16.msra.mxu1 %v7196_v13  ;;  %4923 = vmatprep.subr.bf16.mxu0 %v7201_v14  ;;  %v7270_v13 = vld [vmem:[#allocation2 + $0xe04] ss:$16 sps:$4 sm:$0xff]   ;;  %v7265_v14 = vld [vmem:[#allocation2 + $0xc00] ss:$16 sps:$4 sm:$0xff]  }
  0xd5   :  { %4964 = vmatprep.subr.bf16.mxu1 %v7204_v15  ;;  %v7268_v15 = vld [vmem:[#allocation2 + $0xe00] ss:$16 sps:$4 sm:$0xff]  }
  0xd7   :  { %4924 = vmatpush2.bf16.msra.mxu0 %v7199_v16  ;;  %v7273_v16 = vld [vmem:[#allocation2 + $0xde4] ss:$16 sps:$4 sm:$0xff]  }
  0xd8   :  { %4965 = vmatpush2.bf16.msra.mxu1 %v7202_v17  ;;  %4925 = vmatprep.subr.bf16.mxu0 %v7207_v18  ;;  %v7276_v17 = vld [vmem:[#allocation2 + $0xfe4] ss:$16 sps:$4 sm:$0xff]   ;;  %v7271_v18 = vld [vmem:[#allocation2 + $0xde0] ss:$16 sps:$4 sm:$0xff]  }
  0xd9   :  { %4966 = vmatprep.subr.bf16.mxu1 %v7210_v19  ;;  %v7274_v19 = vld [vmem:[#allocation2 + $0xfe0] ss:$16 sps:$4 sm:$0xff]  }
  0xdb   :  { %4926 = vmatpush2.bf16.msra.mxu0 %v7205_v22  ;;  %v7279_v22 = vld [vmem:[#allocation2 + $0xdc4] ss:$16 sps:$4 sm:$0xff]  }
  0xdc   :  { %4967 = vmatpush2.bf16.msra.mxu1 %v7208_v23  ;;  %4927 = vmatprep.subr.bf16.mxu0 %v7213_v24  ;;  %v7282_v23 = vld [vmem:[#allocation2 + $0xfc4] ss:$16 sps:$4 sm:$0xff]   ;;  %v7277_v24 = vld [vmem:[#allocation2 + $0xdc0] ss:$16 sps:$4 sm:$0xff]  }
  0xdd   :  { %4968 = vmatprep.subr.bf16.mxu1 %v7216_v25  ;;  %v7280_v25 = vld [vmem:[#allocation2 + $0xfc0] ss:$16 sps:$4 sm:$0xff]  }
  0xdf   :  { %4928 = vmatpush2.bf16.msra.mxu0 %v7211_v26  ;;  %v7285_v26 = vld [vmem:[#allocation2 + $0xda4] ss:$16 sps:$4 sm:$0xff]  }
  0xe0   :  { %4969 = vmatpush2.bf16.msra.mxu1 %v7214_v27  ;;  %4929 = vmatprep.subr.bf16.mxu0 %v7219_v28  ;;  %v7288_v27 = vld [vmem:[#allocation2 + $0xfa4] ss:$16 sps:$4 sm:$0xff]   ;;  %v7283_v28 = vld [vmem:[#allocation2 + $0xda0] ss:$16 sps:$4 sm:$0xff]  }
  0xe1   :  { %4970 = vmatprep.subr.bf16.mxu1 %v7222_v30  ;;  %v7286_v30 = vld [vmem:[#allocation2 + $0xfa0] ss:$16 sps:$4 sm:$0xff]  }
  0xe3   :  { %4930 = vmatpush2.bf16.msra.mxu0 %v7217_v31  ;;  %v7291_v31 = vld [vmem:[#allocation2 + $0xd84] ss:$16 sps:$4 sm:$0xff]  }
  0xe4   :  { %4971 = vmatpush2.bf16.msra.mxu1 %v7220_v33  ;;  %4981 = vmatprep.subr.bf16.mxu0 %v7225_v36  ;;  %v7294_v33 = vld [vmem:[#allocation2 + $0xf84] ss:$16 sps:$4 sm:$0xff]  }
  0xe5   :  { %5022 = vmatprep.subr.bf16.mxu1 %v7228_v38  ;;  %v7297_v36 = vld [vmem:[#allocation2 + $0xd64] ss:$16 sps:$4 sm:$0xff]  }
  0xe6   :  { %4932 = vmatmul.mubr.bf16.vlgmr.msra.gmra.mxu0 %v8298_v42  ;;  %v7300_v38 = vld [vmem:[#allocation2 + $0xf64] ss:$16 sps:$4 sm:$0xff]  }
  0xe7   :  { %4973 = vmatmul.mubr.bf16.vlgmr.msra.gmra.mxu1 %v8300_v43  ;;  %4982 = vmatpush1.bf16.msra.mxu0 %v7223_v39  ;;  %v7295_v39 = vld [vmem:[#allocation2 + $0xd60] ss:$16 sps:$4 sm:$0xff]  }
  0xe8   :  { %5023 = vmatpush1.bf16.msra.mxu1 %v7226_v45  ;;  %4983 = vmatprep.subr.bf16.mxu0 %v7231_v46  ;;  %v7306_v45 = vld [vmem:[#allocation2 + $0xf44] ss:$16 sps:$4 sm:$0xff]   ;;  %v7301_v46 = vld [vmem:[#allocation2 + $0xd40] ss:$16 sps:$4 sm:$0xff]  }
  0xe9   :  { %5024 = vmatprep.subr.bf16.mxu1 %v7234_v47  ;;  %5013 = vmatprep.mubr.bf16.mxu0 %v8305_v48  ;;  %v7304_v47 = vld [vmem:[#allocation2 + $0xf40] ss:$16 sps:$4 sm:$0xff]  }
  0xea   :  { %5054 = vmatprep.mubr.bf16.mxu1 %v8307_v50 }
  0xeb   :  { %4984 = vmatpush1.bf16.msra.mxu0 %v7229_v51  ;;  %v875_v51 = vlaneseq }
  0xec   :  { %5025 = vmatpush1.bf16.msra.mxu1 %v7232_v53  ;;  %4985 = vmatprep.subr.bf16.mxu0 %v7237_v54  ;;  %v7309_v53 = vld [vmem:[#allocation2 + $0xd24] ss:$16 sps:$4 sm:$0xff]  }
  0xed   :  { %5026 = vmatprep.subr.bf16.mxu1 %v7240_v55  ;;  %v7312_v54 = vld [vmem:[#allocation2 + $0xf24] ss:$16 sps:$4 sm:$0xff]   ;;  %v7307_v55 = vld [vmem:[#allocation2 + $0xd20] ss:$16 sps:$4 sm:$0xff]  }
  0xef   :  { %4986 = vmatpush1.bf16.msra.mxu0 %v7235_v56  ;;  %v7310_v56 = vld [vmem:[#allocation2 + $0xf20] ss:$16 sps:$4 sm:$0xff]  }
  0xf0   :  { %5027 = vmatpush1.bf16.msra.mxu1 %v7238_v57  ;;  %4987 = vmatprep.subr.bf16.mxu0 %v7243_v58  ;;  %v8313_v57 = vshrl.u32 %v875_v51, 7  ;;  %v7315_v58 = vld [vmem:[#allocation2 + $0xd04] ss:$16 sps:$4 sm:$0xff]   ;;  %v7340_v51 = vld [vmem:[#allocation2 + $0x1280] ss:$16 sps:$4 sm:$0xff]  }
  0xf1   :  { %5028 = vmatprep.subr.bf16.mxu1 %v7246_v59  ;;  %v7318_v59 = vld [vmem:[#allocation2 + $0xf04] ss:$16 sps:$4 sm:$0xff]  }
  0xf3   :  { %4988 = vmatpush1.bf16.msra.mxu0 %v7241_v60  ;;  %v7313_v60 = vld [vmem:[#allocation2 + $0xd00] ss:$16 sps:$4 sm:$0xff]  }
  0xf4   :  { %5029 = vmatpush1.bf16.msra.mxu1 %v7244_v61  ;;  %4989 = vmatprep.subr.bf16.mxu0 %v7249_v62  ;;  %v7316_v61 = vld [vmem:[#allocation2 + $0xf00] ss:$16 sps:$4 sm:$0xff]  }
  0xf5   :  { %5030 = vmatprep.subr.bf16.mxu1 %v7252_v63  ;;  %v873_v62 = vld [vmem:[#allocation4] sm:$0xf] }
  0xf6   :  { %v69_v63 = vld [vmem:[%s8458_s0 + $0x60] sm:$0xff] }
  0xf7   :  { %4990 = vmatpush1.bf16.msra.mxu0 %v7247_v0  ;;  %v877_v0 = vsub.s32 0, %v8313_v57 }
  0xf8   :  { %5031 = vmatpush1.bf16.msra.mxu1 %v7250_v1  ;;  %4991 = vmatprep.subr.bf16.mxu0 %v7255_v2  ;;  %v71_v1 = vld [vmem:[%s8458_s0 + $0x70] sm:$0xff] }
  0xf9   :  { %5032 = vmatprep.subr.bf16.mxu1 %v7258_v3  ;;  %v7321_v2 = vld [vmem:[#allocation2 + $0x10e4] ss:$16 sps:$4 sm:$0xff]  }
  0xfa   :  { %v7324_v3 = vld [vmem:[#allocation2 + $0x12e4] ss:$16 sps:$4 sm:$0xff]  }
  0xfb   :  { %4992 = vmatpush1.bf16.msra.mxu0 %v7253_v4  ;;  %v7319_v4 = vld [vmem:[#allocation2 + $0x10e0] ss:$16 sps:$4 sm:$0xff]  }
  0xfc   :  { %5033 = vmatpush1.bf16.msra.mxu1 %v7256_v5  ;;  %4993 = vmatprep.subr.bf16.mxu0 %v7261_v6  ;;  %v881_v5 = vsub.s32 1, %v8313_v57  ;;  %v74_v6 = vld [vmem:[%s8458_s0 + $0x88] sm:$0xff] }
  0xfd   :  { %5034 = vmatprep.subr.bf16.mxu1 %v7264_v7  ;;  %v8326_v7 = vpack.c.bf16 %v69_v63, %v69_v63  ;;  %v7360_v63 = vld [vmem:[#allocation2 + $0x1224] ss:$16 sps:$4 sm:$0xff]  }
  0xff   :  { %4994 = vmatpush1.bf16.msra.mxu0 %v7259_v10  ;;  %v8328_v10 = vpack.c.bf16 %v71_v1, %v71_v1  ;;  %v7358_v1 = vld [vmem:[#allocation2 + $0x1220] ss:$16 sps:$4 sm:$0xff]  }
 0x100   :  { %5035 = vmatpush1.bf16.msra.mxu1 %v7262_v11  ;;  %4995 = vmatprep.subr.bf16.mxu0 %v7267_v12  ;;  %v76_v11 = vld [vmem:[%s8458_s0 + $0x98] sm:$0xff]  ;;  %v878_v12 = vrot.slane %v873_v62, %v877_v0  ;;  %v7355_v0 = vld [vmem:[#allocation2 + $0x1020] ss:$16 sps:$4 sm:$0xff]  }
 0x101   :  { %5036 = vmatprep.subr.bf16.mxu1 %v7270_v13  ;;  %v7322_v13 = vld [vmem:[#allocation2 + $0x12e0] ss:$16 sps:$4 sm:$0xff]  }
 0x103   :  { %4996 = vmatpush1.bf16.msra.mxu0 %v7265_v14  ;;  %v7327_v14 = vld [vmem:[#allocation2 + $0x10c4] ss:$16 sps:$4 sm:$0xff]  }
 0x104   :  { %5037 = vmatpush1.bf16.msra.mxu1 %v7268_v15  ;;  %4997 = vmatprep.subr.bf16.mxu0 %v7273_v16  ;;  %v7330_v15 = vld [vmem:[#allocation2 + $0x12c4] ss:$16 sps:$4 sm:$0xff]   ;;  %v882_v16 = vrot.slane %v873_v62, %v881_v5  ;;  %v7364_v5 = vld [vmem:[#allocation2 + $0x1200] ss:$16 sps:$4 sm:$0xff]  }
 0x105   :  { %5038 = vmatprep.subr.bf16.mxu1 %v7276_v17  ;;  %v8333_v17 = vpack.c.bf16 %v74_v6, %v74_v6  ;;  %v7357_v62 = vld [vmem:[#allocation2 + $0x1024] ss:$16 sps:$4 sm:$0xff]  }
 0x106   :  { %v7369_v6 = vld [vmem:[#allocation2 + $0x11e4] ss:$16 sps:$4 sm:$0xff]  }
 0x107   :  { %4998 = vmatpush2.bf16.msra.mxu0 %v7271_v18  ;;  %v8335_v18 = vpack.c.bf16 %v76_v11, %v76_v11  ;;  %v7372_v11 = vld [vmem:[#allocation2 + $0x13e4] ss:$16 sps:$4 sm:$0xff]  }
 0x108   :  { %5039 = vmatpush2.bf16.msra.mxu1 %v7274_v19  ;;  %4999 = vmatprep.subr.bf16.mxu0 %v7279_v22 }
 0x109   :  { %5040 = vmatprep.subr.bf16.mxu1 %v7282_v23  ;;  %v7325_v23 = vld [vmem:[#allocation2 + $0x10c0] ss:$16 sps:$4 sm:$0xff]  }
 0x10b   :  { %5000 = vmatpush2.bf16.msra.mxu0 %v7277_v24 }
 0x10c   :  { %5041 = vmatpush2.bf16.msra.mxu1 %v7280_v25  ;;  %5001 = vmatprep.subr.bf16.mxu0 %v7285_v26  ;;  %v7328_v25 = vld [vmem:[#allocation2 + $0x12c0] ss:$16 sps:$4 sm:$0xff]  }
 0x10d   :  { %5042 = vmatprep.subr.bf16.mxu1 %v7288_v27 }
 0x10f   :  { %5002 = vmatpush2.bf16.msra.mxu0 %v7283_v28  ;;  %v7333_v28 = vld [vmem:[#allocation2 + $0x10a4] ss:$16 sps:$4 sm:$0xff]  }
 0x110   :  { %5043 = vmatpush2.bf16.msra.mxu1 %v7286_v30  ;;  %5003 = vmatprep.subr.bf16.mxu0 %v7291_v31  ;;  %v7336_v30 = vld [vmem:[#allocation2 + $0x12a4] ss:$16 sps:$4 sm:$0xff]  }
 0x111   :  { %5044 = vmatprep.subr.bf16.mxu1 %v7294_v33 }
 0x113   :  { %5004 = vmatpush2.bf16.msra.mxu0 %v7289_v34 }
 0x114   :  { %5045 = vmatpush2.bf16.msra.mxu1 %v7292_v35  ;;  %5005 = vmatprep.subr.bf16.mxu0 %v7297_v36  ;;  %v7331_v36 = vld [vmem:[#allocation2 + $0x10a0] ss:$16 sps:$4 sm:$0xff]  }
 0x115   :  { %5046 = vmatprep.subr.bf16.mxu1 %v7300_v38 }
 0x117   :  { %5006 = vmatpush2.bf16.msra.mxu0 %v7295_v39  ;;  %v7334_v39 = vld [vmem:[#allocation2 + $0x12a0] ss:$16 sps:$4 sm:$0xff]  }
 0x118   :  { %5047 = vmatpush2.bf16.msra.mxu1 %v7298_v41  ;;  %5007 = vmatprep.subr.bf16.mxu0 %v7303_v44 }
 0x119   :  { %5048 = vmatprep.subr.bf16.mxu1 %v7306_v45  ;;  %v7339_v45 = vld [vmem:[#allocation2 + $0x1084] ss:$16 sps:$4 sm:$0xff]  }
 0x11b   :  { %5008 = vmatpush2.bf16.msra.mxu0 %v7301_v46  ;;  %v7342_v46 = vld [vmem:[#allocation2 + $0x1284] ss:$16 sps:$4 sm:$0xff]  }
 0x11c   :  { %5049 = vmatpush2.bf16.msra.mxu1 %v7304_v47  ;;  %5009 = vmatprep.subr.bf16.mxu0 %v7309_v53  ;;  %v7337_v47 = vld [vmem:[#allocation2 + $0x1080] ss:$16 sps:$4 sm:$0xff]   ;;  %v7345_v53 = vld [vmem:[#allocation2 + $0x1064] ss:$16 sps:$4 sm:$0xff]  }
 0x11d   :  { %5050 = vmatprep.subr.bf16.mxu1 %v7312_v54  ;;  %v7348_v54 = vld [vmem:[#allocation2 + $0x1264] ss:$16 sps:$4 sm:$0xff]  }
 0x11f   :  { %5010 = vmatpush2.bf16.msra.mxu0 %v7307_v55  ;;  %v7343_v55 = vld [vmem:[#allocation2 + $0x1060] ss:$16 sps:$4 sm:$0xff]  }
 0x120   :  { %5051 = vmatpush2.bf16.msra.mxu1 %v7310_v56  ;;  %5011 = vmatprep.subr.bf16.mxu0 %v7315_v58  ;;  %v7346_v56 = vld [vmem:[#allocation2 + $0x1260] ss:$16 sps:$4 sm:$0xff]   ;;  %v7351_v58 = vld [vmem:[#allocation2 + $0x1044] ss:$16 sps:$4 sm:$0xff]  }
 0x121   :  { %5052 = vmatprep.subr.bf16.mxu1 %v7318_v59  ;;  %v7354_v59 = vld [vmem:[#allocation2 + $0x1244] ss:$16 sps:$4 sm:$0xff]  }
 0x123   :  { %5012 = vmatpush2.bf16.msra.mxu0 %v7313_v60  ;;  %v7349_v60 = vld [vmem:[#allocation2 + $0x1040] ss:$16 sps:$4 sm:$0xff]  }
 0x124   :  { %5053 = vmatpush2.bf16.msra.mxu1 %v7316_v61  ;;  %5063 = vmatprep.subr.bf16.mxu0 %v7321_v2  ;;  %v7352_v61 = vld [vmem:[#allocation2 + $0x1240] ss:$16 sps:$4 sm:$0xff]   ;;  %v7363_v2 = vld [vmem:[#allocation2 + $0x1004] ss:$16 sps:$4 sm:$0xff]  }
 0x125   :  { %5104 = vmatprep.subr.bf16.mxu1 %v7324_v3  ;;  %v7366_v3 = vld [vmem:[#allocation2 + $0x1204] ss:$16 sps:$4 sm:$0xff]  }
 0x126   :  { %v4769_v19 = vpop.f32.mrf.mxu0  ;;  %5014 = vmatmul.mubr.bf16.vlgmr.msra.gmra.mxu0 %v8326_v7 }
 0x127   :  { %v4810_v22 = vpop.f32.mrf.mxu1  ;;  %5055 = vmatmul.mubr.bf16.vlgmr.msra.gmra.mxu1 %v8328_v10  ;;  %v4770_v24 = vadd.f32 %v4769_v19, %v878_v12  ;;  %5064 = vmatpush1.bf16.msra.mxu0 %v7319_v4  ;;  %v7361_v4 = vld [vmem:[#allocation2 + $0x1000] ss:$16 sps:$4 sm:$0xff]  }
 0x128   :  { %5105 = vmatpush1.bf16.msra.mxu1 %v7322_v13  ;;  %v4771_v26 = vpop.f32.mrf.mxu0  ;;  %5065 = vmatprep.subr.bf16.mxu0 %v7327_v14  ;;  %v7367_v12 = vld [vmem:[#allocation2 + $0x11e0] ss:$16 sps:$4 sm:$0xff]   ;;  %v7375_v14 = vld [vmem:[#allocation2 + $0x11c4] ss:$16 sps:$4 sm:$0xff]  }
 0x129   :  { %v4812_v27 = vpop.f32.mrf.mxu1  ;;  %5106 = vmatprep.subr.bf16.mxu1 %v7330_v15  ;;  %v8339_v31 = vadd.f32 %v4810_v22, %v4770_v24  ;;  %v4772_v33 = vadd.f32 %v4771_v26, %v882_v16  ;;  %5095 = vmatprep.mubr.bf16.mxu0 %v8333_v17  ;;  %v7370_v13 = vld [vmem:[#allocation2 + $0x13e0] ss:$16 sps:$4 sm:$0xff]   ;;  %v7378_v15 = vld [vmem:[#allocation2 + $0x13c4] ss:$16 sps:$4 sm:$0xff]  }
 0x12a   :  { %5136 = vmatprep.mubr.bf16.mxu1 %v8335_v18  ;;  %v4773_v34 = vpop.f32.mrf.mxu0  ;;  %v7373_v16 = vld [vmem:[#allocation2 + $0x11c0] ss:$16 sps:$4 sm:$0xff]   ;;  %v7381_v22 = vld [vmem:[#allocation2 + $0x11a4] ss:$16 sps:$4 sm:$0xff]  }
 0x12b   :  { %v4814_v35 = vpop.f32.mrf.mxu1  ;;  %v8343_v38 = vadd.f32 %v4812_v27, %v4772_v33  ;;  %5066 = vmatpush1.bf16.msra.mxu0 %v7325_v23  ;;  %v7376_v19 = vld [vmem:[#allocation2 + $0x13c0] ss:$16 sps:$4 sm:$0xff]   ;;  %v7384_v23 = vld [vmem:[#allocation2 + $0x13a4] ss:$16 sps:$4 sm:$0xff]  }
 0x12c   :  { %5107 = vmatpush1.bf16.msra.mxu1 %v7328_v25  ;;  %v4774_v41 = vpop.f32.mrf.mxu0  ;;  %5067 = vmatprep.subr.bf16.mxu0 %v7333_v28  ;;  %v7379_v24 = vld [vmem:[#allocation2 + $0x11a0] ss:$16 sps:$4 sm:$0xff]   ;;  %v7387_v26 = vld [vmem:[#allocation2 + $0x1184] ss:$16 sps:$4 sm:$0xff]  }
 0x12d   :  { %v4815_v44 = vpop.f32.mrf.mxu1  ;;  %5108 = vmatprep.subr.bf16.mxu1 %v7336_v30  ;;  %v7382_v25 = vld [vmem:[#allocation2 + $0x13a0] ss:$16 sps:$4 sm:$0xff]   ;;  %v7390_v27 = vld [vmem:[#allocation2 + $0x1384] ss:$16 sps:$4 sm:$0xff]  }
 0x12e   :  { %v7385_v28 = vld [vmem:[#allocation2 + $0x1180] ss:$16 sps:$4 sm:$0xff]   ;;  %v7393_v33 = vld [vmem:[#allocation2 + $0x1164] ss:$16 sps:$4 sm:$0xff]  }
 0x12f   :  { %5068 = vmatpush1.bf16.msra.mxu0 %v7331_v36  ;;  %v7388_v30 = vld [vmem:[#allocation2 + $0x1380] ss:$16 sps:$4 sm:$0xff]   ;;  %v7396_v34 = vld [vmem:[#allocation2 + $0x1364] ss:$16 sps:$4 sm:$0xff]  }
 0x130   :  { %5109 = vmatpush1.bf16.msra.mxu1 %v7334_v39  ;;  %5069 = vmatprep.subr.bf16.mxu0 %v7339_v45  ;;  %v7391_v35 = vld [vmem:[#allocation2 + $0x1160] ss:$16 sps:$4 sm:$0xff]   ;;  %v7399_v39 = vld [vmem:[#allocation2 + $0x1144] ss:$16 sps:$4 sm:$0xff]  }
 0x131   :  { %5110 = vmatprep.subr.bf16.mxu1 %v7342_v46  ;;  %v7394_v36 = vld [vmem:[#allocation2 + $0x1360] ss:$16 sps:$4 sm:$0xff]   ;;  %v7402_v41 = vld [vmem:[#allocation2 + $0x1344] ss:$16 sps:$4 sm:$0xff]  }
 0x132   :  { %v7397_v44 = vld [vmem:[#allocation2 + $0x1140] ss:$16 sps:$4 sm:$0xff]   ;;  %v7405_v46 = vld [vmem:[#allocation2 + $0x1124] ss:$16 sps:$4 sm:$0xff]  }
 0x133   :  { %5070 = vmatpush1.bf16.msra.mxu0 %v7337_v47  ;;  %v7400_v45 = vld [vmem:[#allocation2 + $0x1340] ss:$16 sps:$4 sm:$0xff]   ;;  %v7408_v47 = vld [vmem:[#allocation2 + $0x1324] ss:$16 sps:$4 sm:$0xff]  }
 0x134   :  { %5111 = vmatpush1.bf16.msra.mxu1 %v7340_v51  ;;  %5071 = vmatprep.subr.bf16.mxu0 %v7345_v53  ;;  %v7403_v51 = vld [vmem:[#allocation2 + $0x1120] ss:$16 sps:$4 sm:$0xff]  }
 0x135   :  { %5112 = vmatprep.subr.bf16.mxu1 %v7348_v54  ;;  %v7406_v53 = vld [vmem:[#allocation2 + $0x1320] ss:$16 sps:$4 sm:$0xff]   ;;  %v7411_v54 = vld [vmem:[#allocation2 + $0x1104] ss:$16 sps:$4 sm:$0xff]  }
 0x137   :  { %5072 = vmatpush1.bf16.msra.mxu0 %v7343_v55  ;;  %v7414_v55 = vld [vmem:[#allocation2 + $0x1304] ss:$16 sps:$4 sm:$0xff]  }
 0x138   :  { %5113 = vmatpush1.bf16.msra.mxu1 %v7346_v56  ;;  %5073 = vmatprep.subr.bf16.mxu0 %v7351_v58  ;;  %v7409_v56 = vld [vmem:[#allocation2 + $0x1100] ss:$16 sps:$4 sm:$0xff]  }
 0x139   :  { %5114 = vmatprep.subr.bf16.mxu1 %v7354_v59  ;;  %v7412_v58 = vld [vmem:[#allocation2 + $0x1300] ss:$16 sps:$4 sm:$0xff]  }
 0x13a   :  { %v73_v59 = vld [vmem:[%s8458_s0 + $0x80] sm:$0xff] }
 0x13b   :  { %5074 = vmatpush1.bf16.msra.mxu0 %v7349_v60  ;;  %v75_v60 = vld [vmem:[%s8458_s0 + $0x90] sm:$0xff] }
 0x13c   :  { %5115 = vmatpush1.bf16.msra.mxu1 %v7352_v61  ;;  %5075 = vmatprep.subr.bf16.mxu0 %v7357_v62  ;;  %v7417_v61 = vld [vmem:[#allocation2 + $0x14e4] ss:$16 sps:$4 sm:$0xff]  }
 0x13d   :  { %5116 = vmatprep.subr.bf16.mxu1 %v7360_v63  ;;  %v7420_v62 = vld [vmem:[#allocation2 + $0x16e4] ss:$16 sps:$4 sm:$0xff]   ;;  %v78_v63 = vld [vmem:[%s8458_s0 + $0xa8] sm:$0xff] }
 0x13f   :  { %5076 = vmatpush1.bf16.msra.mxu0 %v7355_v0  ;;  %v80_v0 = vld [vmem:[%s8458_s0 + $0xb8] sm:$0xff] }
 0x140   :  { %5117 = vmatpush1.bf16.msra.mxu1 %v7358_v1  ;;  %5077 = vmatprep.subr.bf16.mxu0 %v7363_v2  ;;  %v7415_v1 = vld [vmem:[#allocation2 + $0x14e0] ss:$16 sps:$4 sm:$0xff]  }
 0x141   :  { %5118 = vmatprep.subr.bf16.mxu1 %v7366_v3  ;;  %v7418_v2 = vld [vmem:[#allocation2 + $0x16e0] ss:$16 sps:$4 sm:$0xff]   ;;  %v8357_v3 = vpack.c.bf16 %v73_v59, %v73_v59  ;;  %v7456_v59 = vld [vmem:[#allocation2 + $0x1624] ss:$16 sps:$4 sm:$0xff]  }
 0x143   :  { %5078 = vmatpush1.bf16.msra.mxu0 %v7361_v4  ;;  %v8359_v4 = vpack.c.bf16 %v75_v60, %v75_v60  ;;  %v7451_v60 = vld [vmem:[#allocation2 + $0x1420] ss:$16 sps:$4 sm:$0xff]  }
 0x144   :  { %5119 = vmatpush1.bf16.msra.mxu1 %v7364_v5  ;;  %5079 = vmatprep.subr.bf16.mxu0 %v7369_v6  ;;  %v7423_v5 = vld [vmem:[#allocation2 + $0x14c4] ss:$16 sps:$4 sm:$0xff]  }
 0x145   :  { %5120 = vmatprep.subr.bf16.mxu1 %v7372_v11  ;;  %v7426_v6 = vld [vmem:[#allocation2 + $0x16c4] ss:$16 sps:$4 sm:$0xff]   ;;  %v7421_v11 = vld [vmem:[#allocation2 + $0x14c0] ss:$16 sps:$4 sm:$0xff]  }
 0x147   :  { %5080 = vmatpush2.bf16.msra.mxu0 %v7367_v12  ;;  %v7424_v12 = vld [vmem:[#allocation2 + $0x16c0] ss:$16 sps:$4 sm:$0xff]  }
 0x148   :  { %5121 = vmatpush2.bf16.msra.mxu1 %v7370_v13  ;;  %5081 = vmatprep.subr.bf16.mxu0 %v7375_v14  ;;  %v8361_v13 = vpack.c.bf16 %v78_v63, %v78_v63  ;;  %v8363_v14 = vpack.c.bf16 %v80_v0, %v80_v0  ;;  %v7462_v63 = vld [vmem:[#allocation2 + $0x1604] ss:$16 sps:$4 sm:$0xff]   ;;  %v7457_v0 = vld [vmem:[#allocation2 + $0x1400] ss:$16 sps:$4 sm:$0xff]  }
 0x149   :  { %5122 = vmatprep.subr.bf16.mxu1 %v7378_v15 }
 0x14b   :  { %5082 = vmatpush2.bf16.msra.mxu0 %v7373_v16 }
 0x14c   :  { %5123 = vmatpush2.bf16.msra.mxu1 %v7376_v19  ;;  %5083 = vmatprep.subr.bf16.mxu0 %v7381_v22 }
 0x14d   :  { %5124 = vmatprep.subr.bf16.mxu1 %v7384_v23 }
 0x14f   :  { %5084 = vmatpush2.bf16.msra.mxu0 %v7379_v24  ;;  %v7429_v24 = vld [vmem:[#allocation2 + $0x14a4] ss:$16 sps:$4 sm:$0xff]  }
 0x150   :  { %5125 = vmatpush2.bf16.msra.mxu1 %v7382_v25  ;;  %5085 = vmatprep.subr.bf16.mxu0 %v7387_v26  ;;  %v7432_v25 = vld [vmem:[#allocation2 + $0x16a4] ss:$16 sps:$4 sm:$0xff]  }
 0x151   :  { %5126 = vmatprep.subr.bf16.mxu1 %v7390_v27 }
 0x153   :  { %5086 = vmatpush2.bf16.msra.mxu0 %v7385_v28  ;;  %v7427_v28 = vld [vmem:[#allocation2 + $0x14a0] ss:$16 sps:$4 sm:$0xff]  }
 0x154   :  { %5127 = vmatpush2.bf16.msra.mxu1 %v7388_v30  ;;  %5087 = vmatprep.subr.bf16.mxu0 %v7393_v33  ;;  %v7430_v30 = vld [vmem:[#allocation2 + $0x16a0] ss:$16 sps:$4 sm:$0xff]  }
 0x155   :  { %5128 = vmatprep.subr.bf16.mxu1 %v7396_v34 }
 0x157   :  { %5088 = vmatpush2.bf16.msra.mxu0 %v7391_v35 }
 0x158   :  { %5129 = vmatpush2.bf16.msra.mxu1 %v7394_v36  ;;  %5089 = vmatprep.subr.bf16.mxu0 %v7399_v39  ;;  %v7435_v39 = vld [vmem:[#allocation2 + $0x1484] ss:$16 sps:$4 sm:$0xff]  }
 0x159   :  { %5130 = vmatprep.subr.bf16.mxu1 %v7402_v41  ;;  %v7438_v41 = vld [vmem:[#allocation2 + $0x1684] ss:$16 sps:$4 sm:$0xff]  }
 0x15b   :  { %5090 = vmatpush2.bf16.msra.mxu0 %v7397_v44  ;;  %v7436_v44 = vld [vmem:[#allocation2 + $0x1680] ss:$16 sps:$4 sm:$0xff]  }
 0x15c   :  { %5131 = vmatpush2.bf16.msra.mxu1 %v7400_v45  ;;  %5091 = vmatprep.subr.bf16.mxu0 %v7405_v46  ;;  %v7441_v45 = vld [vmem:[#allocation2 + $0x1464] ss:$16 sps:$4 sm:$0xff]  }
 0x15d   :  { %5132 = vmatprep.subr.bf16.mxu1 %v7408_v47  ;;  %v7444_v46 = vld [vmem:[#allocation2 + $0x1664] ss:$16 sps:$4 sm:$0xff]   ;;  %v7439_v47 = vld [vmem:[#allocation2 + $0x1460] ss:$16 sps:$4 sm:$0xff]  }
 0x15f   :  { %5092 = vmatpush2.bf16.msra.mxu0 %v7403_v51  ;;  %v7442_v51 = vld [vmem:[#allocation2 + $0x1660] ss:$16 sps:$4 sm:$0xff]  }
 0x160   :  { %5133 = vmatpush2.bf16.msra.mxu1 %v7406_v53  ;;  %5093 = vmatprep.subr.bf16.mxu0 %v7411_v54  ;;  %v7447_v53 = vld [vmem:[#allocation2 + $0x1444] ss:$16 sps:$4 sm:$0xff]  }
 0x161   :  { %5134 = vmatprep.subr.bf16.mxu1 %v7414_v55  ;;  %v7450_v54 = vld [vmem:[#allocation2 + $0x1644] ss:$16 sps:$4 sm:$0xff]   ;;  %v7445_v55 = vld [vmem:[#allocation2 + $0x1440] ss:$16 sps:$4 sm:$0xff]  }
 0x163   :  { %5094 = vmatpush2.bf16.msra.mxu0 %v7409_v56  ;;  %v7448_v56 = vld [vmem:[#allocation2 + $0x1640] ss:$16 sps:$4 sm:$0xff]  }
 0x164   :  { %5135 = vmatpush2.bf16.msra.mxu1 %v7412_v58  ;;  %5145 = vmatprep.subr.bf16.mxu0 %v7417_v61  ;;  %v7453_v58 = vld [vmem:[#allocation2 + $0x1424] ss:$16 sps:$4 sm:$0xff]   ;;  %v7454_v61 = vld [vmem:[#allocation2 + $0x1620] ss:$16 sps:$4 sm:$0xff]  }
 0x165   :  { %5186 = vmatprep.subr.bf16.mxu1 %v7420_v62  ;;  %v7459_v62 = vld [vmem:[#allocation2 + $0x1404] ss:$16 sps:$4 sm:$0xff]  }
 0x166   :  { %v4851_v15 = vpop.f32.mrf.mxu0  ;;  %5096 = vmatmul.mubr.bf16.vlgmr.msra.gmra.mxu0 %v8357_v3 }
 0x167   :  { %v4892_v16 = vpop.f32.mrf.mxu1  ;;  %5137 = vmatmul.mubr.bf16.vlgmr.msra.gmra.mxu1 %v8359_v4  ;;  %v4852_v19 = vadd.f32 %v4851_v15, %v8339_v31  ;;  %5146 = vmatpush1.bf16.msra.mxu0 %v7415_v1  ;;  %v7460_v1 = vld [vmem:[#allocation2 + $0x1600] ss:$16 sps:$4 sm:$0xff]   ;;  %v7474_v15 = vld [vmem:[#allocation2 + $0x17c4] ss:$16 sps:$4 sm:$0xff]  }
 0x168   :  { %5187 = vmatpush1.bf16.msra.mxu1 %v7418_v2  ;;  %v4853_v22 = vpop.f32.mrf.mxu0  ;;  %5147 = vmatprep.subr.bf16.mxu0 %v7423_v5  ;;  %v7465_v2 = vld [vmem:[#allocation2 + $0x15e4] ss:$16 sps:$4 sm:$0xff]  }
 0x169   :  { %v4894_v23 = vpop.f32.mrf.mxu1  ;;  %5188 = vmatprep.subr.bf16.mxu1 %v7426_v6  ;;  %v8368_v26 = vadd.f32 %v4892_v16, %v4852_v19  ;;  %v4854_v27 = vadd.f32 %v4853_v22, %v8343_v38  ;;  %5177 = vmatprep.mubr.bf16.mxu0 %v8361_v13  ;;  %v7433_v38 = vld [vmem:[#allocation2 + $0x1480] ss:$16 sps:$4 sm:$0xff]   ;;  %v7468_v5 = vld [vmem:[#allocation2 + $0x17e4] ss:$16 sps:$4 sm:$0xff]  }
 0x16a   :  { %5218 = vmatprep.mubr.bf16.mxu1 %v8363_v14  ;;  %v4855_v33 = vpop.f32.mrf.mxu0  ;;  %v7463_v6 = vld [vmem:[#allocation2 + $0x15e0] ss:$16 sps:$4 sm:$0xff]   ;;  %v7477_v22 = vld [vmem:[#allocation2 + $0x15a4] ss:$16 sps:$4 sm:$0xff]  }
 0x16b   :  { %v4896_v31 = vpop.f32.mrf.mxu1  ;;  %v8373_v34 = vadd.f32 %v4894_v23, %v4854_v27  ;;  %5148 = vmatpush1.bf16.msra.mxu0 %v7421_v11  ;;  %v7466_v11 = vld [vmem:[#allocation2 + $0x17e0] ss:$16 sps:$4 sm:$0xff]   ;;  %v7480_v23 = vld [vmem:[#allocation2 + $0x17a4] ss:$16 sps:$4 sm:$0xff]  }
 0x16c   :  { %5189 = vmatpush1.bf16.msra.mxu1 %v7424_v12  ;;  %v4856_v35 = vpop.f32.mrf.mxu0  ;;  %5149 = vmatprep.subr.bf16.mxu0 %v7429_v24  ;;  %v7471_v12 = vld [vmem:[#allocation2 + $0x15c4] ss:$16 sps:$4 sm:$0xff]   ;;  %v7469_v16 = vld [vmem:[#allocation2 + $0x15c0] ss:$16 sps:$4 sm:$0xff]  }
 0x16d   :  { %v4897_v36 = vpop.f32.mrf.mxu1  ;;  %5190 = vmatprep.subr.bf16.mxu1 %v7432_v25  ;;  %v7472_v19 = vld [vmem:[#allocation2 + $0x17c0] ss:$16 sps:$4 sm:$0xff]   ;;  %v7483_v27 = vld [vmem:[#allocation2 + $0x1584] ss:$16 sps:$4 sm:$0xff]  }
 0x16e   :  { %v7475_v24 = vld [vmem:[#allocation2 + $0x15a0] ss:$16 sps:$4 sm:$0xff]   ;;  %v7489_v31 = vld [vmem:[#allocation2 + $0x1564] ss:$16 sps:$4 sm:$0xff]  }
 0x16f   :  { %5150 = vmatpush1.bf16.msra.mxu0 %v7427_v28  ;;  %v7478_v25 = vld [vmem:[#allocation2 + $0x17a0] ss:$16 sps:$4 sm:$0xff]   ;;  %v7486_v28 = vld [vmem:[#allocation2 + $0x1784] ss:$16 sps:$4 sm:$0xff]  }
 0x170   :  { %5191 = vmatpush1.bf16.msra.mxu1 %v7430_v30  ;;  %5151 = vmatprep.subr.bf16.mxu0 %v7435_v39  ;;  %v7481_v30 = vld [vmem:[#allocation2 + $0x1580] ss:$16 sps:$4 sm:$0xff]   ;;  %v7492_v35 = vld [vmem:[#allocation2 + $0x1764] ss:$16 sps:$4 sm:$0xff]  }
 0x171   :  { %5192 = vmatprep.subr.bf16.mxu1 %v7438_v41  ;;  %v7484_v33 = vld [vmem:[#allocation2 + $0x1780] ss:$16 sps:$4 sm:$0xff]   ;;  %v7495_v41 = vld [vmem:[#allocation2 + $0x1544] ss:$16 sps:$4 sm:$0xff]  }
 0x172   :  { %v7487_v36 = vld [vmem:[#allocation2 + $0x1560] ss:$16 sps:$4 sm:$0xff]  }
 0x173   :  { %5152 = vmatpush1.bf16.msra.mxu0 %v7433_v38  ;;  %v7490_v39 = vld [vmem:[#allocation2 + $0x1760] ss:$16 sps:$4 sm:$0xff]   ;;  %v7498_v38 = vld [vmem:[#allocation2 + $0x1744] ss:$16 sps:$4 sm:$0xff]  }
 0x174   :  { %5193 = vmatpush1.bf16.msra.mxu1 %v7436_v44  ;;  %5153 = vmatprep.subr.bf16.mxu0 %v7441_v45  ;;  %v7493_v44 = vld [vmem:[#allocation2 + $0x1540] ss:$16 sps:$4 sm:$0xff]  }
 0x175   :  { %5194 = vmatprep.subr.bf16.mxu1 %v7444_v46  ;;  %v7496_v45 = vld [vmem:[#allocation2 + $0x1740] ss:$16 sps:$4 sm:$0xff]   ;;  %v7501_v46 = vld [vmem:[#allocation2 + $0x1524] ss:$16 sps:$4 sm:$0xff]  }
 0x177   :  { %5154 = vmatpush1.bf16.msra.mxu0 %v7439_v47  ;;  %v7504_v47 = vld [vmem:[#allocation2 + $0x1724] ss:$16 sps:$4 sm:$0xff]  }
 0x178   :  { %5195 = vmatpush1.bf16.msra.mxu1 %v7442_v51  ;;  %5155 = vmatprep.subr.bf16.mxu0 %v7447_v53  ;;  %v7499_v51 = vld [vmem:[#allocation2 + $0x1520] ss:$16 sps:$4 sm:$0xff]  }
 0x179   :  { %5196 = vmatprep.subr.bf16.mxu1 %v7450_v54  ;;  %v7502_v53 = vld [vmem:[#allocation2 + $0x1720] ss:$16 sps:$4 sm:$0xff]   ;;  %v7507_v54 = vld [vmem:[#allocation2 + $0x1504] ss:$16 sps:$4 sm:$0xff]  }
 0x17b   :  { %5156 = vmatpush1.bf16.msra.mxu0 %v7445_v55  ;;  %v7510_v55 = vld [vmem:[#allocation2 + $0x1704] ss:$16 sps:$4 sm:$0xff]  }
 0x17c   :  { %5197 = vmatpush1.bf16.msra.mxu1 %v7448_v56  ;;  %5157 = vmatprep.subr.bf16.mxu0 %v7453_v58  ;;  %v7505_v56 = vld [vmem:[#allocation2 + $0x1500] ss:$16 sps:$4 sm:$0xff]  }
 0x17d   :  { %5198 = vmatprep.subr.bf16.mxu1 %v7456_v59  ;;  %v7508_v58 = vld [vmem:[#allocation2 + $0x1700] ss:$16 sps:$4 sm:$0xff]  }
 0x17e   :  { %v77_v59 = vld [vmem:[%s8458_s0 + $0xa0] sm:$0xff] }
 0x17f   :  { %5158 = vmatpush1.bf16.msra.mxu0 %v7451_v60  ;;  %v79_v60 = vld [vmem:[%s8458_s0 + $0xb0] sm:$0xff] }
 0x180   :  { %5199 = vmatpush1.bf16.msra.mxu1 %v7454_v61  ;;  %5159 = vmatprep.subr.bf16.mxu0 %v7459_v62  ;;  %v7513_v61 = vld [vmem:[#allocation2 + $0xec] ss:$16 sps:$4 sm:$0xff]  }
 0x181   :  { %5200 = vmatprep.subr.bf16.mxu1 %v7462_v63  ;;  %v7516_v62 = vld [vmem:[#allocation2 + $0x2ec] ss:$16 sps:$4 sm:$0xff]   ;;  %v7511_v63 = vld [vmem:[#allocation2 + $0xe8] ss:$16 sps:$4 sm:$0xff]  }
 0x183   :  { %5160 = vmatpush1.bf16.msra.mxu0 %v7457_v0  ;;  %v7514_v0 = vld [vmem:[#allocation2 + $0x2e8] ss:$16 sps:$4 sm:$0xff]  }
 0x184   :  { %5201 = vmatpush1.bf16.msra.mxu1 %v7460_v1  ;;  %5161 = vmatprep.subr.bf16.mxu0 %v7465_v2  ;;  %v8381_v1 = vpack.c.bf16 %v77_v59, %v77_v59  ;;  %v8383_v2 = vpack.c.bf16 %v79_v60, %v79_v60  ;;  %v7550_v59 = vld [vmem:[#allocation2 + $0x228] ss:$16 sps:$4 sm:$0xff]   ;;  %v7555_v60 = vld [vmem:[#allocation2 + $0xc] ss:$16 sps:$4 sm:$0xff]  }
 0x185   :  { %5202 = vmatprep.subr.bf16.mxu1 %v7468_v5  ;;  %v7519_v5 = vld [vmem:[#allocation2 + $0xcc] ss:$16 sps:$4 sm:$0xff]  }
 0x187   :  { %5162 = vmatpush2.bf16.msra.mxu0 %v7463_v6  ;;  %v7522_v6 = vld [vmem:[#allocation2 + $0x2cc] ss:$16 sps:$4 sm:$0xff]  }
 0x188   :  { %5203 = vmatpush2.bf16.msra.mxu1 %v7466_v11  ;;  %5163 = vmatprep.subr.bf16.mxu0 %v7471_v12  ;;  %v7517_v11 = vld [vmem:[#allocation2 + $0xc8] ss:$16 sps:$4 sm:$0xff]  }
 0x189   :  { %5204 = vmatprep.subr.bf16.mxu1 %v7474_v15  ;;  %v7520_v12 = vld [vmem:[#allocation2 + $0x2c8] ss:$16 sps:$4 sm:$0xff]  }
 0x18b   :  { %5164 = vmatpush2.bf16.msra.mxu0 %v7469_v16 }
 0x18c   :  { %5205 = vmatpush2.bf16.msra.mxu1 %v7472_v19  ;;  %5165 = vmatprep.subr.bf16.mxu0 %v7477_v22 }
 0x18d   :  { %5206 = vmatprep.subr.bf16.mxu1 %v7480_v23 }
 0x18f   :  { %5166 = vmatpush2.bf16.msra.mxu0 %v7475_v24  ;;  %v7525_v24 = vld [vmem:[#allocation2 + $0xac] ss:$16 sps:$4 sm:$0xff]  }
 0x190   :  { %5207 = vmatpush2.bf16.msra.mxu1 %v7478_v25  ;;  %5167 = vmatprep.subr.bf16.mxu0 %v7483_v27  ;;  %v7528_v25 = vld [vmem:[#allocation2 + $0x2ac] ss:$16 sps:$4 sm:$0xff]  }
 0x191   :  { %5208 = vmatprep.subr.bf16.mxu1 %v7486_v28 }
 0x193   :  { %5168 = vmatpush2.bf16.msra.mxu0 %v7481_v30  ;;  %v7523_v30 = vld [vmem:[#allocation2 + $0xa8] ss:$16 sps:$4 sm:$0xff]  }
 0x194   :  { %5209 = vmatpush2.bf16.msra.mxu1 %v7484_v33  ;;  %5169 = vmatprep.subr.bf16.mxu0 %v7489_v31  ;;  %v7526_v33 = vld [vmem:[#allocation2 + $0x2a8] ss:$16 sps:$4 sm:$0xff]  }
 0x195   :  { %5210 = vmatprep.subr.bf16.mxu1 %v7492_v35 }
 0x197   :  { %5170 = vmatpush2.bf16.msra.mxu0 %v7487_v36 }
 0x198   :  { %5211 = vmatpush2.bf16.msra.mxu1 %v7490_v39  ;;  %5171 = vmatprep.subr.bf16.mxu0 %v7495_v41  ;;  %v7531_v41 = vld [vmem:[#allocation2 + $0x8c] ss:$16 sps:$4 sm:$0xff]  }
 0x199   :  { %5212 = vmatprep.subr.bf16.mxu1 %v7498_v38  ;;  %v7534_v38 = vld [vmem:[#allocation2 + $0x28c] ss:$16 sps:$4 sm:$0xff]  }
 0x19b   :  { %5172 = vmatpush2.bf16.msra.mxu0 %v7493_v44  ;;  %v7532_v44 = vld [vmem:[#allocation2 + $0x288] ss:$16 sps:$4 sm:$0xff]  }
 0x19c   :  { %5213 = vmatpush2.bf16.msra.mxu1 %v7496_v45  ;;  %5173 = vmatprep.subr.bf16.mxu0 %v7501_v46  ;;  %v7535_v45 = vld [vmem:[#allocation2 + $0x68] ss:$16 sps:$4 sm:$0xff]  }
 0x19d   :  { %5214 = vmatprep.subr.bf16.mxu1 %v7504_v47  ;;  %v7538_v46 = vld [vmem:[#allocation2 + $0x268] ss:$16 sps:$4 sm:$0xff]   ;;  %v7543_v47 = vld [vmem:[#allocation2 + $0x4c] ss:$16 sps:$4 sm:$0xff]  }
 0x19f   :  { %5174 = vmatpush2.bf16.msra.mxu0 %v7499_v51  ;;  %v7546_v51 = vld [vmem:[#allocation2 + $0x24c] ss:$16 sps:$4 sm:$0xff]  }
 0x1a0   :  { %5215 = vmatpush2.bf16.msra.mxu1 %v7502_v53  ;;  %5175 = vmatprep.subr.bf16.mxu0 %v7507_v54  ;;  %v7541_v53 = vld [vmem:[#allocation2 + $0x48] ss:$16 sps:$4 sm:$0xff]  }
 0x1a1   :  { %5216 = vmatprep.subr.bf16.mxu1 %v7510_v55  ;;  %v7544_v54 = vld [vmem:[#allocation2 + $0x248] ss:$16 sps:$4 sm:$0xff]   ;;  %v7549_v55 = vld [vmem:[#allocation2 + $0x2c] ss:$16 sps:$4 sm:$0xff]  }
 0x1a3   :  { %5176 = vmatpush2.bf16.msra.mxu0 %v7505_v56  ;;  %v7552_v56 = vld [vmem:[#allocation2 + $0x22c] ss:$16 sps:$4 sm:$0xff]  }
 0x1a4   :  { %5217 = vmatpush2.bf16.msra.mxu1 %v7508_v58  ;;  %5227 = vmatprep.subr.bf16.mxu0 %v7513_v61  ;;  %v7547_v58 = vld [vmem:[#allocation2 + $0x28] ss:$16 sps:$4 sm:$0xff]   ;;  %v7558_v61 = vld [vmem:[#allocation2 + $0x20c] ss:$16 sps:$4 sm:$0xff]  }
 0x1a5   :  { %5268 = vmatprep.subr.bf16.mxu1 %v7516_v62  ;;  %v7553_v62 = vld [vmem:[#allocation2 + $0x8] ss:$16 sps:$4 sm:$0xff]  }
 0x1a6   :  { %v4933_v15 = vpop.f32.mrf.mxu0  ;;  %5178 = vmatmul.mubr.bf16.vlgmr.msra.gmra.mxu0 %v8381_v1 }
 0x1a7   :  { %v4974_v16 = vpop.f32.mrf.mxu1  ;;  %5219 = vmatmul.mubr.bf16.vlgmr.msra.gmra.mxu1 %v8383_v2  ;;  %v4934_v19 = vadd.f32 %v4933_v15, %v8368_v26  ;;  %5228 = vmatpush1.bf16.msra.mxu0 %v7511_v63  ;;  %v7556_v63 = vld [vmem:[#allocation2 + $0x208] ss:$16 sps:$4 sm:$0xff]   ;;  %v7570_v15 = vld [vmem:[#allocation2 + $0x3cc] ss:$16 sps:$4 sm:$0xff]  }
 0x1a8   :  { %5269 = vmatpush1.bf16.msra.mxu1 %v7514_v0  ;;  %v4935_v22 = vpop.f32.mrf.mxu0  ;;  %5229 = vmatprep.subr.bf16.mxu0 %v7519_v5  ;;  %v7561_v0 = vld [vmem:[#allocation2 + $0x1ec] ss:$16 sps:$4 sm:$0xff]  }
 0x1a9   :  { %v4976_v23 = vpop.f32.mrf.mxu1  ;;  %5270 = vmatprep.subr.bf16.mxu1 %v7522_v6  ;;  %v8388_v27 = vadd.f32 %v4974_v16, %v4934_v19  ;;  %v4936_v28 = vadd.f32 %v4935_v22, %v8373_v34  ;;  %5259 = vmatprep.mubr.bf16.mxu0 %v8232_v49  ;;  %v7529_v34 = vld [vmem:[#allocation2 + $0x88] ss:$16 sps:$4 sm:$0xff]   ;;  %v7537_v49 = vld [vmem:[#allocation2 + $0x6c] ss:$16 sps:$4 sm:$0xff]  }
 0x1aa   :  { %5300 = vmatprep.mubr.bf16.mxu1 %v8237_v52  ;;  %v4937_v31 = vpop.f32.mrf.mxu0  ;;  %v7540_v52 = vld [vmem:[#allocation2 + $0x26c] ss:$16 sps:$4 sm:$0xff]   ;;  %v7559_v6 = vld [vmem:[#allocation2 + $0x1e8] ss:$16 sps:$4 sm:$0xff]  }
 0x1ab   :  { %v4978_v26 = vpop.f32.mrf.mxu1  ;;  %v8393_v35 = vadd.f32 %v4976_v23, %v4936_v28  ;;  %5230 = vmatpush1.bf16.msra.mxu0 %v7517_v11  ;;  %v7564_v5 = vld [vmem:[#allocation2 + $0x3ec] ss:$16 sps:$4 sm:$0xff]   ;;  %v7562_v11 = vld [vmem:[#allocation2 + $0x3e8] ss:$16 sps:$4 sm:$0xff]  }
 0x1ac   :  { %5271 = vmatpush1.bf16.msra.mxu1 %v7520_v12  ;;  %v4938_v36 = vpop.f32.mrf.mxu0  ;;  %5231 = vmatprep.subr.bf16.mxu0 %v7525_v24  ;;  %v7567_v12 = vld [vmem:[#allocation2 + $0x1cc] ss:$16 sps:$4 sm:$0xff]   ;;  %v7565_v16 = vld [vmem:[#allocation2 + $0x1c8] ss:$16 sps:$4 sm:$0xff]  }
 0x1ad   :  { %v4979_v39 = vpop.f32.mrf.mxu1  ;;  %5272 = vmatprep.subr.bf16.mxu1 %v7528_v25  ;;  %v7568_v19 = vld [vmem:[#allocation2 + $0x3c8] ss:$16 sps:$4 sm:$0xff]   ;;  %v7573_v22 = vld [vmem:[#allocation2 + $0x1ac] ss:$16 sps:$4 sm:$0xff]  }
 0x1ae   :  { %v7576_v23 = vld [vmem:[#allocation2 + $0x3ac] ss:$16 sps:$4 sm:$0xff]   ;;  %v7571_v24 = vld [vmem:[#allocation2 + $0x1a8] ss:$16 sps:$4 sm:$0xff]  }
 0x1af   :  { %5232 = vmatpush1.bf16.msra.mxu0 %v7523_v30  ;;  %v7574_v25 = vld [vmem:[#allocation2 + $0x3a8] ss:$16 sps:$4 sm:$0xff]   ;;  %v7579_v28 = vld [vmem:[#allocation2 + $0x18c] ss:$16 sps:$4 sm:$0xff]  }
 0x1b0   :  { %5273 = vmatpush1.bf16.msra.mxu1 %v7526_v33  ;;  %5233 = vmatprep.subr.bf16.mxu0 %v7531_v41  ;;  %v7582_v30 = vld [vmem:[#allocation2 + $0x38c] ss:$16 sps:$4 sm:$0xff]   ;;  %v7577_v33 = vld [vmem:[#allocation2 + $0x188] ss:$16 sps:$4 sm:$0xff]  }
 0x1b1   :  { %5274 = vmatprep.subr.bf16.mxu1 %v7534_v38  ;;  %v7580_v31 = vld [vmem:[#allocation2 + $0x388] ss:$16 sps:$4 sm:$0xff]   ;;  %v7585_v26 = vld [vmem:[#allocation2 + $0x16c] ss:$16 sps:$4 sm:$0xff]  }
 0x1b2   :  { %v7588_v36 = vld [vmem:[#allocation2 + $0x36c] ss:$16 sps:$4 sm:$0xff]   ;;  %v7583_v39 = vld [vmem:[#allocation2 + $0x168] ss:$16 sps:$4 sm:$0xff]  }
 0x1b3   :  { %5234 = vmatpush1.bf16.msra.mxu0 %v7529_v34  ;;  %v7586_v41 = vld [vmem:[#allocation2 + $0x368] ss:$16 sps:$4 sm:$0xff]   ;;  %v7591_v38 = vld [vmem:[#allocation2 + $0x14c] ss:$16 sps:$4 sm:$0xff]  }
 0x1b4   :  { %5275 = vmatpush1.bf16.msra.mxu1 %v7532_v44  ;;  %5235 = vmatprep.subr.bf16.mxu0 %v7537_v49  ;;  %v7594_v34 = vld [vmem:[#allocation2 + $0x34c] ss:$16 sps:$4 sm:$0xff]   ;;  %v7589_v44 = vld [vmem:[#allocation2 + $0x148] ss:$16 sps:$4 sm:$0xff]  }
 0x1b5   :  { %5276 = vmatprep.subr.bf16.mxu1 %v7540_v52  ;;  %v7592_v49 = vld [vmem:[#allocation2 + $0x348] ss:$16 sps:$4 sm:$0xff]   ;;  %v7597_v52 = vld [vmem:[#allocation2 + $0x12c] ss:$16 sps:$4 sm:$0xff]  }
 0x1b7   :  { %5236 = vmatpush1.bf16.msra.mxu0 %v7535_v45  ;;  %v7600_v45 = vld [vmem:[#allocation2 + $0x32c] ss:$16 sps:$4 sm:$0xff]  }
 0x1b8   :  { %5277 = vmatpush1.bf16.msra.mxu1 %v7538_v46  ;;  %5237 = vmatprep.subr.bf16.mxu0 %v7543_v47  ;;  %v7595_v46 = vld [vmem:[#allocation2 + $0x128] ss:$16 sps:$4 sm:$0xff]  }
 0x1b9   :  { %5278 = vmatprep.subr.bf16.mxu1 %v7546_v51  ;;  %v7598_v47 = vld [vmem:[#allocation2 + $0x328] ss:$16 sps:$4 sm:$0xff]   ;;  %v7603_v51 = vld [vmem:[#allocation2 + $0x10c] ss:$16 sps:$4 sm:$0xff]  }
 0x1bb   :  { %5238 = vmatpush1.bf16.msra.mxu0 %v7541_v53  ;;  %v7606_v53 = vld [vmem:[#allocation2 + $0x30c] ss:$16 sps:$4 sm:$0xff]  }
 0x1bc   :  { %5279 = vmatpush1.bf16.msra.mxu1 %v7544_v54  ;;  %5239 = vmatprep.subr.bf16.mxu0 %v7549_v55  ;;  %v7601_v54 = vld [vmem:[#allocation2 + $0x108] ss:$16 sps:$4 sm:$0xff]  }
 0x1bd   :  { %5280 = vmatprep.subr.bf16.mxu1 %v7552_v56  ;;  %v7604_v55 = vld [vmem:[#allocation2 + $0x308] ss:$16 sps:$4 sm:$0xff]   ;;  %v7609_v56 = vld [vmem:[#allocation2 + $0x4ec] ss:$16 sps:$4 sm:$0xff]  }
 0x1bf   :  { %5240 = vmatpush1.bf16.msra.mxu0 %v7547_v58  ;;  %v7612_v58 = vld [vmem:[#allocation2 + $0x6ec] ss:$16 sps:$4 sm:$0xff]  }
 0x1c0   :  { %5281 = vmatpush1.bf16.msra.mxu1 %v7550_v59  ;;  %5241 = vmatprep.subr.bf16.mxu0 %v7555_v60  ;;  %v7607_v59 = vld [vmem:[#allocation2 + $0x4e8] ss:$16 sps:$4 sm:$0xff]  }
 0x1c1   :  { %5282 = vmatprep.subr.bf16.mxu1 %v7558_v61  ;;  %v7610_v60 = vld [vmem:[#allocation2 + $0x6e8] ss:$16 sps:$4 sm:$0xff]   ;;  %v7615_v61 = vld [vmem:[#allocation2 + $0x4cc] ss:$16 sps:$4 sm:$0xff]  }
 0x1c3   :  { %5242 = vmatpush1.bf16.msra.mxu0 %v7553_v62  ;;  %v7618_v62 = vld [vmem:[#allocation2 + $0x6cc] ss:$16 sps:$4 sm:$0xff]  }
 0x1c4   :  { %5283 = vmatpush1.bf16.msra.mxu1 %v7556_v63  ;;  %5243 = vmatprep.subr.bf16.mxu0 %v7561_v0  ;;  %v7613_v63 = vld [vmem:[#allocation2 + $0x4c8] ss:$16 sps:$4 sm:$0xff]  }
 0x1c5   :  { %5284 = vmatprep.subr.bf16.mxu1 %v7564_v5  ;;  %v7616_v0 = vld [vmem:[#allocation2 + $0x6c8] ss:$16 sps:$4 sm:$0xff]  }
 0x1c7   :  { %5244 = vmatpush2.bf16.msra.mxu0 %v7559_v6 }
 0x1c8   :  { %5285 = vmatpush2.bf16.msra.mxu1 %v7562_v11  ;;  %5245 = vmatprep.subr.bf16.mxu0 %v7567_v12 }
 0x1c9   :  { %5286 = vmatprep.subr.bf16.mxu1 %v7570_v15 }
 0x1cb   :  { %5246 = vmatpush2.bf16.msra.mxu0 %v7565_v16  ;;  %v7621_v16 = vld [vmem:[#allocation2 + $0x4ac] ss:$16 sps:$4 sm:$0xff]  }
 0x1cc   :  { %5287 = vmatpush2.bf16.msra.mxu1 %v7568_v19  ;;  %5247 = vmatprep.subr.bf16.mxu0 %v7573_v22  ;;  %v7624_v19 = vld [vmem:[#allocation2 + $0x6ac] ss:$16 sps:$4 sm:$0xff]  }
 0x1cd   :  { %5288 = vmatprep.subr.bf16.mxu1 %v7576_v23 }
 0x1cf   :  { %5248 = vmatpush2.bf16.msra.mxu0 %v7571_v24  ;;  %v7619_v24 = vld [vmem:[#allocation2 + $0x4a8] ss:$16 sps:$4 sm:$0xff]  }
 0x1d0   :  { %5289 = vmatpush2.bf16.msra.mxu1 %v7574_v25  ;;  %5249 = vmatprep.subr.bf16.mxu0 %v7579_v28  ;;  %v7622_v25 = vld [vmem:[#allocation2 + $0x6a8] ss:$16 sps:$4 sm:$0xff]  }
 0x1d1   :  { %5290 = vmatprep.subr.bf16.mxu1 %v7582_v30 }
 0x1d3   :  { %5250 = vmatpush2.bf16.msra.mxu0 %v7577_v33  ;;  %v7627_v33 = vld [vmem:[#allocation2 + $0x48c] ss:$16 sps:$4 sm:$0xff]  }
 0x1d4   :  { %5291 = vmatpush2.bf16.msra.mxu1 %v7580_v31  ;;  %5251 = vmatprep.subr.bf16.mxu0 %v7585_v26  ;;  %v7630_v31 = vld [vmem:[#allocation2 + $0x68c] ss:$16 sps:$4 sm:$0xff]   ;;  %v7628_v26 = vld [vmem:[#allocation2 + $0x688] ss:$16 sps:$4 sm:$0xff]  }
 0x1d5   :  { %5292 = vmatprep.subr.bf16.mxu1 %v7588_v36  ;;  %v7631_v36 = vld [vmem:[#allocation2 + $0x468] ss:$16 sps:$4 sm:$0xff]  }
 0x1d7   :  { %5252 = vmatpush2.bf16.msra.mxu0 %v7583_v39  ;;  %v7634_v39 = vld [vmem:[#allocation2 + $0x668] ss:$16 sps:$4 sm:$0xff]  }
 0x1d8   :  { %5293 = vmatpush2.bf16.msra.mxu1 %v7586_v41  ;;  %5253 = vmatprep.subr.bf16.mxu0 %v7591_v38  ;;  %v7639_v41 = vld [vmem:[#allocation2 + $0x44c] ss:$16 sps:$4 sm:$0xff]  }
 0x1d9   :  { %5294 = vmatprep.subr.bf16.mxu1 %v7594_v34  ;;  %v7642_v38 = vld [vmem:[#allocation2 + $0x64c] ss:$16 sps:$4 sm:$0xff]   ;;  %v7637_v34 = vld [vmem:[#allocation2 + $0x448] ss:$16 sps:$4 sm:$0xff]  }
 0x1db   :  { %5254 = vmatpush2.bf16.msra.mxu0 %v7589_v44  ;;  %v7640_v44 = vld [vmem:[#allocation2 + $0x648] ss:$16 sps:$4 sm:$0xff]  }
 0x1dc   :  { %5295 = vmatpush2.bf16.msra.mxu1 %v7592_v49  ;;  %5255 = vmatprep.subr.bf16.mxu0 %v7597_v52  ;;  %v7645_v49 = vld [vmem:[#allocation2 + $0x42c] ss:$16 sps:$4 sm:$0xff]  }
 0x1dd   :  { %5296 = vmatprep.subr.bf16.mxu1 %v7600_v45  ;;  %v7648_v52 = vld [vmem:[#allocation2 + $0x62c] ss:$16 sps:$4 sm:$0xff]   ;;  %v7643_v45 = vld [vmem:[#allocation2 + $0x428] ss:$16 sps:$4 sm:$0xff]  }
 0x1df   :  { %5256 = vmatpush2.bf16.msra.mxu0 %v7595_v46  ;;  %v7646_v46 = vld [vmem:[#allocation2 + $0x628] ss:$16 sps:$4 sm:$0xff]  }
 0x1e0   :  { %5297 = vmatpush2.bf16.msra.mxu1 %v7598_v47  ;;  %5257 = vmatprep.subr.bf16.mxu0 %v7603_v51  ;;  %v7651_v47 = vld [vmem:[#allocation2 + $0x40c] ss:$16 sps:$4 sm:$0xff]  }
 0x1e1   :  { %5298 = vmatprep.subr.bf16.mxu1 %v7606_v53  ;;  %v7654_v51 = vld [vmem:[#allocation2 + $0x60c] ss:$16 sps:$4 sm:$0xff]   ;;  %v7649_v53 = vld [vmem:[#allocation2 + $0x408] ss:$16 sps:$4 sm:$0xff]  }
 0x1e3   :  { %5258 = vmatpush2.bf16.msra.mxu0 %v7601_v54  ;;  %v7652_v54 = vld [vmem:[#allocation2 + $0x608] ss:$16 sps:$4 sm:$0xff]  }
 0x1e4   :  { %5299 = vmatpush2.bf16.msra.mxu1 %v7604_v55  ;;  %5309 = vmatprep.subr.bf16.mxu0 %v7609_v56  ;;  %v7657_v55 = vld [vmem:[#allocation2 + $0x5ec] ss:$16 sps:$4 sm:$0xff]  }
 0x1e5   :  { %5350 = vmatprep.subr.bf16.mxu1 %v7612_v58  ;;  %v7660_v56 = vld [vmem:[#allocation2 + $0x7ec] ss:$16 sps:$4 sm:$0xff]   ;;  %v7655_v58 = vld [vmem:[#allocation2 + $0x5e8] ss:$16 sps:$4 sm:$0xff]  }
 0x1e6   :  { %v5015_v5 = vpop.f32.mrf.mxu0  ;;  %5260 = vmatmul.mubr.bf16.vlgmr.msra.gmra.mxu0 %v8247_v8 }
 0x1e7   :  { %v5056_v6 = vpop.f32.mrf.mxu1  ;;  %5301 = vmatmul.mubr.bf16.vlgmr.msra.gmra.mxu1 %v8249_v9  ;;  %v5016_v11 = vadd.f32 %v5015_v5, %v8388_v27  ;;  %5310 = vmatpush1.bf16.msra.mxu0 %v7607_v59  ;;  %v7658_v59 = vld [vmem:[#allocation2 + $0x7e8] ss:$16 sps:$4 sm:$0xff]   ;;  %v7672_v5 = vld [vmem:[#allocation2 + $0x7ac] ss:$16 sps:$4 sm:$0xff]  }
 0x1e8   :  { %5351 = vmatpush1.bf16.msra.mxu1 %v7610_v60  ;;  %v5017_v12 = vpop.f32.mrf.mxu0  ;;  %5311 = vmatprep.subr.bf16.mxu0 %v7615_v61  ;;  %v7663_v60 = vld [vmem:[#allocation2 + $0x5cc] ss:$16 sps:$4 sm:$0xff]  }
 0x1e9   :  { %v5058_v15 = vpop.f32.mrf.mxu1  ;;  %5352 = vmatprep.subr.bf16.mxu1 %v7618_v62  ;;  %v8398_v22 = vadd.f32 %v5056_v6, %v5016_v11  ;;  %v5018_v23 = vadd.f32 %v5017_v12, %v8393_v35  ;;  %5341 = vmatprep.mubr.bf16.mxu0 %v8256_v37  ;;  %v7625_v35 = vld [vmem:[#allocation2 + $0x488] ss:$16 sps:$4 sm:$0xff]   ;;  %v7633_v37 = vld [vmem:[#allocation2 + $0x46c] ss:$16 sps:$4 sm:$0xff]  }
 0x1ea   :  { %5382 = vmatprep.mubr.bf16.mxu1 %v8261_v40  ;;  %v5019_v8 = vpop.f32.mrf.mxu0  ;;  %v7636_v40 = vld [vmem:[#allocation2 + $0x66c] ss:$16 sps:$4 sm:$0xff]   ;;  %v7661_v62 = vld [vmem:[#allocation2 + $0x5c8] ss:$16 sps:$4 sm:$0xff]  }
 0x1eb   :  { %v5060_v9 = vpop.f32.mrf.mxu1  ;;  %v8403_v27 = vadd.f32 %v5058_v15, %v5018_v23  ;;  %5312 = vmatpush1.bf16.msra.mxu0 %v7613_v63  ;;  %v7666_v61 = vld [vmem:[#allocation2 + $0x7cc] ss:$16 sps:$4 sm:$0xff]   ;;  %v7664_v63 = vld [vmem:[#allocation2 + $0x7c8] ss:$16 sps:$4 sm:$0xff]  }
 0x1ec   :  { %5353 = vmatpush1.bf16.msra.mxu1 %v7616_v0  ;;  %v5020_v28 = vpop.f32.mrf.mxu0  ;;  %5313 = vmatprep.subr.bf16.mxu0 %v7621_v16  ;;  %v7669_v0 = vld [vmem:[#allocation2 + $0x5ac] ss:$16 sps:$4 sm:$0xff]   ;;  %v7667_v6 = vld [vmem:[#allocation2 + $0x5a8] ss:$16 sps:$4 sm:$0xff]  }
 0x1ed   :  { %v5061_v30 = vpop.f32.mrf.mxu1  ;;  %5354 = vmatprep.subr.bf16.mxu1 %v7624_v19  ;;  %v7670_v11 = vld [vmem:[#allocation2 + $0x7a8] ss:$16 sps:$4 sm:$0xff]   ;;  %v7675_v12 = vld [vmem:[#allocation2 + $0x58c] ss:$16 sps:$4 sm:$0xff]  }
 0x1ee   :  { %v7678_v15 = vld [vmem:[#allocation2 + $0x78c] ss:$16 sps:$4 sm:$0xff]   ;;  %v7673_v16 = vld [vmem:[#allocation2 + $0x588] ss:$16 sps:$4 sm:$0xff]  }
 0x1ef   :  { %5314 = vmatpush1.bf16.msra.mxu0 %v7619_v24  ;;  %v7676_v19 = vld [vmem:[#allocation2 + $0x788] ss:$16 sps:$4 sm:$0xff]   ;;  %v7681_v23 = vld [vmem:[#allocation2 + $0x56c] ss:$16 sps:$4 sm:$0xff]  }
 0x1f0   :  { %5355 = vmatpush1.bf16.msra.mxu1 %v7622_v25  ;;  %5315 = vmatprep.subr.bf16.mxu0 %v7627_v33  ;;  %v7684_v24 = vld [vmem:[#allocation2 + $0x76c] ss:$16 sps:$4 sm:$0xff]   ;;  %v7679_v25 = vld [vmem:[#allocation2 + $0x568] ss:$16 sps:$4 sm:$0xff]  }
 0x1f1   :  { %5356 = vmatprep.subr.bf16.mxu1 %v7630_v31  ;;  %v7682_v8 = vld [vmem:[#allocation2 + $0x768] ss:$16 sps:$4 sm:$0xff]   ;;  %v7687_v9 = vld [vmem:[#allocation2 + $0x54c] ss:$16 sps:$4 sm:$0xff]  }
 0x1f2   :  { %v7690_v28 = vld [vmem:[#allocation2 + $0x74c] ss:$16 sps:$4 sm:$0xff]   ;;  %v7685_v30 = vld [vmem:[#allocation2 + $0x548] ss:$16 sps:$4 sm:$0xff]  }
 0x1f3   :  { %5316 = vmatpush1.bf16.msra.mxu0 %v7625_v35  ;;  %v7688_v33 = vld [vmem:[#allocation2 + $0x748] ss:$16 sps:$4 sm:$0xff]   ;;  %v7693_v31 = vld [vmem:[#allocation2 + $0x52c] ss:$16 sps:$4 sm:$0xff]  }
 0x1f4   :  { %5357 = vmatpush1.bf16.msra.mxu1 %v7628_v26  ;;  %5317 = vmatprep.subr.bf16.mxu0 %v7633_v37  ;;  %v7696_v35 = vld [vmem:[#allocation2 + $0x72c] ss:$16 sps:$4 sm:$0xff]   ;;  %v7691_v26 = vld [vmem:[#allocation2 + $0x528] ss:$16 sps:$4 sm:$0xff]  }
 0x1f5   :  { %5358 = vmatprep.subr.bf16.mxu1 %v7636_v40  ;;  %v7694_v37 = vld [vmem:[#allocation2 + $0x728] ss:$16 sps:$4 sm:$0xff]   ;;  %v7699_v40 = vld [vmem:[#allocation2 + $0x50c] ss:$16 sps:$4 sm:$0xff]  }
 0x1f7   :  { %5318 = vmatpush1.bf16.msra.mxu0 %v7631_v36  ;;  %v7702_v36 = vld [vmem:[#allocation2 + $0x70c] ss:$16 sps:$4 sm:$0xff]  }
 0x1f8   :  { %5359 = vmatpush1.bf16.msra.mxu1 %v7634_v39  ;;  %5319 = vmatprep.subr.bf16.mxu0 %v7639_v41  ;;  %v7697_v39 = vld [vmem:[#allocation2 + $0x508] ss:$16 sps:$4 sm:$0xff]  }
 0x1f9   :  { %5360 = vmatprep.subr.bf16.mxu1 %v7642_v38  ;;  %v7700_v41 = vld [vmem:[#allocation2 + $0x708] ss:$16 sps:$4 sm:$0xff]   ;;  %v7705_v38 = vld [vmem:[#allocation2 + $0x8ec] ss:$16 sps:$4 sm:$0xff]  }
 0x1fb   :  { %5320 = vmatpush1.bf16.msra.mxu0 %v7637_v34  ;;  %v7708_v34 = vld [vmem:[#allocation2 + $0xaec] ss:$16 sps:$4 sm:$0xff]  }
 0x1fc   :  { %5361 = vmatpush1.bf16.msra.mxu1 %v7640_v44  ;;  %5321 = vmatprep.subr.bf16.mxu0 %v7645_v49  ;;  %v7703_v44 = vld [vmem:[#allocation2 + $0x8e8] ss:$16 sps:$4 sm:$0xff]  }
 0x1fd   :  { %5362 = vmatprep.subr.bf16.mxu1 %v7648_v52  ;;  %v7706_v49 = vld [vmem:[#allocation2 + $0xae8] ss:$16 sps:$4 sm:$0xff]   ;;  %v7711_v52 = vld [vmem:[#allocation2 + $0x8cc] ss:$16 sps:$4 sm:$0xff]  }
 0x1ff   :  { %5322 = vmatpush1.bf16.msra.mxu0 %v7643_v45  ;;  %v7714_v45 = vld [vmem:[#allocation2 + $0xacc] ss:$16 sps:$4 sm:$0xff]  }
 0x200   :  { %5363 = vmatpush1.bf16.msra.mxu1 %v7646_v46  ;;  %5323 = vmatprep.subr.bf16.mxu0 %v7651_v47 }
 0x201   :  { %5364 = vmatprep.subr.bf16.mxu1 %v7654_v51 }
 0x203   :  { %5324 = vmatpush1.bf16.msra.mxu0 %v7649_v53  ;;  %v7709_v53 = vld [vmem:[#allocation2 + $0x8c8] ss:$16 sps:$4 sm:$0xff]  }
 0x204   :  { %5365 = vmatpush1.bf16.msra.mxu1 %v7652_v54  ;;  %5325 = vmatprep.subr.bf16.mxu0 %v7657_v55  ;;  %v7712_v54 = vld [vmem:[#allocation2 + $0xac8] ss:$16 sps:$4 sm:$0xff]  }
 0x205   :  { %5366 = vmatprep.subr.bf16.mxu1 %v7660_v56 }
 0x207   :  { %5326 = vmatpush2.bf16.msra.mxu0 %v7655_v58  ;;  %v7717_v58 = vld [vmem:[#allocation2 + $0x8ac] ss:$16 sps:$4 sm:$0xff]  }
 0x208   :  { %5367 = vmatpush2.bf16.msra.mxu1 %v7658_v59  ;;  %5327 = vmatprep.subr.bf16.mxu0 %v7663_v60  ;;  %v7720_v59 = vld [vmem:[#allocation2 + $0xaac] ss:$16 sps:$4 sm:$0xff]  }
 0x209   :  { %5368 = vmatprep.subr.bf16.mxu1 %v7666_v61 }
 0x20b   :  { %5328 = vmatpush2.bf16.msra.mxu0 %v7661_v62  ;;  %v7715_v62 = vld [vmem:[#allocation2 + $0x8a8] ss:$16 sps:$4 sm:$0xff]  }
 0x20c   :  { %5369 = vmatpush2.bf16.msra.mxu1 %v7664_v63  ;;  %5329 = vmatprep.subr.bf16.mxu0 %v7669_v0  ;;  %v7718_v63 = vld [vmem:[#allocation2 + $0xaa8] ss:$16 sps:$4 sm:$0xff]  }
 0x20d   :  { %5370 = vmatprep.subr.bf16.mxu1 %v7672_v5 }
 0x20f   :  { %5330 = vmatpush2.bf16.msra.mxu0 %v7667_v6  ;;  %v7723_v6 = vld [vmem:[#allocation2 + $0x88c] ss:$16 sps:$4 sm:$0xff]  }
 0x210   :  { %5371 = vmatpush2.bf16.msra.mxu1 %v7670_v11  ;;  %5331 = vmatprep.subr.bf16.mxu0 %v7675_v12  ;;  %v7726_v11 = vld [vmem:[#allocation2 + $0xa8c] ss:$16 sps:$4 sm:$0xff]  }
 0x211   :  { %5372 = vmatprep.subr.bf16.mxu1 %v7678_v15  ;;  %v7732_v12 = vld [vmem:[#allocation2 + $0xa6c] ss:$16 sps:$4 sm:$0xff]   ;;  %v7727_v15 = vld [vmem:[#allocation2 + $0x868] ss:$16 sps:$4 sm:$0xff]  }
 0x213   :  { %5332 = vmatpush2.bf16.msra.mxu0 %v7673_v16  ;;  %v7730_v16 = vld [vmem:[#allocation2 + $0xa68] ss:$16 sps:$4 sm:$0xff]  }
 0x214   :  { %5373 = vmatpush2.bf16.msra.mxu1 %v7676_v19  ;;  %5333 = vmatprep.subr.bf16.mxu0 %v7681_v23  ;;  %v7735_v19 = vld [vmem:[#allocation2 + $0x84c] ss:$16 sps:$4 sm:$0xff]  }
 0x215   :  { %5374 = vmatprep.subr.bf16.mxu1 %v7684_v24  ;;  %v7738_v23 = vld [vmem:[#allocation2 + $0xa4c] ss:$16 sps:$4 sm:$0xff]   ;;  %v7733_v24 = vld [vmem:[#allocation2 + $0x848] ss:$16 sps:$4 sm:$0xff]  }
 0x217   :  { %5334 = vmatpush2.bf16.msra.mxu0 %v7679_v25  ;;  %v7736_v25 = vld [vmem:[#allocation2 + $0xa48] ss:$16 sps:$4 sm:$0xff]  }
 0x218   :  { %5375 = vmatpush2.bf16.msra.mxu1 %v7682_v8  ;;  %5335 = vmatprep.subr.bf16.mxu0 %v7687_v9  ;;  %v7741_v8 = vld [vmem:[#allocation2 + $0x82c] ss:$16 sps:$4 sm:$0xff]  }
 0x219   :  { %5376 = vmatprep.subr.bf16.mxu1 %v7690_v28  ;;  %v7744_v9 = vld [vmem:[#allocation2 + $0xa2c] ss:$16 sps:$4 sm:$0xff]   ;;  %v7739_v28 = vld [vmem:[#allocation2 + $0x828] ss:$16 sps:$4 sm:$0xff]  }
 0x21b   :  { %5336 = vmatpush2.bf16.msra.mxu0 %v7685_v30  ;;  %v7742_v30 = vld [vmem:[#allocation2 + $0xa28] ss:$16 sps:$4 sm:$0xff]  }
 0x21c   :  { %5377 = vmatpush2.bf16.msra.mxu1 %v7688_v33  ;;  %5337 = vmatprep.subr.bf16.mxu0 %v7693_v31  ;;  %v7747_v33 = vld [vmem:[#allocation2 + $0x80c] ss:$16 sps:$4 sm:$0xff]  }
 0x21d   :  { %5378 = vmatprep.subr.bf16.mxu1 %v7696_v35  ;;  %v7750_v31 = vld [vmem:[#allocation2 + $0xa0c] ss:$16 sps:$4 sm:$0xff]   ;;  %v7745_v35 = vld [vmem:[#allocation2 + $0x808] ss:$16 sps:$4 sm:$0xff]  }
 0x21f   :  { %5338 = vmatpush2.bf16.msra.mxu0 %v7691_v26  ;;  %v7748_v26 = vld [vmem:[#allocation2 + $0xa08] ss:$16 sps:$4 sm:$0xff]  }
 0x220   :  { %5379 = vmatpush2.bf16.msra.mxu1 %v7694_v37  ;;  %5339 = vmatprep.subr.bf16.mxu0 %v7699_v40  ;;  %v7753_v37 = vld [vmem:[#allocation2 + $0x9ec] ss:$16 sps:$4 sm:$0xff]  }
 0x221   :  { %5380 = vmatprep.subr.bf16.mxu1 %v7702_v36  ;;  %v7756_v40 = vld [vmem:[#allocation2 + $0xbec] ss:$16 sps:$4 sm:$0xff]   ;;  %v7751_v36 = vld [vmem:[#allocation2 + $0x9e8] ss:$16 sps:$4 sm:$0xff]  }
 0x223   :  { %5340 = vmatpush2.bf16.msra.mxu0 %v7697_v39  ;;  %v7754_v39 = vld [vmem:[#allocation2 + $0xbe8] ss:$16 sps:$4 sm:$0xff]  }
 0x224   :  { %5381 = vmatpush2.bf16.msra.mxu1 %v7700_v41  ;;  %5391 = vmatprep.subr.bf16.mxu0 %v7705_v38  ;;  %v7759_v41 = vld [vmem:[#allocation2 + $0x9cc] ss:$16 sps:$4 sm:$0xff]  }
 0x225   :  { %5432 = vmatprep.subr.bf16.mxu1 %v7708_v34  ;;  %v7762_v38 = vld [vmem:[#allocation2 + $0xbcc] ss:$16 sps:$4 sm:$0xff]   ;;  %v7757_v34 = vld [vmem:[#allocation2 + $0x9c8] ss:$16 sps:$4 sm:$0xff]  }
 0x226   :  { %v5097_v46 = vpop.f32.mrf.mxu0  ;;  %5342 = vmatmul.mubr.bf16.vlgmr.msra.gmra.mxu0 %v8271_v20 }
 0x227   :  { %v5138_v47 = vpop.f32.mrf.mxu1  ;;  %5383 = vmatmul.mubr.bf16.vlgmr.msra.gmra.mxu1 %v8273_v21  ;;  %v5098_v51 = vadd.f32 %v5097_v46, %v8398_v22  ;;  %5392 = vmatpush1.bf16.msra.mxu0 %v7703_v44  ;;  %v7760_v44 = vld [vmem:[#allocation2 + $0xbc8] ss:$16 sps:$4 sm:$0xff]  }
 0x228   :  { %5433 = vmatpush1.bf16.msra.mxu1 %v7706_v49  ;;  %v5099_v55 = vpop.f32.mrf.mxu0  ;;  %5393 = vmatprep.subr.bf16.mxu0 %v7711_v52  ;;  %v7765_v49 = vld [vmem:[#allocation2 + $0x9ac] ss:$16 sps:$4 sm:$0xff]   ;;  %v7766_v46 = vld [vmem:[#allocation2 + $0xba8] ss:$16 sps:$4 sm:$0xff]  }
 0x229   :  { %v5140_v56 = vpop.f32.mrf.mxu1  ;;  %5434 = vmatprep.subr.bf16.mxu1 %v7714_v45  ;;  %v8408_v60 = vadd.f32 %v5138_v47, %v5098_v51  ;;  %v5100_v61 = vadd.f32 %v5099_v55, %v8403_v27  ;;  %5423 = vmatprep.mubr.bf16.mxu0 %v8280_v29  ;;  %v7721_v27 = vld [vmem:[#allocation2 + $0x888] ss:$16 sps:$4 sm:$0xff]   ;;  %v7768_v52 = vld [vmem:[#allocation2 + $0xbac] ss:$16 sps:$4 sm:$0xff]  }
 0x22a   :  { %5464 = vmatprep.mubr.bf16.mxu1 %v8285_v32  ;;  %v5101_v20 = vpop.f32.mrf.mxu0  ;;  %v7724_v29 = vld [vmem:[#allocation2 + $0xa88] ss:$16 sps:$4 sm:$0xff]   ;;  %v7729_v32 = vld [vmem:[#allocation2 + $0x86c] ss:$16 sps:$4 sm:$0xff]  }
 0x22b   :  { %v5142_v21 = vpop.f32.mrf.mxu1  ;;  %v8413_v22 = vadd.f32 %v5140_v56, %v5100_v61  ;;  %5394 = vmatpush1.bf16.msra.mxu0 %v7709_v53  ;;  %v7763_v45 = vld [vmem:[#allocation2 + $0x9a8] ss:$16 sps:$4 sm:$0xff]   ;;  %v7771_v47 = vld [vmem:[#allocation2 + $0x98c] ss:$16 sps:$4 sm:$0xff]  }
 0x22c   :  { %5435 = vmatpush1.bf16.msra.mxu1 %v7712_v54  ;;  %v5102_v0 = vpop.f32.mrf.mxu0  ;;  %5395 = vmatprep.subr.bf16.mxu0 %v7717_v58  ;;  %v7774_v51 = vld [vmem:[#allocation2 + $0xb8c] ss:$16 sps:$4 sm:$0xff]   ;;  %v7769_v53 = vld [vmem:[#allocation2 + $0x988] ss:$16 sps:$4 sm:$0xff]  }
 0x22d   :  { %v5143_v5 = vpop.f32.mrf.mxu1  ;;  %5436 = vmatprep.subr.bf16.mxu1 %v7720_v59  ;;  %v7772_v54 = vld [vmem:[#allocation2 + $0xb88] ss:$16 sps:$4 sm:$0xff]   ;;  %v7777_v55 = vld [vmem:[#allocation2 + $0x96c] ss:$16 sps:$4 sm:$0xff]  }
 0x22e   :  { %v7780_v56 = vld [vmem:[#allocation2 + $0xb6c] ss:$16 sps:$4 sm:$0xff]   ;;  %v7775_v58 = vld [vmem:[#allocation2 + $0x968] ss:$16 sps:$4 sm:$0xff]  }
 0x22f   :  { %5396 = vmatpush1.bf16.msra.mxu0 %v7715_v62  ;;  %v7778_v59 = vld [vmem:[#allocation2 + $0xb68] ss:$16 sps:$4 sm:$0xff]   ;;  %v7783_v61 = vld [vmem:[#allocation2 + $0x94c] ss:$16 sps:$4 sm:$0xff]  }
 0x230   :  { %5437 = vmatpush1.bf16.msra.mxu1 %v7718_v63  ;;  %5397 = vmatprep.subr.bf16.mxu0 %v7723_v6  ;;  %v7786_v20 = vld [vmem:[#allocation2 + $0xb4c] ss:$16 sps:$4 sm:$0xff]   ;;  %v7781_v21 = vld [vmem:[#allocation2 + $0x948] ss:$16 sps:$4 sm:$0xff]  }
 0x231   :  { %5438 = vmatprep.subr.bf16.mxu1 %v7726_v11  ;;  %v7784_v62 = vld [vmem:[#allocation2 + $0xb48] ss:$16 sps:$4 sm:$0xff]   ;;  %v7789_v63 = vld [vmem:[#allocation2 + $0x92c] ss:$16 sps:$4 sm:$0xff]  }
 0x232   :  { %v7792_v0 = vld [vmem:[#allocation2 + $0xb2c] ss:$16 sps:$4 sm:$0xff]   ;;  %v7787_v5 = vld [vmem:[#allocation2 + $0x928] ss:$16 sps:$4 sm:$0xff]  }
 0x233   :  { %5398 = vmatpush1.bf16.msra.mxu0 %v7721_v27  ;;  %v7790_v6 = vld [vmem:[#allocation2 + $0xb28] ss:$16 sps:$4 sm:$0xff]   ;;  %v7795_v11 = vld [vmem:[#allocation2 + $0x90c] ss:$16 sps:$4 sm:$0xff]  }
 0x234   :  { %5439 = vmatpush1.bf16.msra.mxu1 %v7724_v29  ;;  %5399 = vmatprep.subr.bf16.mxu0 %v7729_v32  ;;  %v7798_v27 = vld [vmem:[#allocation2 + $0xb0c] ss:$16 sps:$4 sm:$0xff]   ;;  %v7793_v29 = vld [vmem:[#allocation2 + $0x908] ss:$16 sps:$4 sm:$0xff]  }
 0x235   :  { %5440 = vmatprep.subr.bf16.mxu1 %v7732_v12  ;;  %v7796_v32 = vld [vmem:[#allocation2 + $0xb08] ss:$16 sps:$4 sm:$0xff]   ;;  %v7801_v12 = vld [vmem:[#allocation2 + $0xcec] ss:$16 sps:$4 sm:$0xff]  }
 0x237   :  { %5400 = vmatpush1.bf16.msra.mxu0 %v7727_v15  ;;  %v7804_v15 = vld [vmem:[#allocation2 + $0xeec] ss:$16 sps:$4 sm:$0xff]  }
 0x238   :  { %5441 = vmatpush1.bf16.msra.mxu1 %v7730_v16  ;;  %5401 = vmatprep.subr.bf16.mxu0 %v7735_v19  ;;  %v7799_v16 = vld [vmem:[#allocation2 + $0xce8] ss:$16 sps:$4 sm:$0xff]  }
 0x239   :  { %5442 = vmatprep.subr.bf16.mxu1 %v7738_v23  ;;  %v7802_v19 = vld [vmem:[#allocation2 + $0xee8] ss:$16 sps:$4 sm:$0xff]   ;;  %v7807_v23 = vld [vmem:[#allocation2 + $0xccc] ss:$16 sps:$4 sm:$0xff]  }
 0x23b   :  { %5402 = vmatpush1.bf16.msra.mxu0 %v7733_v24  ;;  %v7810_v24 = vld [vmem:[#allocation2 + $0xecc] ss:$16 sps:$4 sm:$0xff]  }
 0x23c   :  { %5443 = vmatpush1.bf16.msra.mxu1 %v7736_v25  ;;  %5403 = vmatprep.subr.bf16.mxu0 %v7741_v8 }
 0x23d   :  { %5444 = vmatprep.subr.bf16.mxu1 %v7744_v9 }
 0x23f   :  { %5404 = vmatpush1.bf16.msra.mxu0 %v7739_v28  ;;  %v7805_v28 = vld [vmem:[#allocation2 + $0xcc8] ss:$16 sps:$4 sm:$0xff]  }
 0x240   :  { %5445 = vmatpush1.bf16.msra.mxu1 %v7742_v30  ;;  %5405 = vmatprep.subr.bf16.mxu0 %v7747_v33  ;;  %v7808_v30 = vld [vmem:[#allocation2 + $0xec8] ss:$16 sps:$4 sm:$0xff]  }
 0x241   :  { %5446 = vmatprep.subr.bf16.mxu1 %v7750_v31 }
 0x243   :  { %5406 = vmatpush1.bf16.msra.mxu0 %v7745_v35  ;;  %v7813_v35 = vld [vmem:[#allocation2 + $0xcac] ss:$16 sps:$4 sm:$0xff]  }
 0x244   :  { %5447 = vmatpush1.bf16.msra.mxu1 %v7748_v26  ;;  %5407 = vmatprep.subr.bf16.mxu0 %v7753_v37  ;;  %v7816_v26 = vld [vmem:[#allocation2 + $0xeac] ss:$16 sps:$4 sm:$0xff]  }
 0x245   :  { %5448 = vmatprep.subr.bf16.mxu1 %v7756_v40 }
 0x247   :  { %5408 = vmatpush2.bf16.msra.mxu0 %v7751_v36  ;;  %v7811_v36 = vld [vmem:[#allocation2 + $0xca8] ss:$16 sps:$4 sm:$0xff]  }
 0x248   :  { %5449 = vmatpush2.bf16.msra.mxu1 %v7754_v39  ;;  %5409 = vmatprep.subr.bf16.mxu0 %v7759_v41  ;;  %v7814_v39 = vld [vmem:[#allocation2 + $0xea8] ss:$16 sps:$4 sm:$0xff]  }
 0x249   :  { %5450 = vmatprep.subr.bf16.mxu1 %v7762_v38 }
 0x24b   :  { %5410 = vmatpush2.bf16.msra.mxu0 %v7757_v34  ;;  %v7819_v34 = vld [vmem:[#allocation2 + $0xc8c] ss:$16 sps:$4 sm:$0xff]  }
 0x24c   :  { %5451 = vmatpush2.bf16.msra.mxu1 %v7760_v44  ;;  %5411 = vmatprep.subr.bf16.mxu0 %v7765_v49  ;;  %v7822_v44 = vld [vmem:[#allocation2 + $0xe8c] ss:$16 sps:$4 sm:$0xff]  }
 0x24d   :  { %5452 = vmatprep.subr.bf16.mxu1 %v7768_v52  ;;  %v7828_v49 = vld [vmem:[#allocation2 + $0xe6c] ss:$16 sps:$4 sm:$0xff]   ;;  %v7823_v52 = vld [vmem:[#allocation2 + $0xc68] ss:$16 sps:$4 sm:$0xff]  }
 0x24f   :  { %5412 = vmatpush2.bf16.msra.mxu0 %v7763_v45  ;;  %v7826_v45 = vld [vmem:[#allocation2 + $0xe68] ss:$16 sps:$4 sm:$0xff]  }
 0x250   :  { %5453 = vmatpush2.bf16.msra.mxu1 %v7766_v46  ;;  %5413 = vmatprep.subr.bf16.mxu0 %v7771_v47  ;;  %v7831_v46 = vld [vmem:[#allocation2 + $0xc4c] ss:$16 sps:$4 sm:$0xff]  }
 0x251   :  { %5454 = vmatprep.subr.bf16.mxu1 %v7774_v51  ;;  %v7834_v47 = vld [vmem:[#allocation2 + $0xe4c] ss:$16 sps:$4 sm:$0xff]   ;;  %v7829_v51 = vld [vmem:[#allocation2 + $0xc48] ss:$16 sps:$4 sm:$0xff]  }
 0x253   :  { %5414 = vmatpush2.bf16.msra.mxu0 %v7769_v53  ;;  %v7832_v53 = vld [vmem:[#allocation2 + $0xe48] ss:$16 sps:$4 sm:$0xff]  }
 0x254   :  { %5455 = vmatpush2.bf16.msra.mxu1 %v7772_v54  ;;  %5415 = vmatprep.subr.bf16.mxu0 %v7777_v55  ;;  %v7837_v54 = vld [vmem:[#allocation2 + $0xc2c] ss:$16 sps:$4 sm:$0xff]  }
 0x255   :  { %5456 = vmatprep.subr.bf16.mxu1 %v7780_v56  ;;  %v7840_v55 = vld [vmem:[#allocation2 + $0xe2c] ss:$16 sps:$4 sm:$0xff]   ;;  %v7835_v56 = vld [vmem:[#allocation2 + $0xc28] ss:$16 sps:$4 sm:$0xff]  }
 0x257   :  { %5416 = vmatpush2.bf16.msra.mxu0 %v7775_v58  ;;  %v7838_v58 = vld [vmem:[#allocation2 + $0xe28] ss:$16 sps:$4 sm:$0xff]  }
 0x258   :  { %5457 = vmatpush2.bf16.msra.mxu1 %v7778_v59  ;;  %5417 = vmatprep.subr.bf16.mxu0 %v7783_v61  ;;  %v7843_v59 = vld [vmem:[#allocation2 + $0xc0c] ss:$16 sps:$4 sm:$0xff]  }
 0x259   :  { %5458 = vmatprep.subr.bf16.mxu1 %v7786_v20  ;;  %v7846_v61 = vld [vmem:[#allocation2 + $0xe0c] ss:$16 sps:$4 sm:$0xff]   ;;  %v7841_v20 = vld [vmem:[#allocation2 + $0xc08] ss:$16 sps:$4 sm:$0xff]  }
 0x25b   :  { %5418 = vmatpush2.bf16.msra.mxu0 %v7781_v21  ;;  %v7844_v21 = vld [vmem:[#allocation2 + $0xe08] ss:$16 sps:$4 sm:$0xff]  }
 0x25c   :  { %5459 = vmatpush2.bf16.msra.mxu1 %v7784_v62  ;;  %5419 = vmatprep.subr.bf16.mxu0 %v7789_v63  ;;  %v7849_v62 = vld [vmem:[#allocation2 + $0xdec] ss:$16 sps:$4 sm:$0xff]  }
 0x25d   :  { %5460 = vmatprep.subr.bf16.mxu1 %v7792_v0  ;;  %v7852_v63 = vld [vmem:[#allocation2 + $0xfec] ss:$16 sps:$4 sm:$0xff]   ;;  %v7847_v0 = vld [vmem:[#allocation2 + $0xde8] ss:$16 sps:$4 sm:$0xff]  }
 0x25f   :  { %5420 = vmatpush2.bf16.msra.mxu0 %v7787_v5  ;;  %v7850_v5 = vld [vmem:[#allocation2 + $0xfe8] ss:$16 sps:$4 sm:$0xff]  }
 0x260   :  { %5461 = vmatpush2.bf16.msra.mxu1 %v7790_v6  ;;  %5421 = vmatprep.subr.bf16.mxu0 %v7795_v11  ;;  %v7855_v6 = vld [vmem:[#allocation2 + $0xdcc] ss:$16 sps:$4 sm:$0xff]  }
 0x261   :  { %5462 = vmatprep.subr.bf16.mxu1 %v7798_v27  ;;  %v7858_v11 = vld [vmem:[#allocation2 + $0xfcc] ss:$16 sps:$4 sm:$0xff]   ;;  %v7853_v27 = vld [vmem:[#allocation2 + $0xdc8] ss:$16 sps:$4 sm:$0xff]  }
 0x263   :  { %5422 = vmatpush2.bf16.msra.mxu0 %v7793_v29  ;;  %v7856_v29 = vld [vmem:[#allocation2 + $0xfc8] ss:$16 sps:$4 sm:$0xff]  }
 0x264   :  { %5463 = vmatpush2.bf16.msra.mxu1 %v7796_v32  ;;  %5473 = vmatprep.subr.bf16.mxu0 %v7801_v12  ;;  %v7861_v32 = vld [vmem:[#allocation2 + $0xdac] ss:$16 sps:$4 sm:$0xff]  }
 0x265   :  { %5514 = vmatprep.subr.bf16.mxu1 %v7804_v15  ;;  %v7864_v12 = vld [vmem:[#allocation2 + $0xfac] ss:$16 sps:$4 sm:$0xff]   ;;  %v7859_v15 = vld [vmem:[#allocation2 + $0xda8] ss:$16 sps:$4 sm:$0xff]  }
 0x266   :  { %v5179_v25 = vpop.f32.mrf.mxu0  ;;  %5424 = vmatmul.mubr.bf16.vlgmr.msra.gmra.mxu0 %v8298_v42 }
 0x267   :  { %v5220_v8 = vpop.f32.mrf.mxu1  ;;  %5465 = vmatmul.mubr.bf16.vlgmr.msra.gmra.mxu1 %v8300_v43  ;;  %v5180_v9 = vadd.f32 %v5179_v25, %v8408_v60  ;;  %5474 = vmatpush1.bf16.msra.mxu0 %v7799_v16  ;;  %v7862_v16 = vld [vmem:[#allocation2 + $0xfa8] ss:$16 sps:$4 sm:$0xff]  }
 0x268   :  { %5515 = vmatpush1.bf16.msra.mxu1 %v7802_v19  ;;  %v5181_v33 = vpop.f32.mrf.mxu0  ;;  %5475 = vmatprep.subr.bf16.mxu0 %v7807_v23  ;;  %v7867_v19 = vld [vmem:[#allocation2 + $0xd8c] ss:$16 sps:$4 sm:$0xff]   ;;  %v7868_v25 = vld [vmem:[#allocation2 + $0xf88] ss:$16 sps:$4 sm:$0xff]  }
 0x269   :  { %v5222_v31 = vpop.f32.mrf.mxu1  ;;  %5516 = vmatprep.subr.bf16.mxu1 %v7810_v24  ;;  %v8418_v37 = vadd.f32 %v5220_v8, %v5180_v9  ;;  %v5182_v40 = vadd.f32 %v5181_v33, %v8413_v22  ;;  %5505 = vmatprep.mubr.bf16.mxu0 %v8305_v48  ;;  %v7817_v22 = vld [vmem:[#allocation2 + $0xc88] ss:$16 sps:$4 sm:$0xff]   ;;  %v7870_v23 = vld [vmem:[#allocation2 + $0xf8c] ss:$16 sps:$4 sm:$0xff]  }
 0x26a   :  { %5546 = vmatprep.mubr.bf16.mxu1 %v8307_v50  ;;  %v5183_v42 = vpop.f32.mrf.mxu0  ;;  %v7820_v48 = vld [vmem:[#allocation2 + $0xe88] ss:$16 sps:$4 sm:$0xff]   ;;  %v7825_v50 = vld [vmem:[#allocation2 + $0xc6c] ss:$16 sps:$4 sm:$0xff]  }
 0x26b   :  { %v5224_v43 = vpop.f32.mrf.mxu1  ;;  %v8423_v60 = vadd.f32 %v5222_v31, %v5182_v40  ;;  %5476 = vmatpush1.bf16.msra.mxu0 %v7805_v28  ;;  %v7865_v24 = vld [vmem:[#allocation2 + $0xd88] ss:$16 sps:$4 sm:$0xff]   ;;  %v7873_v8 = vld [vmem:[#allocation2 + $0xd6c] ss:$16 sps:$4 sm:$0xff]   ;;  %vm5719_vm1 = vcmp.gt.f32.partialorder %v8418_v37, 0.0 }
 0x26c   :  { %5517 = vmatpush1.bf16.msra.mxu1 %v7808_v30  ;;  %v5184_v41 = vpop.f32.mrf.mxu0  ;;  %5477 = vmatprep.subr.bf16.mxu0 %v7813_v35  ;;  %v7876_v9 = vld [vmem:[#allocation2 + $0xf6c] ss:$16 sps:$4 sm:$0xff]   ;;  %v7871_v28 = vld [vmem:[#allocation2 + $0xd68] ss:$16 sps:$4 sm:$0xff]  }
 0x26d   :  { %v5225_v38 = vpop.f32.mrf.mxu1  ;;  %5518 = vmatprep.subr.bf16.mxu1 %v7816_v26  ;;  %v7874_v30 = vld [vmem:[#allocation2 + $0xf68] ss:$16 sps:$4 sm:$0xff]   ;;  %v7879_v33 = vld [vmem:[#allocation2 + $0xd4c] ss:$16 sps:$4 sm:$0xff]   ;;  %vm5720_vm0 = vcmp.gt.f32.partialorder %v8423_v60, 0.0 }
 0x26e   :  { %v7882_v31 = vld [vmem:[#allocation2 + $0xf4c] ss:$16 sps:$4 sm:$0xff]   ;;  %v7877_v35 = vld [vmem:[#allocation2 + $0xd48] ss:$16 sps:$4 sm:$0xff]  }
 0x26f   :  { %5478 = vmatpush1.bf16.msra.mxu0 %v7811_v36  ;;  %v7880_v26 = vld [vmem:[#allocation2 + $0xf48] ss:$16 sps:$4 sm:$0xff]   ;;  %v7885_v40 = vld [vmem:[#allocation2 + $0xd2c] ss:$16 sps:$4 sm:$0xff]  }
 0x270   :  { %5519 = vmatpush1.bf16.msra.mxu1 %v7814_v39  ;;  %5479 = vmatprep.subr.bf16.mxu0 %v7819_v34  ;;  %v7888_v42 = vld [vmem:[#allocation2 + $0xf2c] ss:$16 sps:$4 sm:$0xff]   ;;  %v7883_v43 = vld [vmem:[#allocation2 + $0xd28] ss:$16 sps:$4 sm:$0xff]  }
 0x271   :  { %5520 = vmatprep.subr.bf16.mxu1 %v7822_v44  ;;  %v7886_v36 = vld [vmem:[#allocation2 + $0xf28] ss:$16 sps:$4 sm:$0xff]   ;;  %v7891_v39 = vld [vmem:[#allocation2 + $0xd0c] ss:$16 sps:$4 sm:$0xff]   ;;  %v885_v44 = vsub.s32 2, %v8313_v57 }
 0x272   :  { %v7894_v41 = vld [vmem:[#allocation2 + $0xf0c] ss:$16 sps:$4 sm:$0xff]   ;;  %v7889_v38 = vld [vmem:[#allocation2 + $0xd08] ss:$16 sps:$4 sm:$0xff]  }
 0x273   :  { %5480 = vmatpush1.bf16.msra.mxu0 %v7817_v22  ;;  %v7892_v34 = vld [vmem:[#allocation2 + $0xf08] ss:$16 sps:$4 sm:$0xff]   ;;  %v7897_v22 = vld [vmem:[#allocation2 + $0x10ec] ss:$16 sps:$4 sm:$0xff]  }
 0x274   :  { %5521 = vmatpush1.bf16.msra.mxu1 %v7820_v48  ;;  %5481 = vmatprep.subr.bf16.mxu0 %v7825_v50  ;;  %v7900_v48 = vld [vmem:[#allocation2 + $0x12ec] ss:$16 sps:$4 sm:$0xff]   ;;  %v889_v50 = vsub.s32 3, %v8313_v57  ;;  %v7901_v57 = vld [vmem:[#allocation2 + $0x10c8] ss:$16 sps:$4 sm:$0xff]  }
 0x275   :  { %5522 = vmatprep.subr.bf16.mxu1 %v7828_v49  ;;  %v8123_v49 = vld [vmem:[#allocation4] sm:$0xf] }
 0x277   :  { %5482 = vmatpush1.bf16.msra.mxu0 %v7823_v52  ;;  %v886_v52 = vrot.slane %v8123_v49, %v885_v44  ;;  %v7952_v44 = vld [vmem:[#allocation2 + $0x13c8] ss:$16 sps:$4 sm:$0xff]  }
 0x278   :  { %5523 = vmatpush1.bf16.msra.mxu1 %v7826_v45  ;;  %5483 = vmatprep.subr.bf16.mxu0 %v7831_v46  ;;  %v7895_v45 = vld [vmem:[#allocation2 + $0x10e8] ss:$16 sps:$4 sm:$0xff]  }
 0x279   :  { %5524 = vmatprep.subr.bf16.mxu1 %v7834_v47  ;;  %v7898_v46 = vld [vmem:[#allocation2 + $0x12e8] ss:$16 sps:$4 sm:$0xff]   ;;  %v7903_v47 = vld [vmem:[#allocation2 + $0x10cc] ss:$16 sps:$4 sm:$0xff]  }
 0x27b   :  { %5484 = vmatpush1.bf16.msra.mxu0 %v7829_v51  ;;  %v7906_v51 = vld [vmem:[#allocation2 + $0x12cc] ss:$16 sps:$4 sm:$0xff]  }
 0x27c   :  { %5525 = vmatpush1.bf16.msra.mxu1 %v7832_v53  ;;  %5485 = vmatprep.subr.bf16.mxu0 %v7837_v54  ;;  %v890_v53 = vrot.slane %v8123_v49, %v889_v50  ;;  %v7955_v50 = vld [vmem:[#allocation2 + $0x11a8] ss:$16 sps:$4 sm:$0xff]  }
 0x27d   :  { %5526 = vmatprep.subr.bf16.mxu1 %v7840_v55  ;;  %v7958_v49 = vld [vmem:[#allocation2 + $0x13a8] ss:$16 sps:$4 sm:$0xff]  }
 0x27f   :  { %5486 = vmatpush1.bf16.msra.mxu0 %v7835_v56 }
 0x280   :  { %5527 = vmatpush1.bf16.msra.mxu1 %v7838_v58  ;;  %5487 = vmatprep.subr.bf16.mxu0 %v7843_v59  ;;  %v7904_v58 = vld [vmem:[#allocation2 + $0x12c8] ss:$16 sps:$4 sm:$0xff]  }
 0x281   :  { %5528 = vmatprep.subr.bf16.mxu1 %v7846_v61 }
 0x283   :  { %5488 = vmatpush1.bf16.msra.mxu0 %v7841_v20  ;;  %v7909_v20 = vld [vmem:[#allocation2 + $0x10ac] ss:$16 sps:$4 sm:$0xff]  }
 0x284   :  { %5529 = vmatpush1.bf16.msra.mxu1 %v7844_v21  ;;  %5489 = vmatprep.subr.bf16.mxu0 %v7849_v62  ;;  %v7912_v21 = vld [vmem:[#allocation2 + $0x12ac] ss:$16 sps:$4 sm:$0xff]  }
 0x285   :  { %5530 = vmatprep.subr.bf16.mxu1 %v7852_v63 }
 0x287   :  { %5490 = vmatpush2.bf16.msra.mxu0 %v7847_v0 }
 0x288   :  { %5531 = vmatpush2.bf16.msra.mxu1 %v7850_v5  ;;  %5491 = vmatprep.subr.bf16.mxu0 %v7855_v6  ;;  %v7907_v5 = vld [vmem:[#allocation2 + $0x10a8] ss:$16 sps:$4 sm:$0xff]  }
 0x289   :  { %5532 = vmatprep.subr.bf16.mxu1 %v7858_v11  ;;  %v7910_v6 = vld [vmem:[#allocation2 + $0x12a8] ss:$16 sps:$4 sm:$0xff]  }
 0x28b   :  { %5492 = vmatpush2.bf16.msra.mxu0 %v7853_v27 }
 0x28c   :  { %5533 = vmatpush2.bf16.msra.mxu1 %v7856_v29  ;;  %5493 = vmatprep.subr.bf16.mxu0 %v7861_v32  ;;  %v7915_v29 = vld [vmem:[#allocation2 + $0x108c] ss:$16 sps:$4 sm:$0xff]  }
 0x28d   :  { %5534 = vmatprep.subr.bf16.mxu1 %v7864_v12  ;;  %v7918_v32 = vld [vmem:[#allocation2 + $0x128c] ss:$16 sps:$4 sm:$0xff]   ;;  %v7913_v12 = vld [vmem:[#allocation2 + $0x1088] ss:$16 sps:$4 sm:$0xff]  }
 0x28f   :  { %5494 = vmatpush2.bf16.msra.mxu0 %v7859_v15  ;;  %v7924_v15 = vld [vmem:[#allocation2 + $0x126c] ss:$16 sps:$4 sm:$0xff]  }
 0x290   :  { %5535 = vmatpush2.bf16.msra.mxu1 %v7862_v16  ;;  %5495 = vmatprep.subr.bf16.mxu0 %v7867_v19  ;;  %v7919_v16 = vld [vmem:[#allocation2 + $0x1068] ss:$16 sps:$4 sm:$0xff]  }
 0x291   :  { %5536 = vmatprep.subr.bf16.mxu1 %v7870_v23  ;;  %v7922_v19 = vld [vmem:[#allocation2 + $0x1268] ss:$16 sps:$4 sm:$0xff]   ;;  %v7927_v23 = vld [vmem:[#allocation2 + $0x104c] ss:$16 sps:$4 sm:$0xff]  }
 0x293   :  { %5496 = vmatpush2.bf16.msra.mxu0 %v7865_v24  ;;  %v7930_v24 = vld [vmem:[#allocation2 + $0x124c] ss:$16 sps:$4 sm:$0xff]  }
 0x294   :  { %5537 = vmatpush2.bf16.msra.mxu1 %v7868_v25  ;;  %5497 = vmatprep.subr.bf16.mxu0 %v7873_v8  ;;  %v7925_v25 = vld [vmem:[#allocation2 + $0x1048] ss:$16 sps:$4 sm:$0xff]  }
 0x295   :  { %5538 = vmatprep.subr.bf16.mxu1 %v7876_v9  ;;  %v7928_v8 = vld [vmem:[#allocation2 + $0x1248] ss:$16 sps:$4 sm:$0xff]   ;;  %v7933_v9 = vld [vmem:[#allocation2 + $0x102c] ss:$16 sps:$4 sm:$0xff]  }
 0x297   :  { %5498 = vmatpush2.bf16.msra.mxu0 %v7871_v28  ;;  %v7936_v28 = vld [vmem:[#allocation2 + $0x122c] ss:$16 sps:$4 sm:$0xff]  }
 0x298   :  { %5539 = vmatpush2.bf16.msra.mxu1 %v7874_v30  ;;  %5499 = vmatprep.subr.bf16.mxu0 %v7879_v33  ;;  %v7931_v30 = vld [vmem:[#allocation2 + $0x1028] ss:$16 sps:$4 sm:$0xff]  }
 0x299   :  { %5540 = vmatprep.subr.bf16.mxu1 %v7882_v31  ;;  %v7934_v33 = vld [vmem:[#allocation2 + $0x1228] ss:$16 sps:$4 sm:$0xff]   ;;  %v7939_v31 = vld [vmem:[#allocation2 + $0x100c] ss:$16 sps:$4 sm:$0xff]  }
 0x29b   :  { %5500 = vmatpush2.bf16.msra.mxu0 %v7877_v35  ;;  %v7942_v35 = vld [vmem:[#allocation2 + $0x120c] ss:$16 sps:$4 sm:$0xff]  }
 0x29c   :  { %5541 = vmatpush2.bf16.msra.mxu1 %v7880_v26  ;;  %5501 = vmatprep.subr.bf16.mxu0 %v7885_v40  ;;  %v7937_v26 = vld [vmem:[#allocation2 + $0x1008] ss:$16 sps:$4 sm:$0xff]  }
 0x29d   :  { %5542 = vmatprep.subr.bf16.mxu1 %v7888_v42  ;;  %v7940_v40 = vld [vmem:[#allocation2 + $0x1208] ss:$16 sps:$4 sm:$0xff]   ;;  %v7945_v42 = vld [vmem:[#allocation2 + $0x11ec] ss:$16 sps:$4 sm:$0xff]  }
 0x29f   :  { %5502 = vmatpush2.bf16.msra.mxu0 %v7883_v43  ;;  %v7948_v43 = vld [vmem:[#allocation2 + $0x13ec] ss:$16 sps:$4 sm:$0xff]  }
 0x2a0   :  { %5543 = vmatpush2.bf16.msra.mxu1 %v7886_v36  ;;  %5503 = vmatprep.subr.bf16.mxu0 %v7891_v39  ;;  %v7943_v36 = vld [vmem:[#allocation2 + $0x11e8] ss:$16 sps:$4 sm:$0xff]  }
 0x2a1   :  { %5544 = vmatprep.subr.bf16.mxu1 %v7894_v41  ;;  %v7946_v39 = vld [vmem:[#allocation2 + $0x13e8] ss:$16 sps:$4 sm:$0xff]   ;;  %v7951_v41 = vld [vmem:[#allocation2 + $0x11cc] ss:$16 sps:$4 sm:$0xff]  }
 0x2a3   :  { %5504 = vmatpush2.bf16.msra.mxu0 %v7889_v38  ;;  %v7954_v38 = vld [vmem:[#allocation2 + $0x13cc] ss:$16 sps:$4 sm:$0xff]  }
 0x2a4   :  { %5545 = vmatpush2.bf16.msra.mxu1 %v7892_v34  ;;  %5555 = vmatprep.subr.bf16.mxu0 %v7897_v22  ;;  %v7949_v34 = vld [vmem:[#allocation2 + $0x11c8] ss:$16 sps:$4 sm:$0xff]   ;;  %v7957_v22 = vld [vmem:[#allocation2 + $0x11ac] ss:$16 sps:$4 sm:$0xff]  }
 0x2a5   :  { %5596 = vmatprep.subr.bf16.mxu1 %v7900_v48  ;;  %v7960_v48 = vld [vmem:[#allocation2 + $0x13ac] ss:$16 sps:$4 sm:$0xff]  }
 0x2a6   :  { %v5261_v54 = vpop.f32.mrf.mxu0  ;;  %5506 = vmatmul.mubr.bf16.vlgmr.msra.gmra.mxu0 %v8326_v7 }
 0x2a7   :  { %v5302_v55 = vpop.f32.mrf.mxu1  ;;  %5547 = vmatmul.mubr.bf16.vlgmr.msra.gmra.mxu1 %v8328_v10  ;;  %v5262_v56 = vadd.f32 %v5261_v54, %v886_v52  ;;  %5556 = vmatpush1.bf16.msra.mxu0 %v7895_v45  ;;  %v7963_v52 = vld [vmem:[#allocation2 + $0x118c] ss:$16 sps:$4 sm:$0xff]   ;;  %v7967_v54 = vld [vmem:[#allocation2 + $0x1168] ss:$16 sps:$4 sm:$0xff]  }
 0x2a8   :  { %5597 = vmatpush1.bf16.msra.mxu1 %v7898_v46  ;;  %v5263_v59 = vpop.f32.mrf.mxu0  ;;  %5557 = vmatprep.subr.bf16.mxu0 %v7903_v47  ;;  %v7966_v45 = vld [vmem:[#allocation2 + $0x138c] ss:$16 sps:$4 sm:$0xff]   ;;  %v7961_v46 = vld [vmem:[#allocation2 + $0x1188] ss:$16 sps:$4 sm:$0xff]  }
 0x2a9   :  { %v5304_v61 = vpop.f32.mrf.mxu1  ;;  %5598 = vmatprep.subr.bf16.mxu1 %v7906_v51  ;;  %v8429_v62 = vadd.f32 %v5302_v55, %v5262_v56  ;;  %v5264_v63 = vadd.f32 %v5263_v59, %v890_v53  ;;  %5587 = vmatprep.mubr.bf16.mxu0 %v8333_v17  ;;  %v7916_v17 = vld [vmem:[#allocation2 + $0x1288] ss:$16 sps:$4 sm:$0xff]   ;;  %v7969_v51 = vld [vmem:[#allocation2 + $0x116c] ss:$16 sps:$4 sm:$0xff]  }
 0x2aa   :  { %5628 = vmatprep.mubr.bf16.mxu1 %v8335_v18  ;;  %v5265_v7 = vpop.f32.mrf.mxu0  ;;  %v7921_v18 = vld [vmem:[#allocation2 + $0x106c] ss:$16 sps:$4 sm:$0xff]   ;;  %v7964_v47 = vld [vmem:[#allocation2 + $0x1388] ss:$16 sps:$4 sm:$0xff]  }
 0x2ab   :  { %v5306_v10 = vpop.f32.mrf.mxu1  ;;  %v8433_v0 = vadd.f32 %v5304_v61, %v5264_v63  ;;  %5558 = vmatpush1.bf16.msra.mxu0 %v7901_v57  ;;  %v7972_v53 = vld [vmem:[#allocation2 + $0x136c] ss:$16 sps:$4 sm:$0xff]   ;;  %v7970_v55 = vld [vmem:[#allocation2 + $0x1368] ss:$16 sps:$4 sm:$0xff]  }
 0x2ac   :  { %5599 = vmatpush1.bf16.msra.mxu1 %v7904_v58  ;;  %v5266_v11 = vpop.f32.mrf.mxu0  ;;  %5559 = vmatprep.subr.bf16.mxu0 %v7909_v20  ;;  %v7975_v56 = vld [vmem:[#allocation2 + $0x114c] ss:$16 sps:$4 sm:$0xff]   ;;  %v7973_v58 = vld [vmem:[#allocation2 + $0x1148] ss:$16 sps:$4 sm:$0xff]  }
 0x2ad   :  { %v5307_v27 = vpop.f32.mrf.mxu1  ;;  %5600 = vmatprep.subr.bf16.mxu1 %v7912_v21  ;;  %v7978_v57 = vld [vmem:[#allocation2 + $0x134c] ss:$16 sps:$4 sm:$0xff]   ;;  %v7976_v59 = vld [vmem:[#allocation2 + $0x1348] ss:$16 sps:$4 sm:$0xff]  }
 0x2ae   :  { %v7981_v61 = vld [vmem:[#allocation2 + $0x112c] ss:$16 sps:$4 sm:$0xff]   ;;  %v7979_v21 = vld [vmem:[#allocation2 + $0x1128] ss:$16 sps:$4 sm:$0xff]  }
 0x2af   :  { %5560 = vmatpush1.bf16.msra.mxu0 %v7907_v5  ;;  %v7984_v20 = vld [vmem:[#allocation2 + $0x132c] ss:$16 sps:$4 sm:$0xff]   ;;  %v7982_v63 = vld [vmem:[#allocation2 + $0x1328] ss:$16 sps:$4 sm:$0xff]  }
 0x2b0   :  { %5601 = vmatpush1.bf16.msra.mxu1 %v7910_v6  ;;  %5561 = vmatprep.subr.bf16.mxu0 %v7915_v29  ;;  %v7987_v7 = vld [vmem:[#allocation2 + $0x110c] ss:$16 sps:$4 sm:$0xff]   ;;  %v7985_v5 = vld [vmem:[#allocation2 + $0x1108] ss:$16 sps:$4 sm:$0xff]  }
 0x2b1   :  { %5602 = vmatprep.subr.bf16.mxu1 %v7918_v32  ;;  %v7990_v10 = vld [vmem:[#allocation2 + $0x130c] ss:$16 sps:$4 sm:$0xff]   ;;  %v7988_v6 = vld [vmem:[#allocation2 + $0x1308] ss:$16 sps:$4 sm:$0xff]  }
 0x2b2   :  { %v7993_v11 = vld [vmem:[#allocation2 + $0x14ec] ss:$16 sps:$4 sm:$0xff]   ;;  %v7991_v29 = vld [vmem:[#allocation2 + $0x14e8] ss:$16 sps:$4 sm:$0xff]  }
 0x2b3   :  { %5562 = vmatpush1.bf16.msra.mxu0 %v7913_v12  ;;  %v7996_v27 = vld [vmem:[#allocation2 + $0x16ec] ss:$16 sps:$4 sm:$0xff]   ;;  %v7994_v32 = vld [vmem:[#allocation2 + $0x16e8] ss:$16 sps:$4 sm:$0xff]  }
 0x2b4   :  { %5603 = vmatpush1.bf16.msra.mxu1 %v7916_v17  ;;  %5563 = vmatprep.subr.bf16.mxu0 %v7921_v18  ;;  %v7999_v12 = vld [vmem:[#allocation2 + $0x14cc] ss:$16 sps:$4 sm:$0xff]  }
 0x2b5   :  { %5604 = vmatprep.subr.bf16.mxu1 %v7924_v15  ;;  %v8002_v17 = vld [vmem:[#allocation2 + $0x16cc] ss:$16 sps:$4 sm:$0xff]  }
 0x2b7   :  { %5564 = vmatpush1.bf16.msra.mxu0 %v7919_v16 }
 0x2b8   :  { %5605 = vmatpush1.bf16.msra.mxu1 %v7922_v19  ;;  %5565 = vmatprep.subr.bf16.mxu0 %v7927_v23  ;;  %v7997_v19 = vld [vmem:[#allocation2 + $0x14c8] ss:$16 sps:$4 sm:$0xff]  }
 0x2b9   :  { %5606 = vmatprep.subr.bf16.mxu1 %v7930_v24  ;;  %v8000_v23 = vld [vmem:[#allocation2 + $0x16c8] ss:$16 sps:$4 sm:$0xff]  }
 0x2bb   :  { %5566 = vmatpush1.bf16.msra.mxu0 %v7925_v25 }
 0x2bc   :  { %5607 = vmatpush1.bf16.msra.mxu1 %v7928_v8  ;;  %5567 = vmatprep.subr.bf16.mxu0 %v7933_v9  ;;  %v8005_v8 = vld [vmem:[#allocation2 + $0x14ac] ss:$16 sps:$4 sm:$0xff]  }
 0x2bd   :  { %5608 = vmatprep.subr.bf16.mxu1 %v7936_v28  ;;  %v8008_v9 = vld [vmem:[#allocation2 + $0x16ac] ss:$16 sps:$4 sm:$0xff]  }
 0x2bf   :  { %5568 = vmatpush1.bf16.msra.mxu0 %v7931_v30 }
 0x2c0   :  { %5609 = vmatpush1.bf16.msra.mxu1 %v7934_v33  ;;  %5569 = vmatprep.subr.bf16.mxu0 %v7939_v31  ;;  %v8003_v33 = vld [vmem:[#allocation2 + $0x14a8] ss:$16 sps:$4 sm:$0xff]  }
 0x2c1   :  { %5610 = vmatprep.subr.bf16.mxu1 %v7942_v35  ;;  %v8006_v31 = vld [vmem:[#allocation2 + $0x16a8] ss:$16 sps:$4 sm:$0xff]  }
 0x2c3   :  { %5570 = vmatpush1.bf16.msra.mxu0 %v7937_v26 }
 0x2c4   :  { %5611 = vmatpush1.bf16.msra.mxu1 %v7940_v40  ;;  %5571 = vmatprep.subr.bf16.mxu0 %v7945_v42  ;;  %v8011_v40 = vld [vmem:[#allocation2 + $0x148c] ss:$16 sps:$4 sm:$0xff]  }
 0x2c5   :  { %5612 = vmatprep.subr.bf16.mxu1 %v7948_v43  ;;  %v8014_v42 = vld [vmem:[#allocation2 + $0x168c] ss:$16 sps:$4 sm:$0xff]  }
 0x2c6   :  { %v8020_v43 = vld [vmem:[#allocation2 + $0x166c] ss:$16 sps:$4 sm:$0xff]  }
 0x2c7   :  { %5572 = vmatpush2.bf16.msra.mxu0 %v7943_v36  ;;  %v8015_v36 = vld [vmem:[#allocation2 + $0x1468] ss:$16 sps:$4 sm:$0xff]  }
 0x2c8   :  { %5613 = vmatpush2.bf16.msra.mxu1 %v7946_v39  ;;  %5573 = vmatprep.subr.bf16.mxu0 %v7951_v41  ;;  %v8018_v39 = vld [vmem:[#allocation2 + $0x1668] ss:$16 sps:$4 sm:$0xff]   ;;  %v8023_v41 = vld [vmem:[#allocation2 + $0x144c] ss:$16 sps:$4 sm:$0xff]  }
 0x2c9   :  { %5614 = vmatprep.subr.bf16.mxu1 %v7954_v38  ;;  %v8026_v38 = vld [vmem:[#allocation2 + $0x164c] ss:$16 sps:$4 sm:$0xff]  }
 0x2cb   :  { %5574 = vmatpush2.bf16.msra.mxu0 %v7949_v34  ;;  %v8021_v34 = vld [vmem:[#allocation2 + $0x1448] ss:$16 sps:$4 sm:$0xff]  }
 0x2cc   :  { %5615 = vmatpush2.bf16.msra.mxu1 %v7952_v44  ;;  %5575 = vmatprep.subr.bf16.mxu0 %v7957_v22  ;;  %v8024_v44 = vld [vmem:[#allocation2 + $0x1648] ss:$16 sps:$4 sm:$0xff]   ;;  %v8029_v22 = vld [vmem:[#allocation2 + $0x142c] ss:$16 sps:$4 sm:$0xff]  }
 0x2cd   :  { %5616 = vmatprep.subr.bf16.mxu1 %v7960_v48  ;;  %v8032_v48 = vld [vmem:[#allocation2 + $0x162c] ss:$16 sps:$4 sm:$0xff]  }
 0x2cf   :  { %5576 = vmatpush2.bf16.msra.mxu0 %v7955_v50  ;;  %v8027_v50 = vld [vmem:[#allocation2 + $0x1428] ss:$16 sps:$4 sm:$0xff]  }
 0x2d0   :  { %5617 = vmatpush2.bf16.msra.mxu1 %v7958_v49  ;;  %5577 = vmatprep.subr.bf16.mxu0 %v7963_v52  ;;  %v8030_v49 = vld [vmem:[#allocation2 + $0x1628] ss:$16 sps:$4 sm:$0xff]   ;;  %v8035_v52 = vld [vmem:[#allocation2 + $0x140c] ss:$16 sps:$4 sm:$0xff]  }
 0x2d1   :  { %5618 = vmatprep.subr.bf16.mxu1 %v7966_v45  ;;  %v8038_v45 = vld [vmem:[#allocation2 + $0x160c] ss:$16 sps:$4 sm:$0xff]  }
 0x2d3   :  { %5578 = vmatpush2.bf16.msra.mxu0 %v7961_v46  ;;  %v8033_v46 = vld [vmem:[#allocation2 + $0x1408] ss:$16 sps:$4 sm:$0xff]  }
 0x2d4   :  { %5619 = vmatpush2.bf16.msra.mxu1 %v7964_v47  ;;  %5579 = vmatprep.subr.bf16.mxu0 %v7969_v51  ;;  %v8036_v47 = vld [vmem:[#allocation2 + $0x1608] ss:$16 sps:$4 sm:$0xff]   ;;  %v8041_v51 = vld [vmem:[#allocation2 + $0x15ec] ss:$16 sps:$4 sm:$0xff]  }
 0x2d5   :  { %5620 = vmatprep.subr.bf16.mxu1 %v7972_v53  ;;  %v8044_v53 = vld [vmem:[#allocation2 + $0x17ec] ss:$16 sps:$4 sm:$0xff]  }
 0x2d7   :  { %5580 = vmatpush2.bf16.msra.mxu0 %v7967_v54  ;;  %v8039_v54 = vld [vmem:[#allocation2 + $0x15e8] ss:$16 sps:$4 sm:$0xff]  }
 0x2d8   :  { %5621 = vmatpush2.bf16.msra.mxu1 %v7970_v55  ;;  %5581 = vmatprep.subr.bf16.mxu0 %v7975_v56  ;;  %v8042_v55 = vld [vmem:[#allocation2 + $0x17e8] ss:$16 sps:$4 sm:$0xff]   ;;  %v8047_v56 = vld [vmem:[#allocation2 + $0x15cc] ss:$16 sps:$4 sm:$0xff]  }
 0x2d9   :  { %5622 = vmatprep.subr.bf16.mxu1 %v7978_v57  ;;  %v8050_v57 = vld [vmem:[#allocation2 + $0x17cc] ss:$16 sps:$4 sm:$0xff]  }
 0x2db   :  { %5582 = vmatpush2.bf16.msra.mxu0 %v7973_v58  ;;  %v8045_v58 = vld [vmem:[#allocation2 + $0x15c8] ss:$16 sps:$4 sm:$0xff]  }
 0x2dc   :  { %5623 = vmatpush2.bf16.msra.mxu1 %v7976_v59  ;;  %5583 = vmatprep.subr.bf16.mxu0 %v7981_v61  ;;  %v8048_v59 = vld [vmem:[#allocation2 + $0x17c8] ss:$16 sps:$4 sm:$0xff]   ;;  %v8053_v61 = vld [vmem:[#allocation2 + $0x15ac] ss:$16 sps:$4 sm:$0xff]  }
 0x2dd   :  { %5624 = vmatprep.subr.bf16.mxu1 %v7984_v20  ;;  %v8056_v20 = vld [vmem:[#allocation2 + $0x17ac] ss:$16 sps:$4 sm:$0xff]  }
 0x2df   :  { %5584 = vmatpush2.bf16.msra.mxu0 %v7979_v21  ;;  %v8051_v21 = vld [vmem:[#allocation2 + $0x15a8] ss:$16 sps:$4 sm:$0xff]  }
 0x2e0   :  { %5625 = vmatpush2.bf16.msra.mxu1 %v7982_v63  ;;  %5585 = vmatprep.subr.bf16.mxu0 %v7987_v7  ;;  %v8054_v63 = vld [vmem:[#allocation2 + $0x17a8] ss:$16 sps:$4 sm:$0xff]   ;;  %v8059_v7 = vld [vmem:[#allocation2 + $0x158c] ss:$16 sps:$4 sm:$0xff]  }
 0x2e1   :  { %5626 = vmatprep.subr.bf16.mxu1 %v7990_v10  ;;  %v8062_v10 = vld [vmem:[#allocation2 + $0x178c] ss:$16 sps:$4 sm:$0xff]  }
 0x2e3   :  { %5586 = vmatpush2.bf16.msra.mxu0 %v7985_v5  ;;  %v8057_v5 = vld [vmem:[#allocation2 + $0x1588] ss:$16 sps:$4 sm:$0xff]  }
 0x2e4   :  { %5627 = vmatpush2.bf16.msra.mxu1 %v7988_v6  ;;  %5637 = vmatprep.subr.bf16.mxu0 %v7993_v11  ;;  %v8060_v6 = vld [vmem:[#allocation2 + $0x1788] ss:$16 sps:$4 sm:$0xff]   ;;  %v8065_v11 = vld [vmem:[#allocation2 + $0x156c] ss:$16 sps:$4 sm:$0xff]  }
 0x2e5   :  { %5678 = vmatprep.subr.bf16.mxu1 %v7996_v27  ;;  %v8068_v27 = vld [vmem:[#allocation2 + $0x176c] ss:$16 sps:$4 sm:$0xff]  }
 0x2e6   :  { %v5343_v18 = vpop.f32.mrf.mxu0  ;;  %5588 = vmatmul.mubr.bf16.vlgmr.msra.gmra.mxu0 %v8357_v3 }
 0x2e7   :  { %v5384_v15 = vpop.f32.mrf.mxu1  ;;  %5629 = vmatmul.mubr.bf16.vlgmr.msra.gmra.mxu1 %v8359_v4  ;;  %v5344_v16 = vadd.f32 %v5343_v18, %v8429_v62  ;;  %5638 = vmatpush1.bf16.msra.mxu0 %v7991_v29  ;;  %v8063_v29 = vld [vmem:[#allocation2 + $0x1568] ss:$16 sps:$4 sm:$0xff]  }
 0x2e8   :  { %5679 = vmatpush1.bf16.msra.mxu1 %v7994_v32  ;;  %v5345_v24 = vpop.f32.mrf.mxu0  ;;  %5639 = vmatprep.subr.bf16.mxu0 %v7999_v12  ;;  %v8066_v32 = vld [vmem:[#allocation2 + $0x1768] ss:$16 sps:$4 sm:$0xff]   ;;  %v8071_v12 = vld [vmem:[#allocation2 + $0x154c] ss:$16 sps:$4 sm:$0xff]  }
 0x2e9   :  { %v5386_v25 = vpop.f32.mrf.mxu1  ;;  %5680 = vmatprep.subr.bf16.mxu1 %v8002_v17  ;;  %v8438_v28 = vadd.f32 %v5384_v15, %v5344_v16  ;;  %v5346_v30 = vadd.f32 %v5345_v24, %v8433_v0  ;;  %5669 = vmatprep.mubr.bf16.mxu0 %v8361_v13  ;;  %v8009_v0 = vld [vmem:[#allocation2 + $0x1488] ss:$16 sps:$4 sm:$0xff]   ;;  %v8074_v17 = vld [vmem:[#allocation2 + $0x174c] ss:$16 sps:$4 sm:$0xff]  }
 0x2ea   :  { %5710 = vmatprep.mubr.bf16.mxu1 %v8363_v14  ;;  %v5347_v3 = vpop.f32.mrf.mxu0  ;;  %v8012_v13 = vld [vmem:[#allocation2 + $0x1688] ss:$16 sps:$4 sm:$0xff]   ;;  %v8017_v14 = vld [vmem:[#allocation2 + $0x146c] ss:$16 sps:$4 sm:$0xff]  }
 0x2eb   :  { %v5388_v4 = vpop.f32.mrf.mxu1  ;;  %v8443_v62 = vadd.f32 %v5386_v25, %v5346_v30  ;;  %5640 = vmatpush1.bf16.msra.mxu0 %v7997_v19  ;;  %v8069_v18 = vld [vmem:[#allocation2 + $0x1548] ss:$16 sps:$4 sm:$0xff]   ;;  %v8077_v16 = vld [vmem:[#allocation2 + $0x152c] ss:$16 sps:$4 sm:$0xff]  }
 0x2ec   :  { %5681 = vmatpush1.bf16.msra.mxu1 %v8000_v23  ;;  %v5348_v35 = vpop.f32.mrf.mxu0  ;;  %5641 = vmatprep.subr.bf16.mxu0 %v8005_v8  ;;  %v8072_v15 = vld [vmem:[#allocation2 + $0x1748] ss:$16 sps:$4 sm:$0xff]   ;;  %v8080_v19 = vld [vmem:[#allocation2 + $0x172c] ss:$16 sps:$4 sm:$0xff]  }
 0x2ed   :  { %v5389_v26 = vpop.f32.mrf.mxu1  ;;  %5682 = vmatprep.subr.bf16.mxu1 %v8008_v9  ;;  %v8075_v23 = vld [vmem:[#allocation2 + $0x1528] ss:$16 sps:$4 sm:$0xff]   ;;  %v8083_v25 = vld [vmem:[#allocation2 + $0x150c] ss:$16 sps:$4 sm:$0xff]   ;;  %v5724_v9 = vmul.f32 0.1, %v8423_v60 }
 0x2ee   :  { %v8078_v24 = vld [vmem:[#allocation2 + $0x1728] ss:$16 sps:$4 sm:$0xff]   ;;  %v8086_v8 = vld [vmem:[#allocation2 + $0x170c] ss:$16 sps:$4 sm:$0xff]  }
 0x2ef   :  { %5642 = vmatpush1.bf16.msra.mxu0 %v8003_v33  ;;  %v8081_v30 = vld [vmem:[#allocation2 + $0x1508] ss:$16 sps:$4 sm:$0xff]   ;;  %v8087_v4 = vld [vmem:[#allocation6 + $0x78] sm:$0xff]   ;;  %v5728_v33 = vsel %vm5720_vm0, %v8423_v60, %v5724_v9  ;;  %v8091_v60 = vld [vmem:[#allocation6 + $0x68] sm:$0xff]  }
 0x2f0   :  { %5683 = vmatpush1.bf16.msra.mxu1 %v8006_v31  ;;  %5643 = vmatprep.subr.bf16.mxu0 %v8011_v40  ;;  %v8084_v3 = vld [vmem:[#allocation2 + $0x1708] ss:$16 sps:$4 sm:$0xff]   ;;  %v8088_v31 = vld [vmem:[#allocation6 + $0x38] sm:$0xff]   ;;  %v5732_v26 = vpack.c.bf16 %v5728_v33, %v5728_v33 }
 0x2f1   :  { %5684 = vmatprep.subr.bf16.mxu1 %v8014_v42  ;;  %v8089_v35 = vld [vmem:[#allocation6 + $0x70] sm:$0xff]  }
 0x2f3   :  { %5644 = vmatpush1.bf16.msra.mxu0 %v8009_v0 }
 0x2f4   :  { %5685 = vmatpush1.bf16.msra.mxu1 %v8012_v13  ;;  %5645 = vmatprep.subr.bf16.mxu0 %v8017_v14  ;;  %v8090_v13 = vld [vmem:[#allocation6 + $0x30] sm:$0xff]  }
 0x2f5   :  { %5686 = vmatprep.subr.bf16.mxu1 %v8020_v43 }
 0x2f7   :  { %5646 = vmatpush1.bf16.msra.mxu0 %v8015_v36 }
 0x2f8   :  { %5687 = vmatpush1.bf16.msra.mxu1 %v8018_v39  ;;  %5647 = vmatprep.subr.bf16.mxu0 %v8023_v41 }
 0x2f9   :  { %5688 = vmatprep.subr.bf16.mxu1 %v8026_v38 }
 0x2fb   :  { %5648 = vmatpush1.bf16.msra.mxu0 %v8021_v34 }
 0x2fc   :  { %5689 = vmatpush1.bf16.msra.mxu1 %v8024_v44  ;;  %5649 = vmatprep.subr.bf16.mxu0 %v8029_v22  ;;  %v8092_v44 = vld [vmem:[#allocation6 + $0x28] sm:$0xff]  }
 0x2fd   :  { %5690 = vmatprep.subr.bf16.mxu1 %v8032_v48  ;;  %v8104_v48 = vld [vmem:[#allocation6 + $0xb8] sm:$0xff]  }
 0x2ff   :  { %5650 = vmatpush1.bf16.msra.mxu0 %v8027_v50  ;;  %v8105_v50 = vld [vmem:[#allocation6 + $0xf0] sm:$0xff]  }
 0x300   :  { %5691 = vmatpush1.bf16.msra.mxu1 %v8030_v49  ;;  %5651 = vmatprep.subr.bf16.mxu0 %v8035_v52  ;;  %v8094_v49 = vld [vmem:[#allocation6 + $0x20] sm:$0xff]   ;;  %v8106_v52 = vld [vmem:[#allocation6 + $0xb0] sm:$0xff]  }
 0x301   :  { %5692 = vmatprep.subr.bf16.mxu1 %v8038_v45  ;;  %v8095_v45 = vld [vmem:[#allocation6 + $0x58] sm:$0xff]  }
 0x303   :  { %5652 = vmatpush1.bf16.msra.mxu0 %v8033_v46  ;;  %v8096_v46 = vld [vmem:[#allocation6 + $0x18] sm:$0xff]  }
 0x304   :  { %5693 = vmatpush1.bf16.msra.mxu1 %v8036_v47  ;;  %5653 = vmatprep.subr.bf16.mxu0 %v8041_v51  ;;  %v8108_v47 = vld [vmem:[#allocation6 + $0xa8] sm:$0xff]   ;;  %v8097_v51 = vld [vmem:[#allocation6 + $0x50] sm:$0xff]  }
 0x305   :  { %5694 = vmatprep.subr.bf16.mxu1 %v8044_v53  ;;  %v8109_v53 = vld [vmem:[#allocation6 + $0xe0] sm:$0xff]  }
 0x307   :  { %5654 = vmatpush2.bf16.msra.mxu0 %v8039_v54  ;;  %v8098_v54 = vld [vmem:[#allocation6 + $0x10] sm:$0xff]  }
 0x308   :  { %5695 = vmatpush2.bf16.msra.mxu1 %v8042_v55  ;;  %5655 = vmatprep.subr.bf16.mxu0 %v8047_v56  ;;  %v8110_v55 = vld [vmem:[#allocation6 + $0xa0] sm:$0xff]   ;;  %v8099_v56 = vld [vmem:[#allocation6 + $0x48] sm:$0xff]  }
 0x309   :  { %5696 = vmatprep.subr.bf16.mxu1 %v8050_v57  ;;  %v8111_v57 = vld [vmem:[#allocation6 + $0xd8] sm:$0xff]  }
 0x30b   :  { %5656 = vmatpush2.bf16.msra.mxu0 %v8045_v58  ;;  %v8100_v58 = vld [vmem:[#allocation6 + $0x8] sm:$0xff]  }
 0x30c   :  { %5697 = vmatpush2.bf16.msra.mxu1 %v8048_v59  ;;  %5657 = vmatprep.subr.bf16.mxu0 %v8053_v61  ;;  %v8112_v59 = vld [vmem:[#allocation6 + $0x98] sm:$0xff]   ;;  %v8101_v61 = vld [vmem:[#allocation6 + $0x40] sm:$0xff]  }
 0x30d   :  { %5698 = vmatprep.subr.bf16.mxu1 %v8056_v20  ;;  %v5723_v20 = vmul.f32 0.1, %v8418_v37 }
 0x30f   :  { %5658 = vmatpush2.bf16.msra.mxu0 %v8051_v21  ;;  %v8102_v21 = vld [vmem:[#allocation6] sm:$0xff]  }
 0x310   :  { %5699 = vmatpush2.bf16.msra.mxu1 %v8054_v63  ;;  %5659 = vmatprep.subr.bf16.mxu0 %v8059_v7  ;;  %v5727_v63 = vsel %vm5719_vm1, %v8418_v37, %v5723_v20 }
 0x311   :  { %5700 = vmatprep.subr.bf16.mxu1 %v8062_v10  ;;  %v5731_v7 = vpack.c.bf16 %v5727_v63, %v5727_v63  ;;  %v8113_v10 = vld [vmem:[#allocation6 + $0xd0] sm:$0xff]  }
 0x313   :  { %5660 = vmatpush2.bf16.msra.mxu0 %v8057_v5 }
 0x314   :  { %5701 = vmatpush2.bf16.msra.mxu1 %v8060_v6  ;;  %5661 = vmatprep.subr.bf16.mxu0 %v8065_v11  ;;  %v8114_v11 = vld [vmem:[#allocation6 + $0x90] sm:$0xff]  }
 0x315   :  { %5702 = vmatprep.subr.bf16.mxu1 %v8068_v27 }
 0x317   :  { %5662 = vmatpush2.bf16.msra.mxu0 %v8063_v29 }
 0x318   :  { %5703 = vmatpush2.bf16.msra.mxu1 %v8066_v32  ;;  %5663 = vmatprep.subr.bf16.mxu0 %v8071_v12 }
 0x319   :  { %5704 = vmatprep.subr.bf16.mxu1 %v8074_v17 }
 0x31b   :  { %5664 = vmatpush2.bf16.msra.mxu0 %v8069_v18  ;;  %v8115_v18 = vld [vmem:[#allocation6 + $0xc8] sm:$0xff]  }
 0x31c   :  { %5705 = vmatpush2.bf16.msra.mxu1 %v8072_v15  ;;  %5665 = vmatprep.subr.bf16.mxu0 %v8077_v16 }
 0x31d   :  { %5706 = vmatprep.subr.bf16.mxu1 %v8080_v19  ;;  %v8116_v19 = vld [vmem:[#allocation6 + $0x88] sm:$0xff]  }
 0x31f   :  { %5666 = vmatpush2.bf16.msra.mxu0 %v8075_v23 }
 0x320   :  { %5707 = vmatpush2.bf16.msra.mxu1 %v8078_v24  ;;  %5667 = vmatprep.subr.bf16.mxu0 %v8083_v25  ;;  %v8117_v25 = vld [vmem:[#allocation6 + $0xc0] sm:$0xff]  }
 0x321   :  { %5708 = vmatprep.subr.bf16.mxu1 %v8086_v8  ;;  %v8118_v8 = vld [vmem:[#allocation6 + $0x80] sm:$0xff]  }
 0x323   :  { %5668 = vmatpush2.bf16.msra.mxu0 %v8081_v30 }
 0x324   :  { %5709 = vmatpush2.bf16.msra.mxu1 %v8084_v3  ;;  %6884 = vmatprep.subr.bf16.mxu0 %v8087_v4 }
 0x326   :  { %v5425_v40 = vpop.f32.mrf.mxu0  ;;  %5670 = vmatmul.mubr.bf16.vlgmr.msra.gmra.mxu0 %v8381_v1  ;;  %v8093_v1 = vld [vmem:[#allocation6 + $0x60] sm:$0xff]  }
 0x327   :  { %v5466_v42 = vpop.f32.mrf.mxu1  ;;  %5711 = vmatmul.mubr.bf16.vlgmr.msra.gmra.mxu1 %v8383_v2  ;;  %v5426_v0 = vadd.f32 %v5425_v40, %v8438_v28  ;;  %6885 = vmatpush3.bf16.msra.mxu0 %v8088_v31  ;;  %v8103_v28 = vld [vmem:[#allocation6 + $0xf8] sm:$0xff]  }
 0x328   :  { %6023 = vmatprep.mubr.bf16.mxu0 %v5732_v26  ;;  %v5427_v14 = vpop.f32.mrf.mxu0  ;;  %6886 = vmatprep.subr.bf16.mxu0 %v8089_v35 }
 0x329   :  { %v5468_v43 = vpop.f32.mrf.mxu1  ;;  %v5467_v36 = vadd.f32 %v5466_v42, %v5426_v0  ;;  %v5428_v39 = vadd.f32 %v5427_v14, %v8443_v62  ;;  %6906 = vmatprep.subr.bf16.mxu1 %v8103_v28  ;;  %v8107_v62 = vld [vmem:[#allocation6 + $0xe8] sm:$0xff]  }
 0x32a   :  { %v5429_v41 = vpop.f32.mrf.mxu0  ;;  %6907 = vmatpush3.bf16.msra.mxu1 %v8104_v48 }
 0x32b   :  { %v5470_v38 = vpop.f32.mrf.mxu1  ;;  %v5469_v34 = vadd.f32 %v5468_v43, %v5428_v39  ;;  %6887 = vmatpush3.bf16.msra.mxu0 %v8090_v13  ;;  %6908 = vmatprep.subr.bf16.mxu1 %v8105_v50 }
 0x32c   :  { %v5430_v22 = vpop.f32.mrf.mxu0  ;;  %6888 = vmatprep.subr.bf16.mxu0 %v8091_v60 }
 0x32d   :  { %v5471_v2 = vpop.f32.mrf.mxu1 }
 0x32e   :  { %6909 = vmatpush3.bf16.msra.mxu1 %v8106_v52 }
 0x32f   :  { %6889 = vmatpush3.bf16.msra.mxu0 %v8092_v44  ;;  %6910 = vmatprep.subr.bf16.mxu1 %v8107_v62 }
 0x330   :  { %6890 = vmatprep.subr.bf16.mxu0 %v8093_v1 }
 0x332   :  { %6911 = vmatpush3.bf16.msra.mxu1 %v8108_v47 }
 0x333   :  { %6891 = vmatpush3.bf16.msra.mxu0 %v8094_v49  ;;  %6912 = vmatprep.subr.bf16.mxu1 %v8109_v53 }
 0x334   :  { %6892 = vmatprep.subr.bf16.mxu0 %v8095_v45 }
 0x336   :  { %6913 = vmatpush3.bf16.msra.mxu1 %v8110_v55 }
 0x337   :  { %6893 = vmatpush3.bf16.msra.mxu0 %v8096_v46  ;;  %6914 = vmatprep.subr.bf16.mxu1 %v8111_v57 }
 0x338   :  { %6894 = vmatprep.subr.bf16.mxu0 %v8097_v51 }
 0x33a   :  { %6915 = vmatpush3.bf16.msra.mxu1 %v8112_v59 }
 0x33b   :  { %6895 = vmatpush3.bf16.msra.mxu0 %v8098_v54  ;;  %6916 = vmatprep.subr.bf16.mxu1 %v8113_v10 }
 0x33c   :  { %6896 = vmatprep.subr.bf16.mxu0 %v8099_v56 }
 0x33e   :  { %6917 = vmatpush3.bf16.msra.mxu1 %v8114_v11 }
 0x33f   :  { %6897 = vmatpush3.bf16.msra.mxu0 %v8100_v58  ;;  %6918 = vmatprep.subr.bf16.mxu1 %v8115_v18 }
 0x340   :  { %6898 = vmatprep.subr.bf16.mxu0 %v8101_v61 }
 0x342   :  { %6919 = vmatpush3.bf16.msra.mxu1 %v8116_v19 }
 0x343   :  { %6899 = vmatpush3.bf16.msra.mxu0 %v8102_v21  ;;  %6920 = vmatprep.subr.bf16.mxu1 %v8117_v25 }
 0x346   :  { %6024 = vmatmul.mubr.bf16.vlgmr.msra.gmra.mxu0 %v5731_v7  ;;  %6921 = vmatpush3.bf16.msra.mxu1 %v8118_v8 }
 0x366   :  { %v5507_v5 = vpop.f32.mrf.mxu0 }
 0x367   :  { %v5548_v6 = vpop.f32.mrf.mxu1  ;;  %v5508_v27 = vadd.f32 %v5507_v5, %v5467_v36 }
 0x368   :  { %v5509_v29 = vpop.f32.mrf.mxu0 }
 0x369   :  { %v5550_v32 = vpop.f32.mrf.mxu1  ;;  %v5549_v12 = vadd.f32 %v5548_v6, %v5508_v27  ;;  %v5510_v17 = vadd.f32 %v5509_v29, %v5469_v34 }
 0x36a   :  { %v5511_v15 = vpop.f32.mrf.mxu0 }
 0x36b   :  { %v5552_v16 = vpop.f32.mrf.mxu1  ;;  %v5551_v23 = vadd.f32 %v5550_v32, %v5510_v17 }
 0x36c   :  { %v5512_v37 = vpop.f32.mrf.mxu0 }
 0x36d   :  { %v5553_v24 = vpop.f32.mrf.mxu1 }
 0x3a6   :  { %v5589_v9 = vpop.f32.mrf.mxu0 }
 0x3a7   :  { %v5630_v30 = vpop.f32.mrf.mxu1  ;;  %v5590_v3 = vadd.f32 %v5589_v9, %v5549_v12 }
 0x3a8   :  { %v5591_v4 = vpop.f32.mrf.mxu0 }
 0x3a9   :  { %v5632_v33 = vpop.f32.mrf.mxu1  ;;  %v5631_v31 = vadd.f32 %v5630_v30, %v5590_v3  ;;  %v5592_v0 = vadd.f32 %v5591_v4, %v5551_v23 }
 0x3aa   :  { %v5593_v35 = vpop.f32.mrf.mxu0 }
 0x3ab   :  { %v5634_v26 = vpop.f32.mrf.mxu1  ;;  %v5633_v43 = vadd.f32 %v5632_v33, %v5592_v0 }
 0x3ac   :  { %v5594_v40 = vpop.f32.mrf.mxu0 }
 0x3ad   :  { %v5635_v42 = vpop.f32.mrf.mxu1 }
 0x3e6   :  { %v5671_v13 = vpop.f32.mrf.mxu0 }
 0x3e7   :  { %v5712_v14 = vpop.f32.mrf.mxu1  ;;  %v5672_v60 = vadd.f32 %v5671_v13, %v5631_v31 }
 0x3e8   :  { %v5673_v36 = vpop.f32.mrf.mxu0 }
 0x3e9   :  { %v5714_v39 = vpop.f32.mrf.mxu1  ;;  %v5713_v41 = vadd.f32 %v5712_v14, %v5672_v60  ;;  %v5674_v38 = vadd.f32 %v5673_v36, %v5633_v43 }
 0x3ea   :  { %v5675_v34 = vpop.f32.mrf.mxu0 }
 0x3eb   :  { %v5716_v44 = vpop.f32.mrf.mxu1  ;;  %vm5721_vm2 = vcmp.gt.f32.partialorder %v5713_v41, 0.0  ;;  %v5725_v1 = vmul.f32 0.1, %v5713_v41  ;;  %v5715_v22 = vadd.f32 %v5714_v39, %v5674_v38 }
 0x3ec   :  { %v5676_v2 = vpop.f32.mrf.mxu0 }
 0x3ed   :  { %v5717_v28 = vpop.f32.mrf.mxu1  ;;  %vm5722_vm3 = vcmp.gt.f32.partialorder %v5715_v22, 0.0  ;;  %v5726_v48 = vmul.f32 0.1, %v5715_v22  ;;  %v5729_v50 = vsel %vm5721_vm2, %v5713_v41, %v5725_v1 }
 0x3ee   :  { %v5733_v45 = vpack.c.bf16 %v5729_v50, %v5729_v50 }
 0x3ef   :  { %v5730_v49 = vsel %vm5722_vm3, %v5715_v22, %v5726_v48 }
 0x3f0   :  { %v5734_v52 = vpack.c.bf16 %v5730_v49, %v5730_v49 }
 0x3f2   :  { %6063 = vmatprep.mubr.bf16.mxu1 %v5734_v52 }
 0x3f3   :  { %6064 = vmatmul.mubr.bf16.vlgmr.msra.gmra.mxu1 %v5733_v45 }
 0x406   :  { %v6900_v62 = vpop.f32.mrf.mxu0 }
 0x408   :  { %v6901_v46 = vpop.f32.mrf.mxu0 }
 0x409   :  { %v6902_v47 = vadd.f32 %v6901_v46, %v6900_v62 }
 0x40a   :  { %v6903_v51 = vpop.f32.mrf.mxu0 }
 0x40c   :  { %v6904_v53 = vpop.f32.mrf.mxu0 }
 0x4b3   :  { %v6922_v54 = vpop.f32.mrf.mxu1 }
 0x4b5   :  { %v6923_v55 = vpop.f32.mrf.mxu1 }
 0x4b6   :  { %v6924_v56 = vadd.f32 %v6923_v55, %v6922_v54 }
 0x4b7   :  { %v6925_v57 = vpop.f32.mrf.mxu1 }
 0x4b8   :  { %v6066_v58 = vadd.f32 %v6924_v56, %v6902_v47 }
 0x4b9   :  { %v6926_v59 = vpop.f32.mrf.mxu1 }
 0x4ba   :  { %v6071_v61 = vsub.f32 0.0, %v6066_v58 }
 0x4bc   :  { %v6072_v20 = vmul.f32 1.442695, %v6071_v61 }
 0x4be   :  { %8119 = vpow2.f32 %v6072_v20 }
 0x4cb   :  { %v8120_v21 = vpop.eup %8119 }
 0x4cc   :  { %v6074_v63 = vadd.f32 1.0, %v8120_v21 }
 0x4ce   :  { %8121 = vrcp.f32 %v6074_v63 }
 0x4db   :  { %v8122_v7 = vpop.eup %8121 }
 0x4dc   :  { %6077 = vst [vmem:[%s8462_s4] sm:$0xff] %v8122_v7 }
 0x4dd   :  { %6082 = vsyncpa [#allocation3], 1 }
 0x4de   :  { %6083 = vsyncpa [#allocation5], 1 }

</bundles_post_ra>
